<compile_context>
chip_gen: v5e
topology: v5e:2x2
jax: 0.10.0
libtpu: 0.0.40
codegen_flags: <defaults>
</compile_context>

<pallas_src>
import functools

import jax
import jax.numpy as jnp
from jax import lax
from jax.experimental import pallas as pl
from jax.experimental.pallas import tpu as pltpu
import numpy as np


def _mixvpr_kernel(x_ref, ln_g_ref, ln_b_ref, w1t_ref, b1_ref, w2t_ref, b2_ref,
                   wct_ref, wrt_ref, bcr_ref, out_ref, *, mix_depth, hw):
    bt, C, HWP = x_ref.shape
    M = bt * C
    # Fold the batch tile into the matmul M dimension (rows are independent
    # through LayerNorm + the mixer MLP).
    x = x_ref[...].reshape(M, HWP).astype(jnp.float32)
    inv_hw = 1.0 / float(hw)
    npad = float(HWP - hw)

    # ---- FeatureMixer layers (token-mixing MLP over the HW axis) ----
    # Pad lanes of x are exactly zero (zero-padded input, zero-padded W2^T/b2),
    # so no lane mask is needed: sum(x) only sees true lanes, and
    # sum(centered^2) is corrected by npad*mu^2 for the pad lanes.
    # TODO(synk): for very large HW on v7x (64 MiB VMEM), stream per-layer
    # W1^T/W2^T via a depth grid axis or emit_pipeline instead of keeping the
    # full mix_depth weight stacks resident.
    for d in range(mix_depth):
        mu = jnp.sum(x, axis=-1, keepdims=True) * inv_hw
        centered = x - mu
        var = (jnp.sum(centered * centered, axis=-1, keepdims=True)
               - npad * (mu * mu)) * inv_hw
        xn = centered * lax.rsqrt(var + 1e-5) * ln_g_ref[d] + ln_b_ref[d]
        h = jnp.dot(xn.astype(jnp.bfloat16), w1t_ref[d],
                    preferred_element_type=jnp.float32) + b1_ref[d]
        h = jnp.maximum(h, 0.0)
        h = jnp.dot(h.astype(jnp.bfloat16), w2t_ref[d],
                    preferred_element_type=jnp.float32) + b2_ref[d]
        x = x + h                                                    # residual

    # ---- re-associated projections + per-batch L2 normalize ----
    # z = Wc @ (x @ Wr^T) + (bc * colsum(Wr^T) + br): contracting HW first
    # turns the expensive (OC x C)@(C x HW) product into a tiny (C x R) one.
    t = jnp.dot(x.astype(jnp.bfloat16), wrt_ref[...],
                preferred_element_type=jnp.float32)                  # (M, R)
    t3 = t.astype(jnp.bfloat16).reshape(bt, C, -1)                   # (bt, C, R)
    wct = wct_ref[...]                                               # (C, OC) bf16
    bcr = bcr_ref[...]                                               # (R, OC) f32
    for i in range(bt):
        # Transposed-LHS matmul -> (R, OC): keeps OC (lane-dense) as last dim.
        zi = lax.dot_general(t3[i], wct,
                             dimension_numbers=(((0,), (0,)), ((), ())),
                             preferred_element_type=jnp.float32) + bcr
        inv_norm = lax.rsqrt(jnp.maximum(jnp.sum(zi * zi), 1e-24))
        out_ref[i] = (zi * inv_norm).astype(out_ref.dtype)


def _pad_to(a, shape):
    pads = [(0, t - s) for s, t in zip(a.shape, shape)]
    if not any(p[1] for p in pads):
        return a
    return jnp.pad(a, pads)


def _tpu_vmem_capacity_bytes():
    try:
        info = pltpu.get_tpu_info()
        for name in ("vmem_capacity_bytes", "vmem_bytes", "vmem_size_bytes"):
            v = getattr(info, name, None)
            if v:
                return int(v)
    except Exception:
        pass
    try:
        kind = jax.devices()[0].device_kind.lower()
    except Exception:
        kind = ""
    if "v7" in kind:
        return 64 * 1024 * 1024
    if any(k in kind for k in ("v5 lite", "v5e", "v5litepod", "v6")):
        return 128 * 1024 * 1024
    return 64 * 1024 * 1024          # conservative default when unknown


def _num_tensorcores():
    try:
        kind = jax.devices()[0].device_kind.lower()
        if "v7" in kind:
            return 2
    except Exception:
        pass
    return 1


def _vmem_estimate_bytes(bt, C, HWP, HWMP, OC, R, mix_depth, weight_bufs):
    f32, bf16 = 4, 2
    M = bt * C
    x_block = bt * C * HWP * f32 * 2                    # input, double-buffered
    out_block = bt * R * OC * f32 * 2                   # output, double-buffered
    weights = (2 * mix_depth * HWP * HWMP * bf16        # W1^T + W2^T stacks
               + mix_depth * (3 * HWP + HWMP) * f32     # gamma, beta, b1, b2
               + C * OC * bf16 + HWP * R * bf16 + R * OC * f32) * weight_bufs
    live = M * (2 * HWP + HWMP + R) * f32               # x, centered/xn, h, t
    return x_block + out_block + weights + live + (2 << 20)   # compiler scratch


def _pick_batch_tile(B, C, HWP, HWMP, OC, R, mix_depth, *, num_tc,
                     vmem_budget, target_m=512):
    """Fold batch into the MXU M dim.  Single-TC parts (v5e/v6e) fold until
    M = bt*C ~ target_m; v7x (2 TCs/chip) keeps >= 2 'parallel' grid steps."""
    best = 1
    for t in range(1, B + 1):
        if B % t:
            continue
        if num_tc >= 2 and B >= 2 and (B // t) < 2:
            continue
        if t > 1 and t * C > target_m:
            continue
        if t > 1 and _vmem_estimate_bytes(t, C, HWP, HWMP, OC, R, mix_depth,
                                          weight_bufs=2) > vmem_budget:
            continue
        best = t
    return best


def mixvpr_pallas(x, params, *, mix_depth, batch_tile=None, lane_multiple=128):
    """x: (B, C, H, W) float32.  Returns (B, out_channels * out_rows) float32."""
    B, C, H, W = x.shape
    HW = H * W
    ln_g, ln_b, w1t, b1, w2t, b2, wc, bc, wrt, br = params
    HWM = w1t.shape[-1]
    OC = wc.shape[0]
    R = wrt.shape[-1]

    rnd = lambda n: ((n + lane_multiple - 1) // lane_multiple) * lane_multiple
    HWP, HWMP = rnd(HW), rnd(HWM)

    vmem_cap = _tpu_vmem_capacity_bytes()
    vmem_budget = vmem_cap - (8 << 20)          # headroom for compiler internals
    num_tc = _num_tensorcores()

    if batch_tile is None:
        bt = _pick_batch_tile(B, C, HWP, HWMP, OC, R, mix_depth,
                              num_tc=num_tc, vmem_budget=vmem_budget)
    else:
        bt = batch_tile
    assert B % bt == 0, "batch_tile must divide B"

    est = _vmem_estimate_bytes(bt, C, HWP, HWMP, OC, R, mix_depth, weight_bufs=2)
    vmem_limit = max(32 << 20, min(vmem_budget, est + (8 << 20)))

    # Pad lane dims; cast the big weights to bf16 (f32 accumulation in-kernel).
    x_flat = _pad_to(x.reshape(B, C, HW).astype(jnp.float32), (B, C, HWP))
    ln_g_p = _pad_to(ln_g, (mix_depth, 1, HWP))        # pad gamma/beta with zeros
    ln_b_p = _pad_to(ln_b, (mix_depth, 1, HWP))
    w1t_p = _pad_to(w1t, (mix_depth, HWP, HWMP)).astype(jnp.bfloat16)
    b1_p = _pad_to(b1, (mix_depth, 1, HWMP))
    w2t_p = _pad_to(w2t, (mix_depth, HWMP, HWP)).astype(jnp.bfloat16)
    b2_p = _pad_to(b2, (mix_depth, 1, HWP))
    wct_b = wc.T.astype(jnp.bfloat16)                                # (C, OC)
    wrt_p = _pad_to(wrt, (HWP, R)).astype(jnp.bfloat16)              # (HWP, R)
    # Folded bias for the re-associated projection (computed in f32):
    #   z = Wc @ (x @ Wr^T) + bc * colsum(Wr^T) + br
    bcr = jnp.asarray((bc * jnp.sum(wrt, axis=0, keepdims=True) + br).T,
                      jnp.float32)                                   # (R, OC)

    kernel = functools.partial(_mixvpr_kernel, mix_depth=mix_depth, hw=HW)

    def run(single_buffer_weights):
        wkw = ({"pipeline_mode": pl.Buffered(buffer_count=1)}
               if single_buffer_weights else {})
        grid_spec = pltpu.PrefetchScalarGridSpec(
            num_scalar_prefetch=0,
            grid=(B // bt,),
            in_specs=[
                pl.BlockSpec((bt, C, HWP), lambda b: (b, 0, 0)),               # x
                pl.BlockSpec((mix_depth, 1, HWP), lambda b: (0, 0, 0), **wkw),  # gamma
                pl.BlockSpec((mix_depth, 1, HWP), lambda b: (0, 0, 0), **wkw),  # beta
                pl.BlockSpec((mix_depth, HWP, HWMP), lambda b: (0, 0, 0), **wkw),  # W1^T
                pl.BlockSpec((mix_depth, 1, HWMP), lambda b: (0, 0, 0), **wkw),    # b1
                pl.BlockSpec((mix_depth, HWMP, HWP), lambda b: (0, 0, 0), **wkw),  # W2^T
                pl.BlockSpec((mix_depth, 1, HWP), lambda b: (0, 0, 0), **wkw),     # b2
                pl.BlockSpec((C, OC), lambda b: (0, 0), **wkw),                 # Wc^T
                pl.BlockSpec((HWP, R), lambda b: (0, 0), **wkw),                # Wr^T
                pl.BlockSpec((R, OC), lambda b: (0, 0), **wkw),                 # folded bias
            ],
            out_specs=pl.BlockSpec((bt, R, OC), lambda b: (b, 0, 0)),
        )
        out = pl.pallas_call(
            kernel,
            out_shape=jax.ShapeDtypeStruct((B, R, OC), jnp.float32),
            grid_spec=grid_spec,
            compiler_params=pltpu.CompilerParams(
                dimension_semantics=("parallel",),
                vmem_limit_bytes=int(vmem_limit)),
        )(x_flat, ln_g_p, ln_b_p, w1t_p, b1_p, w2t_p, b2_p, wct_b, wrt_p, bcr)
        return out

    try:
        out3 = run(True)
        jax.block_until_ready(out3)
    except Exception:
        # Fallback for JAX versions without single-buffered pipeline_mode.
        out3 = run(False)

    # (B, R, OC) -> (B, OC, R) -> flatten, matching torch flatten(1) order.
    return jnp.transpose(out3, (0, 2, 1)).reshape(B, OC * R)


def mixvpr_reference(x, params, *, mix_depth):
    """Pure-JAX f32 reference mirroring the PyTorch forward."""
    ln_g, ln_b, w1t, b1, w2t, b2, wc, bc, wrt, br = params
    B, C, H, W = x.shape
    xf = x.reshape(B, C, H * W).astype(jnp.float32)
    for d in range(mix_depth):
        mu = jnp.mean(xf, axis=-1, keepdims=True)
        var = jnp.mean((xf - mu) ** 2, axis=-1, keepdims=True)
        xn = (xf - mu) / jnp.sqrt(var + 1e-5) * ln_g[d] + ln_b[d]
        h = jnp.maximum(xn @ w1t[d] + b1[d], 0.0)
        h = h @ w2t[d] + b2[d]
        xf = xf + h
    y = jnp.einsum('oc,bch->boh', wc, xf) + bc[None]       # (B, OC, HW)
    z = y @ wrt + br                                        # (B, OC, R)
    v = z.reshape(B, -1)
    return v / jnp.maximum(jnp.linalg.norm(v, axis=-1, keepdims=True), 1e-12)


def init_params(key, *, in_channels, hw, mlp_ratio, out_channels, out_rows,
                mix_depth):
    """Deterministic synthetic init (trunc-normal std=0.02 weights, zero biases)."""
    hwm = int(hw * mlp_ratio)

    def tn(k, shape, std=0.02):
        return jax.random.truncated_normal(k, -2.0, 2.0, shape, jnp.float32) * std

    keys = jax.random.split(key, 2 * mix_depth + 2)
    ln_g = jnp.ones((mix_depth, 1, hw), jnp.float32)
    ln_b = jnp.zeros((mix_depth, 1, hw), jnp.float32)
    # PyTorch Linear weight is (out, in); we store the transposed (in, out) layout.
    w1t = jnp.stack([tn(keys[2 * d], (hw, hwm)) for d in range(mix_depth)])
    b1 = jnp.zeros((mix_depth, 1, hwm), jnp.float32)
    w2t = jnp.stack([tn(keys[2 * d + 1], (hwm, hw)) for d in range(mix_depth)])
    b2 = jnp.zeros((mix_depth, 1, hw), jnp.float32)
    wc = tn(keys[-2], (out_channels, in_channels))          # (OC, C)
    bc = jnp.zeros((out_channels, 1), jnp.float32)
    wrt = tn(keys[-1], (hw, out_rows))                      # Wr^T
    br = jnp.zeros((1, out_rows), jnp.float32)
    return (ln_g, ln_b, w1t, b1, w2t, b2, wc, bc, wrt, br)


if __name__ == "__main__":
    # Small, forward-consistent shapes (B=4 exercises batch folding and, on
    # 2-TC parts, the >= 2 grid-step rule).
    B, C, H, W = 4, 16, 8, 8            # in_channels=16, in_h=in_w=8 -> hw=64
    OUT_CHANNELS, OUT_ROWS = 32, 4
    MIX_DEPTH, MLP_RATIO = 2, 1

    key = jax.random.PRNGKey(0)
    kx, kp = jax.random.split(key)
    x = jax.random.normal(kx, (B, C, H, W), jnp.float32)
    params = init_params(kp, in_channels=C, hw=H * W, mlp_ratio=MLP_RATIO,
                         out_channels=OUT_CHANNELS, out_rows=OUT_ROWS,
                         mix_depth=MIX_DEPTH)

    out = mixvpr_pallas(x, params, mix_depth=MIX_DEPTH)
    jax.block_until_ready(out)

    ref = mixvpr_reference(x, params, mix_depth=MIX_DEPTH)
    # bf16 weights/operands with f32 accumulation (and re-associated projection
    # order): compare against the f32 reference with a loosened tolerance.
    np.testing.assert_allclose(np.asarray(out), np.asarray(ref),
                               rtol=2e-2, atol=2e-2)
    assert out.shape == (B, OUT_CHANNELS * OUT_ROWS)
    print("KERNEL_OK")
</pallas_src>

<mosaic_0001>
module attributes {stable_mosaic.version = 11 : i64} {
  func.func @_mixvpr_kernel(%arg0: i32, %arg1: memref<4x16x128xf32, #tpu.memory_space<vmem>>, %arg2: memref<2x1x128xf32, #tpu.memory_space<vmem>>, %arg3: memref<2x1x128xf32, #tpu.memory_space<vmem>>, %arg4: memref<2x128x128xbf16, #tpu.memory_space<vmem>>, %arg5: memref<2x1x128xf32, #tpu.memory_space<vmem>>, %arg6: memref<2x128x128xbf16, #tpu.memory_space<vmem>>, %arg7: memref<2x1x128xf32, #tpu.memory_space<vmem>>, %arg8: memref<16x32xbf16, #tpu.memory_space<vmem>>, %arg9: memref<128x4xbf16, #tpu.memory_space<vmem>>, %arg10: memref<4x32xf32, #tpu.memory_space<vmem>>, %arg11: memref<4x4x32xf32, #tpu.memory_space<vmem>>) attributes {dimension_semantics = [#tpu.dimension_semantics<parallel>], iteration_bounds = array<i64: 1>, scalar_prefetch = 0 : i64, scratch_operands = 0 : i64, tpu.core_type = #tpu.core_type<tc>, window_params = [{transform_indices = @transform_0, window_bounds = array<i64: 4, 16, 128>}, {pipeline_mode = #tpu.pipeline_mode<synchronous>, transform_indices = @transform_1, window_bounds = array<i64: 2, 1, 128>}, {pipeline_mode = #tpu.pipeline_mode<synchronous>, transform_indices = @transform_2, window_bounds = array<i64: 2, 1, 128>}, {pipeline_mode = #tpu.pipeline_mode<synchronous>, transform_indices = @transform_3, window_bounds = array<i64: 2, 128, 128>}, {pipeline_mode = #tpu.pipeline_mode<synchronous>, transform_indices = @transform_4, window_bounds = array<i64: 2, 1, 128>}, {pipeline_mode = #tpu.pipeline_mode<synchronous>, transform_indices = @transform_5, window_bounds = array<i64: 2, 128, 128>}, {pipeline_mode = #tpu.pipeline_mode<synchronous>, transform_indices = @transform_6, window_bounds = array<i64: 2, 1, 128>}, {pipeline_mode = #tpu.pipeline_mode<synchronous>, transform_indices = @transform_7, window_bounds = array<i64: 16, 32>}, {pipeline_mode = #tpu.pipeline_mode<synchronous>, transform_indices = @transform_8, window_bounds = array<i64: 128, 4>}, {pipeline_mode = #tpu.pipeline_mode<synchronous>, transform_indices = @transform_9, window_bounds = array<i64: 4, 32>}, {transform_indices = @transform_10, window_bounds = array<i64: 4, 4, 32>}]} {
    %c0 = arith.constant 0 : index
    %c0_0 = arith.constant 0 : index
    %c0_1 = arith.constant 0 : index
    %0 = vector.load %arg1[%c0, %c0_0, %c0_1] : memref<4x16x128xf32, #tpu.memory_space<vmem>>, vector<4x16x128xf32>
    %1 = vector.shape_cast %0 : vector<4x16x128xf32> to vector<64x128xf32>
    %cst = arith.constant dense<0.000000e+00> : vector<64xf32>
    %2 = vector.multi_reduction <add>, %1, %cst [1] : vector<64x128xf32> to vector<64xf32>
    %3 = vector.shape_cast %2 : vector<64xf32> to vector<64x1xf32>
    %cst_2 = arith.constant 1.562500e-02 : f32
    %4 = vector.broadcast %cst_2 : f32 to vector<64x1xf32>
    %5 = arith.mulf %3, %4 : vector<64x1xf32>
    %6 = vector.broadcast %5 : vector<64x1xf32> to vector<64x128xf32>
    %7 = arith.subf %1, %6 : vector<64x128xf32>
    %8 = arith.mulf %7, %7 : vector<64x128xf32>
    %cst_3 = arith.constant dense<0.000000e+00> : vector<64xf32>
    %9 = vector.multi_reduction <add>, %8, %cst_3 [1] : vector<64x128xf32> to vector<64xf32>
    %10 = vector.shape_cast %9 : vector<64xf32> to vector<64x1xf32>
    %11 = arith.mulf %5, %5 : vector<64x1xf32>
    %cst_4 = arith.constant 6.400000e+01 : f32
    %12 = vector.broadcast %cst_4 : f32 to vector<64x1xf32>
    %13 = arith.mulf %12, %11 : vector<64x1xf32>
    %14 = arith.subf %10, %13 : vector<64x1xf32>
    %cst_5 = arith.constant 1.562500e-02 : f32
    %15 = vector.broadcast %cst_5 : f32 to vector<64x1xf32>
    %16 = arith.mulf %14, %15 : vector<64x1xf32>
    %cst_6 = arith.constant 9.99999974E-6 : f32
    %17 = vector.broadcast %cst_6 : f32 to vector<64x1xf32>
    %18 = arith.addf %16, %17 : vector<64x1xf32>
    %19 = math.rsqrt %18 : vector<64x1xf32>
    %20 = vector.broadcast %19 : vector<64x1xf32> to vector<64x128xf32>
    %21 = arith.mulf %7, %20 : vector<64x128xf32>
    %c0_7 = arith.constant 0 : index
    %c0_8 = arith.constant 0 : index
    %c0_9 = arith.constant 0 : index
    %22 = vector.load %arg2[%c0_7, %c0_8, %c0_9] : memref<2x1x128xf32, #tpu.memory_space<vmem>>, vector<1x1x128xf32>
    %23 = vector.shape_cast %22 : vector<1x1x128xf32> to vector<1x128xf32>
    %24 = vector.broadcast %23 : vector<1x128xf32> to vector<64x128xf32>
    %25 = arith.mulf %21, %24 : vector<64x128xf32>
    %c0_10 = arith.constant 0 : index
    %c0_11 = arith.constant 0 : index
    %c0_12 = arith.constant 0 : index
    %26 = vector.load %arg3[%c0_10, %c0_11, %c0_12] : memref<2x1x128xf32, #tpu.memory_space<vmem>>, vector<1x1x128xf32>
    %27 = vector.shape_cast %26 : vector<1x1x128xf32> to vector<1x128xf32>
    %28 = vector.broadcast %27 : vector<1x128xf32> to vector<64x128xf32>
    %29 = arith.addf %25, %28 : vector<64x128xf32>
    %30 = arith.truncf %29 : vector<64x128xf32> to vector<64x128xbf16>
    %c0_13 = arith.constant 0 : index
    %c0_14 = arith.constant 0 : index
    %c0_15 = arith.constant 0 : index
    %31 = vector.load %arg4[%c0_13, %c0_14, %c0_15] : memref<2x128x128xbf16, #tpu.memory_space<vmem>>, vector<1x128x128xbf16>
    %32 = vector.shape_cast %31 : vector<1x128x128xbf16> to vector<128x128xbf16>
    %cst_16 = arith.constant dense<0.000000e+00> : vector<64x128xf32>
    %33 = tpu.matmul %30, %32, %cst_16 {dimension_numbers = #tpu.dot_dimension_numbers<[1], [0], [0], [1], [0, 0, 1, 1], [], []>} : vector<64x128xbf16>, vector<128x128xbf16>, vector<64x128xf32> -> vector<64x128xf32>
    %c0_17 = arith.constant 0 : index
    %c0_18 = arith.constant 0 : index
    %c0_19 = arith.constant 0 : index
    %34 = vector.load %arg5[%c0_17, %c0_18, %c0_19] : memref<2x1x128xf32, #tpu.memory_space<vmem>>, vector<1x1x128xf32>
    %35 = vector.shape_cast %34 : vector<1x1x128xf32> to vector<1x128xf32>
    %36 = vector.broadcast %35 : vector<1x128xf32> to vector<64x128xf32>
    %37 = arith.addf %33, %36 : vector<64x128xf32>
    %cst_20 = arith.constant 0.000000e+00 : f32
    %38 = vector.broadcast %cst_20 : f32 to vector<64x128xf32>
    %39 = arith.maximumf %37, %38 : vector<64x128xf32>
    %40 = arith.truncf %39 : vector<64x128xf32> to vector<64x128xbf16>
    %c0_21 = arith.constant 0 : index
    %c0_22 = arith.constant 0 : index
    %c0_23 = arith.constant 0 : index
    %41 = vector.load %arg6[%c0_21, %c0_22, %c0_23] : memref<2x128x128xbf16, #tpu.memory_space<vmem>>, vector<1x128x128xbf16>
    %42 = vector.shape_cast %41 : vector<1x128x128xbf16> to vector<128x128xbf16>
    %cst_24 = arith.constant dense<0.000000e+00> : vector<64x128xf32>
    %43 = tpu.matmul %40, %42, %cst_24 {dimension_numbers = #tpu.dot_dimension_numbers<[1], [0], [0], [1], [0, 0, 1, 1], [], []>} : vector<64x128xbf16>, vector<128x128xbf16>, vector<64x128xf32> -> vector<64x128xf32>
    %c0_25 = arith.constant 0 : index
    %c0_26 = arith.constant 0 : index
    %c0_27 = arith.constant 0 : index
    %44 = vector.load %arg7[%c0_25, %c0_26, %c0_27] : memref<2x1x128xf32, #tpu.memory_space<vmem>>, vector<1x1x128xf32>
    %45 = vector.shape_cast %44 : vector<1x1x128xf32> to vector<1x128xf32>
    %46 = vector.broadcast %45 : vector<1x128xf32> to vector<64x128xf32>
    %47 = arith.addf %43, %46 : vector<64x128xf32>
    %48 = arith.addf %1, %47 : vector<64x128xf32>
    %cst_28 = arith.constant dense<0.000000e+00> : vector<64xf32>
    %49 = vector.multi_reduction <add>, %48, %cst_28 [1] : vector<64x128xf32> to vector<64xf32>
    %50 = vector.shape_cast %49 : vector<64xf32> to vector<64x1xf32>
    %cst_29 = arith.constant 1.562500e-02 : f32
    %51 = vector.broadcast %cst_29 : f32 to vector<64x1xf32>
    %52 = arith.mulf %50, %51 : vector<64x1xf32>
    %53 = vector.broadcast %52 : vector<64x1xf32> to vector<64x128xf32>
    %54 = arith.subf %48, %53 : vector<64x128xf32>
    %55 = arith.mulf %54, %54 : vector<64x128xf32>
    %cst_30 = arith.constant dense<0.000000e+00> : vector<64xf32>
    %56 = vector.multi_reduction <add>, %55, %cst_30 [1] : vector<64x128xf32> to vector<64xf32>
    %57 = vector.shape_cast %56 : vector<64xf32> to vector<64x1xf32>
    %58 = arith.mulf %52, %52 : vector<64x1xf32>
    %cst_31 = arith.constant 6.400000e+01 : f32
    %59 = vector.broadcast %cst_31 : f32 to vector<64x1xf32>
    %60 = arith.mulf %59, %58 : vector<64x1xf32>
    %61 = arith.subf %57, %60 : vector<64x1xf32>
    %cst_32 = arith.constant 1.562500e-02 : f32
    %62 = vector.broadcast %cst_32 : f32 to vector<64x1xf32>
    %63 = arith.mulf %61, %62 : vector<64x1xf32>
    %cst_33 = arith.constant 9.99999974E-6 : f32
    %64 = vector.broadcast %cst_33 : f32 to vector<64x1xf32>
    %65 = arith.addf %63, %64 : vector<64x1xf32>
    %66 = math.rsqrt %65 : vector<64x1xf32>
    %67 = vector.broadcast %66 : vector<64x1xf32> to vector<64x128xf32>
    %68 = arith.mulf %54, %67 : vector<64x128xf32>
    %c1 = arith.constant 1 : index
    %c0_34 = arith.constant 0 : index
    %c0_35 = arith.constant 0 : index
    %69 = vector.load %arg2[%c1, %c0_34, %c0_35] : memref<2x1x128xf32, #tpu.memory_space<vmem>>, vector<1x1x128xf32>
    %70 = vector.shape_cast %69 : vector<1x1x128xf32> to vector<1x128xf32>
    %71 = vector.broadcast %70 : vector<1x128xf32> to vector<64x128xf32>
    %72 = arith.mulf %68, %71 : vector<64x128xf32>
    %c1_36 = arith.constant 1 : index
    %c0_37 = arith.constant 0 : index
    %c0_38 = arith.constant 0 : index
    %73 = vector.load %arg3[%c1_36, %c0_37, %c0_38] : memref<2x1x128xf32, #tpu.memory_space<vmem>>, vector<1x1x128xf32>
    %74 = vector.shape_cast %73 : vector<1x1x128xf32> to vector<1x128xf32>
    %75 = vector.broadcast %74 : vector<1x128xf32> to vector<64x128xf32>
    %76 = arith.addf %72, %75 : vector<64x128xf32>
    %77 = arith.truncf %76 : vector<64x128xf32> to vector<64x128xbf16>
    %c1_39 = arith.constant 1 : index
    %c0_40 = arith.constant 0 : index
    %c0_41 = arith.constant 0 : index
    %78 = vector.load %arg4[%c1_39, %c0_40, %c0_41] : memref<2x128x128xbf16, #tpu.memory_space<vmem>>, vector<1x128x128xbf16>
    %79 = vector.shape_cast %78 : vector<1x128x128xbf16> to vector<128x128xbf16>
    %cst_42 = arith.constant dense<0.000000e+00> : vector<64x128xf32>
    %80 = tpu.matmul %77, %79, %cst_42 {dimension_numbers = #tpu.dot_dimension_numbers<[1], [0], [0], [1], [0, 0, 1, 1], [], []>} : vector<64x128xbf16>, vector<128x128xbf16>, vector<64x128xf32> -> vector<64x128xf32>
    %c1_43 = arith.constant 1 : index
    %c0_44 = arith.constant 0 : index
    %c0_45 = arith.constant 0 : index
    %81 = vector.load %arg5[%c1_43, %c0_44, %c0_45] : memref<2x1x128xf32, #tpu.memory_space<vmem>>, vector<1x1x128xf32>
    %82 = vector.shape_cast %81 : vector<1x1x128xf32> to vector<1x128xf32>
    %83 = vector.broadcast %82 : vector<1x128xf32> to vector<64x128xf32>
    %84 = arith.addf %80, %83 : vector<64x128xf32>
    %cst_46 = arith.constant 0.000000e+00 : f32
    %85 = vector.broadcast %cst_46 : f32 to vector<64x128xf32>
    %86 = arith.maximumf %84, %85 : vector<64x128xf32>
    %87 = arith.truncf %86 : vector<64x128xf32> to vector<64x128xbf16>
    %c1_47 = arith.constant 1 : index
    %c0_48 = arith.constant 0 : index
    %c0_49 = arith.constant 0 : index
    %88 = vector.load %arg6[%c1_47, %c0_48, %c0_49] : memref<2x128x128xbf16, #tpu.memory_space<vmem>>, vector<1x128x128xbf16>
    %89 = vector.shape_cast %88 : vector<1x128x128xbf16> to vector<128x128xbf16>
    %cst_50 = arith.constant dense<0.000000e+00> : vector<64x128xf32>
    %90 = tpu.matmul %87, %89, %cst_50 {dimension_numbers = #tpu.dot_dimension_numbers<[1], [0], [0], [1], [0, 0, 1, 1], [], []>} : vector<64x128xbf16>, vector<128x128xbf16>, vector<64x128xf32> -> vector<64x128xf32>
    %c1_51 = arith.constant 1 : index
    %c0_52 = arith.constant 0 : index
    %c0_53 = arith.constant 0 : index
    %91 = vector.load %arg7[%c1_51, %c0_52, %c0_53] : memref<2x1x128xf32, #tpu.memory_space<vmem>>, vector<1x1x128xf32>
    %92 = vector.shape_cast %91 : vector<1x1x128xf32> to vector<1x128xf32>
    %93 = vector.broadcast %92 : vector<1x128xf32> to vector<64x128xf32>
    %94 = arith.addf %90, %93 : vector<64x128xf32>
    %95 = arith.addf %48, %94 : vector<64x128xf32>
    %96 = arith.truncf %95 : vector<64x128xf32> to vector<64x128xbf16>
    %c0_54 = arith.constant 0 : index
    %c0_55 = arith.constant 0 : index
    %97 = vector.load %arg9[%c0_54, %c0_55] : memref<128x4xbf16, #tpu.memory_space<vmem>>, vector<128x4xbf16>
    %cst_56 = arith.constant dense<0.000000e+00> : vector<64x4xf32>
    %98 = tpu.matmul %96, %97, %cst_56 {dimension_numbers = #tpu.dot_dimension_numbers<[1], [0], [0], [1], [0, 0, 1, 1], [], []>} : vector<64x128xbf16>, vector<128x4xbf16>, vector<64x4xf32> -> vector<64x4xf32>
    %99 = arith.truncf %98 : vector<64x4xf32> to vector<64x4xbf16>
    %100 = vector.shape_cast %99 : vector<64x4xbf16> to vector<4x16x4xbf16>
    %c0_57 = arith.constant 0 : index
    %c0_58 = arith.constant 0 : index
    %101 = vector.load %arg8[%c0_57, %c0_58] : memref<16x32xbf16, #tpu.memory_space<vmem>>, vector<16x32xbf16>
    %c0_59 = arith.constant 0 : index
    %c0_60 = arith.constant 0 : index
    %102 = vector.load %arg10[%c0_59, %c0_60] : memref<4x32xf32, #tpu.memory_space<vmem>>, vector<4x32xf32>
    %103 = vector.extract_strided_slice %100 {offsets = [0, 0, 0], sizes = [1, 16, 4], strides = [1, 1, 1]} : vector<4x16x4xbf16> to vector<1x16x4xbf16>
    %104 = vector.shape_cast %103 : vector<1x16x4xbf16> to vector<16x4xbf16>
    %cst_61 = arith.constant dense<0.000000e+00> : vector<4x32xf32>
    %105 = tpu.matmul %104, %101, %cst_61 {dimension_numbers = #tpu.dot_dimension_numbers<[0], [0], [1], [1], [0, 1, 1, 1], [], []>} : vector<16x4xbf16>, vector<16x32xbf16>, vector<4x32xf32> -> vector<4x32xf32>
    %106 = arith.addf %105, %102 : vector<4x32xf32>
    %107 = arith.mulf %106, %106 : vector<4x32xf32>
    %108 = vector.shape_cast %107 : vector<4x32xf32> to vector<1x4x32xf32>
    %cst_62 = arith.constant dense<0.000000e+00> : vector<1xf32>
    %109 = vector.multi_reduction <add>, %108, %cst_62 [1, 2] : vector<1x4x32xf32> to vector<1xf32>
    %110 = vector.shape_cast %109 : vector<1xf32> to vector<1x1x1xf32>
    %111 = vector.extract %110[0, 0, 0] : f32 from vector<1x1x1xf32>
    %cst_63 = arith.constant 1.000000e-24 : f32
    %112 = arith.maximumf %111, %cst_63 : f32
    %113 = math.rsqrt %112 : f32
    %114 = vector.broadcast %113 : f32 to vector<4x32xf32>
    %115 = arith.mulf %106, %114 : vector<4x32xf32>
    %c0_64 = arith.constant 0 : index
    %c0_65 = arith.constant 0 : index
    %c0_66 = arith.constant 0 : index
    %116 = vector.load %arg11[%c0_64, %c0_65, %c0_66] : memref<4x4x32xf32, #tpu.memory_space<vmem>>, vector<1x4x32xf32>
    %117 = vector.shape_cast %116 : vector<1x4x32xf32> to vector<4x32xf32>
    %118 = vector.shape_cast %115 : vector<4x32xf32> to vector<1x4x32xf32>
    tpu.vector_store %arg11[%c0_64, %c0_65, %c0_66], %118 {strides = array<i32>} : memref<4x4x32xf32, #tpu.memory_space<vmem>>, vector<1x4x32xf32>,
    %119 = vector.extract_strided_slice %100 {offsets = [1, 0, 0], sizes = [1, 16, 4], strides = [1, 1, 1]} : vector<4x16x4xbf16> to vector<1x16x4xbf16>
    %120 = vector.shape_cast %119 : vector<1x16x4xbf16> to vector<16x4xbf16>
    %cst_67 = arith.constant dense<0.000000e+00> : vector<4x32xf32>
    %121 = tpu.matmul %120, %101, %cst_67 {dimension_numbers = #tpu.dot_dimension_numbers<[0], [0], [1], [1], [0, 1, 1, 1], [], []>} : vector<16x4xbf16>, vector<16x32xbf16>, vector<4x32xf32> -> vector<4x32xf32>
    %122 = arith.addf %121, %102 : vector<4x32xf32>
    %123 = arith.mulf %122, %122 : vector<4x32xf32>
    %124 = vector.shape_cast %123 : vector<4x32xf32> to vector<1x4x32xf32>
    %cst_68 = arith.constant dense<0.000000e+00> : vector<1xf32>
    %125 = vector.multi_reduction <add>, %124, %cst_68 [1, 2] : vector<1x4x32xf32> to vector<1xf32>
    %126 = vector.shape_cast %125 : vector<1xf32> to vector<1x1x1xf32>
    %127 = vector.extract %126[0, 0, 0] : f32 from vector<1x1x1xf32>
    %cst_69 = arith.constant 1.000000e-24 : f32
    %128 = arith.maximumf %127, %cst_69 : f32
    %129 = math.rsqrt %128 : f32
    %130 = vector.broadcast %129 : f32 to vector<4x32xf32>
    %131 = arith.mulf %122, %130 : vector<4x32xf32>
    %c1_70 = arith.constant 1 : index
    %c0_71 = arith.constant 0 : index
    %c0_72 = arith.constant 0 : index
    %132 = vector.load %arg11[%c1_70, %c0_71, %c0_72] : memref<4x4x32xf32, #tpu.memory_space<vmem>>, vector<1x4x32xf32>
    %133 = vector.shape_cast %132 : vector<1x4x32xf32> to vector<4x32xf32>
    %134 = vector.shape_cast %131 : vector<4x32xf32> to vector<1x4x32xf32>
    tpu.vector_store %arg11[%c1_70, %c0_71, %c0_72], %134 {strides = array<i32>} : memref<4x4x32xf32, #tpu.memory_space<vmem>>, vector<1x4x32xf32>,
    %135 = vector.extract_strided_slice %100 {offsets = [2, 0, 0], sizes = [1, 16, 4], strides = [1, 1, 1]} : vector<4x16x4xbf16> to vector<1x16x4xbf16>
    %136 = vector.shape_cast %135 : vector<1x16x4xbf16> to vector<16x4xbf16>
    %cst_73 = arith.constant dense<0.000000e+00> : vector<4x32xf32>
    %137 = tpu.matmul %136, %101, %cst_73 {dimension_numbers = #tpu.dot_dimension_numbers<[0], [0], [1], [1], [0, 1, 1, 1], [], []>} : vector<16x4xbf16>, vector<16x32xbf16>, vector<4x32xf32> -> vector<4x32xf32>
    %138 = arith.addf %137, %102 : vector<4x32xf32>
    %139 = arith.mulf %138, %138 : vector<4x32xf32>
    %140 = vector.shape_cast %139 : vector<4x32xf32> to vector<1x4x32xf32>
    %cst_74 = arith.constant dense<0.000000e+00> : vector<1xf32>
    %141 = vector.multi_reduction <add>, %140, %cst_74 [1, 2] : vector<1x4x32xf32> to vector<1xf32>
    %142 = vector.shape_cast %141 : vector<1xf32> to vector<1x1x1xf32>
    %143 = vector.extract %142[0, 0, 0] : f32 from vector<1x1x1xf32>
    %cst_75 = arith.constant 1.000000e-24 : f32
    %144 = arith.maximumf %143, %cst_75 : f32
    %145 = math.rsqrt %144 : f32
    %146 = vector.broadcast %145 : f32 to vector<4x32xf32>
    %147 = arith.mulf %138, %146 : vector<4x32xf32>
    %c2 = arith.constant 2 : index
    %c0_76 = arith.constant 0 : index
    %c0_77 = arith.constant 0 : index
    %148 = vector.load %arg11[%c2, %c0_76, %c0_77] : memref<4x4x32xf32, #tpu.memory_space<vmem>>, vector<1x4x32xf32>
    %149 = vector.shape_cast %148 : vector<1x4x32xf32> to vector<4x32xf32>
    %150 = vector.shape_cast %147 : vector<4x32xf32> to vector<1x4x32xf32>
    tpu.vector_store %arg11[%c2, %c0_76, %c0_77], %150 {strides = array<i32>} : memref<4x4x32xf32, #tpu.memory_space<vmem>>, vector<1x4x32xf32>,
    %151 = vector.extract_strided_slice %100 {offsets = [3, 0, 0], sizes = [1, 16, 4], strides = [1, 1, 1]} : vector<4x16x4xbf16> to vector<1x16x4xbf16>
    %152 = vector.shape_cast %151 : vector<1x16x4xbf16> to vector<16x4xbf16>
    %cst_78 = arith.constant dense<0.000000e+00> : vector<4x32xf32>
    %153 = tpu.matmul %152, %101, %cst_78 {dimension_numbers = #tpu.dot_dimension_numbers<[0], [0], [1], [1], [0, 1, 1, 1], [], []>} : vector<16x4xbf16>, vector<16x32xbf16>, vector<4x32xf32> -> vector<4x32xf32>
    %154 = arith.addf %153, %102 : vector<4x32xf32>
    %155 = arith.mulf %154, %154 : vector<4x32xf32>
    %156 = vector.shape_cast %155 : vector<4x32xf32> to vector<1x4x32xf32>
    %cst_79 = arith.constant dense<0.000000e+00> : vector<1xf32>
    %157 = vector.multi_reduction <add>, %156, %cst_79 [1, 2] : vector<1x4x32xf32> to vector<1xf32>
    %158 = vector.shape_cast %157 : vector<1xf32> to vector<1x1x1xf32>
    %159 = vector.extract %158[0, 0, 0] : f32 from vector<1x1x1xf32>
    %cst_80 = arith.constant 1.000000e-24 : f32
    %160 = arith.maximumf %159, %cst_80 : f32
    %161 = math.rsqrt %160 : f32
    %162 = vector.broadcast %161 : f32 to vector<4x32xf32>
    %163 = arith.mulf %154, %162 : vector<4x32xf32>
    %c3 = arith.constant 3 : index
    %c0_81 = arith.constant 0 : index
    %c0_82 = arith.constant 0 : index
    %164 = vector.load %arg11[%c3, %c0_81, %c0_82] : memref<4x4x32xf32, #tpu.memory_space<vmem>>, vector<1x4x32xf32>
    %165 = vector.shape_cast %164 : vector<1x4x32xf32> to vector<4x32xf32>
    %166 = vector.shape_cast %163 : vector<4x32xf32> to vector<1x4x32xf32>
    tpu.vector_store %arg11[%c3, %c0_81, %c0_82], %166 {strides = array<i32>} : memref<4x4x32xf32, #tpu.memory_space<vmem>>, vector<1x4x32xf32>,
    return
  }
  func.func @transform_0(%arg0: i32) -> (i32, i32, i32) {
    %c0_i32 = arith.constant 0 : i32
    %c0_i32_0 = arith.constant 0 : i32
    %c0_i32_1 = arith.constant 0 : i32
    return %arg0, %c0_i32, %c0_i32_0 : i32, i32, i32
  }
  func.func @transform_1(%arg0: i32) -> (i32, i32, i32) {
    %c0_i32 = arith.constant 0 : i32
    %c0_i32_0 = arith.constant 0 : i32
    %c0_i32_1 = arith.constant 0 : i32
    %c0_i32_2 = arith.constant 0 : i32
    return %c0_i32, %c0_i32_0, %c0_i32_1 : i32, i32, i32
  }
  func.func @transform_2(%arg0: i32) -> (i32, i32, i32) {
    %c0_i32 = arith.constant 0 : i32
    %c0_i32_0 = arith.constant 0 : i32
    %c0_i32_1 = arith.constant 0 : i32
    %c0_i32_2 = arith.constant 0 : i32
    return %c0_i32, %c0_i32_0, %c0_i32_1 : i32, i32, i32
  }
  func.func @transform_3(%arg0: i32) -> (i32, i32, i32) {
    %c0_i32 = arith.constant 0 : i32
    %c0_i32_0 = arith.constant 0 : i32
    %c0_i32_1 = arith.constant 0 : i32
    %c0_i32_2 = arith.constant 0 : i32
    return %c0_i32, %c0_i32_0, %c0_i32_1 : i32, i32, i32
  }
  func.func @transform_4(%arg0: i32) -> (i32, i32, i32) {
    %c0_i32 = arith.constant 0 : i32
    %c0_i32_0 = arith.constant 0 : i32
    %c0_i32_1 = arith.constant 0 : i32
    %c0_i32_2 = arith.constant 0 : i32
    return %c0_i32, %c0_i32_0, %c0_i32_1 : i32, i32, i32
  }
  func.func @transform_5(%arg0: i32) -> (i32, i32, i32) {
    %c0_i32 = arith.constant 0 : i32
    %c0_i32_0 = arith.constant 0 : i32
    %c0_i32_1 = arith.constant 0 : i32
    %c0_i32_2 = arith.constant 0 : i32
    return %c0_i32, %c0_i32_0, %c0_i32_1 : i32, i32, i32
  }
  func.func @transform_6(%arg0: i32) -> (i32, i32, i32) {
    %c0_i32 = arith.constant 0 : i32
    %c0_i32_0 = arith.constant 0 : i32
    %c0_i32_1 = arith.constant 0 : i32
    %c0_i32_2 = arith.constant 0 : i32
    return %c0_i32, %c0_i32_0, %c0_i32_1 : i32, i32, i32
  }
  func.func @transform_7(%arg0: i32) -> (i32, i32) {
    %c0_i32 = arith.constant 0 : i32
    %c0_i32_0 = arith.constant 0 : i32
    %c0_i32_1 = arith.constant 0 : i32
    return %c0_i32, %c0_i32_0 : i32, i32
  }
  func.func @transform_8(%arg0: i32) -> (i32, i32) {
    %c0_i32 = arith.constant 0 : i32
    %c0_i32_0 = arith.constant 0 : i32
    %c0_i32_1 = arith.constant 0 : i32
    return %c0_i32, %c0_i32_0 : i32, i32
  }
  func.func @transform_9(%arg0: i32) -> (i32, i32) {
    %c0_i32 = arith.constant 0 : i32
    %c0_i32_0 = arith.constant 0 : i32
    %c0_i32_1 = arith.constant 0 : i32
    return %c0_i32, %c0_i32_0 : i32, i32
  }
  func.func @transform_10(%arg0: i32) -> (i32, i32, i32) {
    %c0_i32 = arith.constant 0 : i32
    %c0_i32_0 = arith.constant 0 : i32
    %c0_i32_1 = arith.constant 0 : i32
    return %arg0, %c0_i32, %c0_i32_0 : i32, i32, i32
  }
}

module attributes {stable_mosaic.version = 11 : i64} {
  func.func @_mixvpr_kernel(%arg0: i32, %arg1: memref<4x16x128xf32, #tpu.memory_space<vmem>>, %arg2: memref<2x1x128xf32, #tpu.memory_space<vmem>>, %arg3: memref<2x1x128xf32, #tpu.memory_space<vmem>>, %arg4: memref<2x128x128xbf16, #tpu.memory_space<vmem>>, %arg5: memref<2x1x128xf32, #tpu.memory_space<vmem>>, %arg6: memref<2x128x128xbf16, #tpu.memory_space<vmem>>, %arg7: memref<2x1x128xf32, #tpu.memory_space<vmem>>, %arg8: memref<16x32xbf16, #tpu.memory_space<vmem>>, %arg9: memref<128x4xbf16, #tpu.memory_space<vmem>>, %arg10: memref<4x32xf32, #tpu.memory_space<vmem>>, %arg11: memref<4x4x32xf32, #tpu.memory_space<vmem>>) attributes {dimension_semantics = [#tpu.dimension_semantics<parallel>], iteration_bounds = array<i64: 1>, scalar_prefetch = 0 : i64, scratch_operands = 0 : i64, tpu.core_type = #tpu.core_type<tc>, window_params = [{transform_indices = @transform_0, window_bounds = array<i64: 4, 16, 128>}, {pipeline_mode = #tpu.pipeline_mode<synchronous>, transform_indices = @transform_1, window_bounds = array<i64: 2, 1, 128>}, {pipeline_mode = #tpu.pipeline_mode<synchronous>, transform_indices = @transform_2, window_bounds = array<i64: 2, 1, 128>}, {pipeline_mode = #tpu.pipeline_mode<synchronous>, transform_indices = @transform_3, window_bounds = array<i64: 2, 128, 128>}, {pipeline_mode = #tpu.pipeline_mode<synchronous>, transform_indices = @transform_4, window_bounds = array<i64: 2, 1, 128>}, {pipeline_mode = #tpu.pipeline_mode<synchronous>, transform_indices = @transform_5, window_bounds = array<i64: 2, 128, 128>}, {pipeline_mode = #tpu.pipeline_mode<synchronous>, transform_indices = @transform_6, window_bounds = array<i64: 2, 1, 128>}, {pipeline_mode = #tpu.pipeline_mode<synchronous>, transform_indices = @transform_7, window_bounds = array<i64: 16, 32>}, {pipeline_mode = #tpu.pipeline_mode<synchronous>, transform_indices = @transform_8, window_bounds = array<i64: 128, 4>}, {pipeline_mode = #tpu.pipeline_mode<synchronous>, transform_indices = @transform_9, window_bounds = array<i64: 4, 32>}, {transform_indices = @transform_10, window_bounds = array<i64: 4, 4, 32>}]} {
    %c0 = arith.constant 0 : index
    %c0_0 = arith.constant 0 : index
    %c0_1 = arith.constant 0 : index
    %0 = vector.load %arg1[%c0, %c0_0, %c0_1] : memref<4x16x128xf32, #tpu.memory_space<vmem>>, vector<4x16x128xf32>
    %1 = vector.shape_cast %0 : vector<4x16x128xf32> to vector<64x128xf32>
    %cst = arith.constant dense<0.000000e+00> : vector<64xf32>
    %2 = vector.multi_reduction <add>, %1, %cst [1] : vector<64x128xf32> to vector<64xf32>
    %3 = vector.shape_cast %2 : vector<64xf32> to vector<64x1xf32>
    %cst_2 = arith.constant 1.562500e-02 : f32
    %4 = vector.broadcast %cst_2 : f32 to vector<64x1xf32>
    %5 = arith.mulf %3, %4 : vector<64x1xf32>
    %6 = vector.broadcast %5 : vector<64x1xf32> to vector<64x128xf32>
    %7 = arith.subf %1, %6 : vector<64x128xf32>
    %8 = arith.mulf %7, %7 : vector<64x128xf32>
    %cst_3 = arith.constant dense<0.000000e+00> : vector<64xf32>
    %9 = vector.multi_reduction <add>, %8, %cst_3 [1] : vector<64x128xf32> to vector<64xf32>
    %10 = vector.shape_cast %9 : vector<64xf32> to vector<64x1xf32>
    %11 = arith.mulf %5, %5 : vector<64x1xf32>
    %cst_4 = arith.constant 6.400000e+01 : f32
    %12 = vector.broadcast %cst_4 : f32 to vector<64x1xf32>
    %13 = arith.mulf %12, %11 : vector<64x1xf32>
    %14 = arith.subf %10, %13 : vector<64x1xf32>
    %cst_5 = arith.constant 1.562500e-02 : f32
    %15 = vector.broadcast %cst_5 : f32 to vector<64x1xf32>
    %16 = arith.mulf %14, %15 : vector<64x1xf32>
    %cst_6 = arith.constant 9.99999974E-6 : f32
    %17 = vector.broadcast %cst_6 : f32 to vector<64x1xf32>
    %18 = arith.addf %16, %17 : vector<64x1xf32>
    %19 = math.rsqrt %18 : vector<64x1xf32>
    %20 = vector.broadcast %19 : vector<64x1xf32> to vector<64x128xf32>
    %21 = arith.mulf %7, %20 : vector<64x128xf32>
    %c0_7 = arith.constant 0 : index
    %c0_8 = arith.constant 0 : index
    %c0_9 = arith.constant 0 : index
    %22 = vector.load %arg2[%c0_7, %c0_8, %c0_9] : memref<2x1x128xf32, #tpu.memory_space<vmem>>, vector<1x1x128xf32>
    %23 = vector.shape_cast %22 : vector<1x1x128xf32> to vector<1x128xf32>
    %24 = vector.broadcast %23 : vector<1x128xf32> to vector<64x128xf32>
    %25 = arith.mulf %21, %24 : vector<64x128xf32>
    %c0_10 = arith.constant 0 : index
    %c0_11 = arith.constant 0 : index
    %c0_12 = arith.constant 0 : index
    %26 = vector.load %arg3[%c0_10, %c0_11, %c0_12] : memref<2x1x128xf32, #tpu.memory_space<vmem>>, vector<1x1x128xf32>
    %27 = vector.shape_cast %26 : vector<1x1x128xf32> to vector<1x128xf32>
    %28 = vector.broadcast %27 : vector<1x128xf32> to vector<64x128xf32>
    %29 = arith.addf %25, %28 : vector<64x128xf32>
    %30 = arith.truncf %29 : vector<64x128xf32> to vector<64x128xbf16>
    %c0_13 = arith.constant 0 : index
    %c0_14 = arith.constant 0 : index
    %c0_15 = arith.constant 0 : index
    %31 = vector.load %arg4[%c0_13, %c0_14, %c0_15] : memref<2x128x128xbf16, #tpu.memory_space<vmem>>, vector<1x128x128xbf16>
    %32 = vector.shape_cast %31 : vector<1x128x128xbf16> to vector<128x128xbf16>
    %cst_16 = arith.constant dense<0.000000e+00> : vector<64x128xf32>
    %33 = tpu.matmul %30, %32, %cst_16 {dimension_numbers = #tpu.dot_dimension_numbers<[1], [0], [0], [1], [0, 0, 1, 1], [], []>} : vector<64x128xbf16>, vector<128x128xbf16>, vector<64x128xf32> -> vector<64x128xf32>
    %c0_17 = arith.constant 0 : index
    %c0_18 = arith.constant 0 : index
    %c0_19 = arith.constant 0 : index
    %34 = vector.load %arg5[%c0_17, %c0_18, %c0_19] : memref<2x1x128xf32, #tpu.memory_space<vmem>>, vector<1x1x128xf32>
    %35 = vector.shape_cast %34 : vector<1x1x128xf32> to vector<1x128xf32>
    %36 = vector.broadcast %35 : vector<1x128xf32> to vector<64x128xf32>
    %37 = arith.addf %33, %36 : vector<64x128xf32>
    %cst_20 = arith.constant 0.000000e+00 : f32
    %38 = vector.broadcast %cst_20 : f32 to vector<64x128xf32>
    %39 = arith.maximumf %37, %38 : vector<64x128xf32>
    %40 = arith.truncf %39 : vector<64x128xf32> to vector<64x128xbf16>
    %c0_21 = arith.constant 0 : index
    %c0_22 = arith.constant 0 : index
    %c0_23 = arith.constant 0 : index
    %41 = vector.load %arg6[%c0_21, %c0_22, %c0_23] : memref<2x128x128xbf16, #tpu.memory_space<vmem>>, vector<1x128x128xbf16>
    %42 = vector.shape_cast %41 : vector<1x128x128xbf16> to vector<128x128xbf16>
    %cst_24 = arith.constant dense<0.000000e+00> : vector<64x128xf32>
    %43 = tpu.matmul %40, %42, %cst_24 {dimension_numbers = #tpu.dot_dimension_numbers<[1], [0], [0], [1], [0, 0, 1, 1], [], []>} : vector<64x128xbf16>, vector<128x128xbf16>, vector<64x128xf32> -> vector<64x128xf32>
    %c0_25 = arith.constant 0 : index
    %c0_26 = arith.constant 0 : index
    %c0_27 = arith.constant 0 : index
    %44 = vector.load %arg7[%c0_25, %c0_26, %c0_27] : memref<2x1x128xf32, #tpu.memory_space<vmem>>, vector<1x1x128xf32>
    %45 = vector.shape_cast %44 : vector<1x1x128xf32> to vector<1x128xf32>
    %46 = vector.broadcast %45 : vector<1x128xf32> to vector<64x128xf32>
    %47 = arith.addf %43, %46 : vector<64x128xf32>
    %48 = arith.addf %1, %47 : vector<64x128xf32>
    %cst_28 = arith.constant dense<0.000000e+00> : vector<64xf32>
    %49 = vector.multi_reduction <add>, %48, %cst_28 [1] : vector<64x128xf32> to vector<64xf32>
    %50 = vector.shape_cast %49 : vector<64xf32> to vector<64x1xf32>
    %cst_29 = arith.constant 1.562500e-02 : f32
    %51 = vector.broadcast %cst_29 : f32 to vector<64x1xf32>
    %52 = arith.mulf %50, %51 : vector<64x1xf32>
    %53 = vector.broadcast %52 : vector<64x1xf32> to vector<64x128xf32>
    %54 = arith.subf %48, %53 : vector<64x128xf32>
    %55 = arith.mulf %54, %54 : vector<64x128xf32>
    %cst_30 = arith.constant dense<0.000000e+00> : vector<64xf32>
    %56 = vector.multi_reduction <add>, %55, %cst_30 [1] : vector<64x128xf32> to vector<64xf32>
    %57 = vector.shape_cast %56 : vector<64xf32> to vector<64x1xf32>
    %58 = arith.mulf %52, %52 : vector<64x1xf32>
    %cst_31 = arith.constant 6.400000e+01 : f32
    %59 = vector.broadcast %cst_31 : f32 to vector<64x1xf32>
    %60 = arith.mulf %59, %58 : vector<64x1xf32>
    %61 = arith.subf %57, %60 : vector<64x1xf32>
    %cst_32 = arith.constant 1.562500e-02 : f32
    %62 = vector.broadcast %cst_32 : f32 to vector<64x1xf32>
    %63 = arith.mulf %61, %62 : vector<64x1xf32>
    %cst_33 = arith.constant 9.99999974E-6 : f32
    %64 = vector.broadcast %cst_33 : f32 to vector<64x1xf32>
    %65 = arith.addf %63, %64 : vector<64x1xf32>
    %66 = math.rsqrt %65 : vector<64x1xf32>
    %67 = vector.broadcast %66 : vector<64x1xf32> to vector<64x128xf32>
    %68 = arith.mulf %54, %67 : vector<64x128xf32>
    %c1 = arith.constant 1 : index
    %c0_34 = arith.constant 0 : index
    %c0_35 = arith.constant 0 : index
    %69 = vector.load %arg2[%c1, %c0_34, %c0_35] : memref<2x1x128xf32, #tpu.memory_space<vmem>>, vector<1x1x128xf32>
    %70 = vector.shape_cast %69 : vector<1x1x128xf32> to vector<1x128xf32>
    %71 = vector.broadcast %70 : vector<1x128xf32> to vector<64x128xf32>
    %72 = arith.mulf %68, %71 : vector<64x128xf32>
    %c1_36 = arith.constant 1 : index
    %c0_37 = arith.constant 0 : index
    %c0_38 = arith.constant 0 : index
    %73 = vector.load %arg3[%c1_36, %c0_37, %c0_38] : memref<2x1x128xf32, #tpu.memory_space<vmem>>, vector<1x1x128xf32>
    %74 = vector.shape_cast %73 : vector<1x1x128xf32> to vector<1x128xf32>
    %75 = vector.broadcast %74 : vector<1x128xf32> to vector<64x128xf32>
    %76 = arith.addf %72, %75 : vector<64x128xf32>
    %77 = arith.truncf %76 : vector<64x128xf32> to vector<64x128xbf16>
    %c1_39 = arith.constant 1 : index
    %c0_40 = arith.constant 0 : index
    %c0_41 = arith.constant 0 : index
    %78 = vector.load %arg4[%c1_39, %c0_40, %c0_41] : memref<2x128x128xbf16, #tpu.memory_space<vmem>>, vector<1x128x128xbf16>
    %79 = vector.shape_cast %78 : vector<1x128x128xbf16> to vector<128x128xbf16>
    %cst_42 = arith.constant dense<0.000000e+00> : vector<64x128xf32>
    %80 = tpu.matmul %77, %79, %cst_42 {dimension_numbers = #tpu.dot_dimension_numbers<[1], [0], [0], [1], [0, 0, 1, 1], [], []>} : vector<64x128xbf16>, vector<128x128xbf16>, vector<64x128xf32> -> vector<64x128xf32>
    %c1_43 = arith.constant 1 : index
    %c0_44 = arith.constant 0 : index
    %c0_45 = arith.constant 0 : index
    %81 = vector.load %arg5[%c1_43, %c0_44, %c0_45] : memref<2x1x128xf32, #tpu.memory_space<vmem>>, vector<1x1x128xf32>
    %82 = vector.shape_cast %81 : vector<1x1x128xf32> to vector<1x128xf32>
    %83 = vector.broadcast %82 : vector<1x128xf32> to vector<64x128xf32>
    %84 = arith.addf %80, %83 : vector<64x128xf32>
    %cst_46 = arith.constant 0.000000e+00 : f32
    %85 = vector.broadcast %cst_46 : f32 to vector<64x128xf32>
    %86 = arith.maximumf %84, %85 : vector<64x128xf32>
    %87 = arith.truncf %86 : vector<64x128xf32> to vector<64x128xbf16>
    %c1_47 = arith.constant 1 : index
    %c0_48 = arith.constant 0 : index
    %c0_49 = arith.constant 0 : index
    %88 = vector.load %arg6[%c1_47, %c0_48, %c0_49] : memref<2x128x128xbf16, #tpu.memory_space<vmem>>, vector<1x128x128xbf16>
    %89 = vector.shape_cast %88 : vector<1x128x128xbf16> to vector<128x128xbf16>
    %cst_50 = arith.constant dense<0.000000e+00> : vector<64x128xf32>
    %90 = tpu.matmul %87, %89, %cst_50 {dimension_numbers = #tpu.dot_dimension_numbers<[1], [0], [0], [1], [0, 0, 1, 1], [], []>} : vector<64x128xbf16>, vector<128x128xbf16>, vector<64x128xf32> -> vector<64x128xf32>
    %c1_51 = arith.constant 1 : index
    %c0_52 = arith.constant 0 : index
    %c0_53 = arith.constant 0 : index
    %91 = vector.load %arg7[%c1_51, %c0_52, %c0_53] : memref<2x1x128xf32, #tpu.memory_space<vmem>>, vector<1x1x128xf32>
    %92 = vector.shape_cast %91 : vector<1x1x128xf32> to vector<1x128xf32>
    %93 = vector.broadcast %92 : vector<1x128xf32> to vector<64x128xf32>
    %94 = arith.addf %90, %93 : vector<64x128xf32>
    %95 = arith.addf %48, %94 : vector<64x128xf32>
    %96 = arith.truncf %95 : vector<64x128xf32> to vector<64x128xbf16>
    %c0_54 = arith.constant 0 : index
    %c0_55 = arith.constant 0 : index
    %97 = vector.load %arg9[%c0_54, %c0_55] : memref<128x4xbf16, #tpu.memory_space<vmem>>, vector<128x4xbf16>
    %cst_56 = arith.constant dense<0.000000e+00> : vector<64x4xf32>
    %98 = tpu.matmul %96, %97, %cst_56 {dimension_numbers = #tpu.dot_dimension_numbers<[1], [0], [0], [1], [0, 0, 1, 1], [], []>} : vector<64x128xbf16>, vector<128x4xbf16>, vector<64x4xf32> -> vector<64x4xf32>
    %99 = arith.truncf %98 : vector<64x4xf32> to vector<64x4xbf16>
    %100 = vector.shape_cast %99 : vector<64x4xbf16> to vector<4x16x4xbf16>
    %c0_57 = arith.constant 0 : index
    %c0_58 = arith.constant 0 : index
    %101 = vector.load %arg8[%c0_57, %c0_58] : memref<16x32xbf16, #tpu.memory_space<vmem>>, vector<16x32xbf16>
    %c0_59 = arith.constant 0 : index
    %c0_60 = arith.constant 0 : index
    %102 = vector.load %arg10[%c0_59, %c0_60] : memref<4x32xf32, #tpu.memory_space<vmem>>, vector<4x32xf32>
    %103 = vector.extract_strided_slice %100 {offsets = [0, 0, 0], sizes = [1, 16, 4], strides = [1, 1, 1]} : vector<4x16x4xbf16> to vector<1x16x4xbf16>
    %104 = vector.shape_cast %103 : vector<1x16x4xbf16> to vector<16x4xbf16>
    %cst_61 = arith.constant dense<0.000000e+00> : vector<4x32xf32>
    %105 = tpu.matmul %104, %101, %cst_61 {dimension_numbers = #tpu.dot_dimension_numbers<[0], [0], [1], [1], [0, 1, 1, 1], [], []>} : vector<16x4xbf16>, vector<16x32xbf16>, vector<4x32xf32> -> vector<4x32xf32>
    %106 = arith.addf %105, %102 : vector<4x32xf32>
    %107 = arith.mulf %106, %106 : vector<4x32xf32>
    %108 = vector.shape_cast %107 : vector<4x32xf32> to vector<1x4x32xf32>
    %cst_62 = arith.constant dense<0.000000e+00> : vector<1xf32>
    %109 = vector.multi_reduction <add>, %108, %cst_62 [1, 2] : vector<1x4x32xf32> to vector<1xf32>
    %110 = vector.shape_cast %109 : vector<1xf32> to vector<1x1x1xf32>
    %111 = vector.extract %110[0, 0, 0] : f32 from vector<1x1x1xf32>
    %cst_63 = arith.constant 1.000000e-24 : f32
    %112 = arith.maximumf %111, %cst_63 : f32
    %113 = math.rsqrt %112 : f32
    %114 = vector.broadcast %113 : f32 to vector<4x32xf32>
    %115 = arith.mulf %106, %114 : vector<4x32xf32>
    %c0_64 = arith.constant 0 : index
    %c0_65 = arith.constant 0 : index
    %c0_66 = arith.constant 0 : index
    %116 = vector.load %arg11[%c0_64, %c0_65, %c0_66] : memref<4x4x32xf32, #tpu.memory_space<vmem>>, vector<1x4x32xf32>
    %117 = vector.shape_cast %116 : vector<1x4x32xf32> to vector<4x32xf32>
    %118 = vector.shape_cast %115 : vector<4x32xf32> to vector<1x4x32xf32>
    tpu.vector_store %arg11[%c0_64, %c0_65, %c0_66], %118 {strides = array<i32>} : memref<4x4x32xf32, #tpu.memory_space<vmem>>, vector<1x4x32xf32>,
    %119 = vector.extract_strided_slice %100 {offsets = [1, 0, 0], sizes = [1, 16, 4], strides = [1, 1, 1]} : vector<4x16x4xbf16> to vector<1x16x4xbf16>
    %120 = vector.shape_cast %119 : vector<1x16x4xbf16> to vector<16x4xbf16>
    %cst_67 = arith.constant dense<0.000000e+00> : vector<4x32xf32>
    %121 = tpu.matmul %120, %101, %cst_67 {dimension_numbers = #tpu.dot_dimension_numbers<[0], [0], [1], [1], [0, 1, 1, 1], [], []>} : vector<16x4xbf16>, vector<16x32xbf16>, vector<4x32xf32> -> vector<4x32xf32>
    %122 = arith.addf %121, %102 : vector<4x32xf32>
    %123 = arith.mulf %122, %122 : vector<4x32xf32>
    %124 = vector.shape_cast %123 : vector<4x32xf32> to vector<1x4x32xf32>
    %cst_68 = arith.constant dense<0.000000e+00> : vector<1xf32>
    %125 = vector.multi_reduction <add>, %124, %cst_68 [1, 2] : vector<1x4x32xf32> to vector<1xf32>
    %126 = vector.shape_cast %125 : vector<1xf32> to vector<1x1x1xf32>
    %127 = vector.extract %126[0, 0, 0] : f32 from vector<1x1x1xf32>
    %cst_69 = arith.constant 1.000000e-24 : f32
    %128 = arith.maximumf %127, %cst_69 : f32
    %129 = math.rsqrt %128 : f32
    %130 = vector.broadcast %129 : f32 to vector<4x32xf32>
    %131 = arith.mulf %122, %130 : vector<4x32xf32>
    %c1_70 = arith.constant 1 : index
    %c0_71 = arith.constant 0 : index
    %c0_72 = arith.constant 0 : index
    %132 = vector.load %arg11[%c1_70, %c0_71, %c0_72] : memref<4x4x32xf32, #tpu.memory_space<vmem>>, vector<1x4x32xf32>
    %133 = vector.shape_cast %132 : vector<1x4x32xf32> to vector<4x32xf32>
    %134 = vector.shape_cast %131 : vector<4x32xf32> to vector<1x4x32xf32>
    tpu.vector_store %arg11[%c1_70, %c0_71, %c0_72], %134 {strides = array<i32>} : memref<4x4x32xf32, #tpu.memory_space<vmem>>, vector<1x4x32xf32>,
    %135 = vector.extract_strided_slice %100 {offsets = [2, 0, 0], sizes = [1, 16, 4], strides = [1, 1, 1]} : vector<4x16x4xbf16> to vector<1x16x4xbf16>
    %136 = vector.shape_cast %135 : vector<1x16x4xbf16> to vector<16x4xbf16>
    %cst_73 = arith.constant dense<0.000000e+00> : vector<4x32xf32>
    %137 = tpu.matmul %136, %101, %cst_73 {dimension_numbers = #tpu.dot_dimension_numbers<[0], [0], [1], [1], [0, 1, 1, 1], [], []>} : vector<16x4xbf16>, vector<16x32xbf16>, vector<4x32xf32> -> vector<4x32xf32>
    %138 = arith.addf %137, %102 : vector<4x32xf32>
    %139 = arith.mulf %138, %138 : vector<4x32xf32>
    %140 = vector.shape_cast %139 : vector<4x32xf32> to vector<1x4x32xf32>
    %cst_74 = arith.constant dense<0.000000e+00> : vector<1xf32>
    %141 = vector.multi_reduction <add>, %140, %cst_74 [1, 2] : vector<1x4x32xf32> to vector<1xf32>
    %142 = vector.shape_cast %141 : vector<1xf32> to vector<1x1x1xf32>
    %143 = vector.extract %142[0, 0, 0] : f32 from vector<1x1x1xf32>
    %cst_75 = arith.constant 1.000000e-24 : f32
    %144 = arith.maximumf %143, %cst_75 : f32
    %145 = math.rsqrt %144 : f32
    %146 = vector.broadcast %145 : f32 to vector<4x32xf32>
    %147 = arith.mulf %138, %146 : vector<4x32xf32>
    %c2 = arith.constant 2 : index
    %c0_76 = arith.constant 0 : index
    %c0_77 = arith.constant 0 : index
    %148 = vector.load %arg11[%c2, %c0_76, %c0_77] : memref<4x4x32xf32, #tpu.memory_space<vmem>>, vector<1x4x32xf32>
    %149 = vector.shape_cast %148 : vector<1x4x32xf32> to vector<4x32xf32>
    %150 = vector.shape_cast %147 : vector<4x32xf32> to vector<1x4x32xf32>
    tpu.vector_store %arg11[%c2, %c0_76, %c0_77], %150 {strides = array<i32>} : memref<4x4x32xf32, #tpu.memory_space<vmem>>, vector<1x4x32xf32>,
    %151 = vector.extract_strided_slice %100 {offsets = [3, 0, 0], sizes = [1, 16, 4], strides = [1, 1, 1]} : vector<4x16x4xbf16> to vector<1x16x4xbf16>
    %152 = vector.shape_cast %151 : vector<1x16x4xbf16> to vector<16x4xbf16>
    %cst_78 = arith.constant dense<0.000000e+00> : vector<4x32xf32>
    %153 = tpu.matmul %152, %101, %cst_78 {dimension_numbers = #tpu.dot_dimension_numbers<[0], [0], [1], [1], [0, 1, 1, 1], [], []>} : vector<16x4xbf16>, vector<16x32xbf16>, vector<4x32xf32> -> vector<4x32xf32>
    %154 = arith.addf %153, %102 : vector<4x32xf32>
    %155 = arith.mulf %154, %154 : vector<4x32xf32>
    %156 = vector.shape_cast %155 : vector<4x32xf32> to vector<1x4x32xf32>
    %cst_79 = arith.constant dense<0.000000e+00> : vector<1xf32>
    %157 = vector.multi_reduction <add>, %156, %cst_79 [1, 2] : vector<1x4x32xf32> to vector<1xf32>
    %158 = vector.shape_cast %157 : vector<1xf32> to vector<1x1x1xf32>
    %159 = vector.extract %158[0, 0, 0] : f32 from vector<1x1x1xf32>
    %cst_80 = arith.constant 1.000000e-24 : f32
    %160 = arith.maximumf %159, %cst_80 : f32
    %161 = math.rsqrt %160 : f32
    %162 = vector.broadcast %161 : f32 to vector<4x32xf32>
    %163 = arith.mulf %154, %162 : vector<4x32xf32>
    %c3 = arith.constant 3 : index
    %c0_81 = arith.constant 0 : index
    %c0_82 = arith.constant 0 : index
    %164 = vector.load %arg11[%c3, %c0_81, %c0_82] : memref<4x4x32xf32, #tpu.memory_space<vmem>>, vector<1x4x32xf32>
    %165 = vector.shape_cast %164 : vector<1x4x32xf32> to vector<4x32xf32>
    %166 = vector.shape_cast %163 : vector<4x32xf32> to vector<1x4x32xf32>
    tpu.vector_store %arg11[%c3, %c0_81, %c0_82], %166 {strides = array<i32>} : memref<4x4x32xf32, #tpu.memory_space<vmem>>, vector<1x4x32xf32>,
    return
  }
  func.func @transform_0(%arg0: i32) -> (i32, i32, i32) {
    %c0_i32 = arith.constant 0 : i32
    %c0_i32_0 = arith.constant 0 : i32
    %c0_i32_1 = arith.constant 0 : i32
    return %arg0, %c0_i32, %c0_i32_0 : i32, i32, i32
  }
  func.func @transform_1(%arg0: i32) -> (i32, i32, i32) {
    %c0_i32 = arith.constant 0 : i32
    %c0_i32_0 = arith.constant 0 : i32
    %c0_i32_1 = arith.constant 0 : i32
    %c0_i32_2 = arith.constant 0 : i32
    return %c0_i32, %c0_i32_0, %c0_i32_1 : i32, i32, i32
  }
  func.func @transform_2(%arg0: i32) -> (i32, i32, i32) {
    %c0_i32 = arith.constant 0 : i32
    %c0_i32_0 = arith.constant 0 : i32
    %c0_i32_1 = arith.constant 0 : i32
    %c0_i32_2 = arith.constant 0 : i32
    return %c0_i32, %c0_i32_0, %c0_i32_1 : i32, i32, i32
  }
  func.func @transform_3(%arg0: i32) -> (i32, i32, i32) {
    %c0_i32 = arith.constant 0 : i32
    %c0_i32_0 = arith.constant 0 : i32
    %c0_i32_1 = arith.constant 0 : i32
    %c0_i32_2 = arith.constant 0 : i32
    return %c0_i32, %c0_i32_0, %c0_i32_1 : i32, i32, i32
  }
  func.func @transform_4(%arg0: i32) -> (i32, i32, i32) {
    %c0_i32 = arith.constant 0 : i32
    %c0_i32_0 = arith.constant 0 : i32
    %c0_i32_1 = arith.constant 0 : i32
    %c0_i32_2 = arith.constant 0 : i32
    return %c0_i32, %c0_i32_0, %c0_i32_1 : i32, i32, i32
  }
  func.func @transform_5(%arg0: i32) -> (i32, i32, i32) {
    %c0_i32 = arith.constant 0 : i32
    %c0_i32_0 = arith.constant 0 : i32
    %c0_i32_1 = arith.constant 0 : i32
    %c0_i32_2 = arith.constant 0 : i32
    return %c0_i32, %c0_i32_0, %c0_i32_1 : i32, i32, i32
  }
  func.func @transform_6(%arg0: i32) -> (i32, i32, i32) {
    %c0_i32 = arith.constant 0 : i32
    %c0_i32_0 = arith.constant 0 : i32
    %c0_i32_1 = arith.constant 0 : i32
    %c0_i32_2 = arith.constant 0 : i32
    return %c0_i32, %c0_i32_0, %c0_i32_1 : i32, i32, i32
  }
  func.func @transform_7(%arg0: i32) -> (i32, i32) {
    %c0_i32 = arith.constant 0 : i32
    %c0_i32_0 = arith.constant 0 : i32
    %c0_i32_1 = arith.constant 0 : i32
    return %c0_i32, %c0_i32_0 : i32, i32
  }
  func.func @transform_8(%arg0: i32) -> (i32, i32) {
    %c0_i32 = arith.constant 0 : i32
    %c0_i32_0 = arith.constant 0 : i32
    %c0_i32_1 = arith.constant 0 : i32
    return %c0_i32, %c0_i32_0 : i32, i32
  }
  func.func @transform_9(%arg0: i32) -> (i32, i32) {
    %c0_i32 = arith.constant 0 : i32
    %c0_i32_0 = arith.constant 0 : i32
    %c0_i32_1 = arith.constant 0 : i32
    return %c0_i32, %c0_i32_0 : i32, i32
  }
  func.func @transform_10(%arg0: i32) -> (i32, i32, i32) {
    %c0_i32 = arith.constant 0 : i32
    %c0_i32_0 = arith.constant 0 : i32
    %c0_i32_1 = arith.constant 0 : i32
    return %arg0, %c0_i32, %c0_i32_0 : i32, i32, i32
  }
}

</mosaic_0001>

<bundles_post_ra>
// kernel: tpu_custom_call.1
= control target key start
LH: loop header
LB: loop body
LE: loop exit
PB: predicated region body
PF: predicated region fallthrough
CT: control target
= control target key end

     0   :  { %15 = vsyncpa [#allocation3], 0  ;;  %s2326_s0 = inlined_call_operand.vmem [shape: f32[4,16,128], index: 0, kind: input, shape index: {}]   ;;  %s2327_s1 = inlined_call_operand.vmem [shape: f32[2,1,128], index: 1, kind: input, shape index: {}]   ;;  %s2328_s2 = inlined_call_operand.hbm [shape: f32[2,1,128], index: 2, kind: input, shape index: {}]   ;;  %s2329_s3 = inlined_call_operand.hbm [shape: bf16[2,128,128], index: 3, kind: input, shape index: {}]   ;;  %s2330_s4 = inlined_call_operand.hbm [shape: f32[2,1,128], index: 4, kind: input, shape index: {}]   ;;  %s2331_s5 = inlined_call_operand.hbm [shape: bf16[2,128,128], index: 5, kind: input, shape index: {}]   ;;  %s2332_s6 = inlined_call_operand.hbm [shape: f32[2,1,128], index: 6, kind: input, shape index: {}]   ;;  %s2333_s7 = inlined_call_operand.hbm [shape: bf16[16,32], index: 7, kind: input, shape index: {}]   ;;  %s2334_s8 = inlined_call_operand.vmem [shape: bf16[128,4], index: 8, kind: input, shape index: {}]   ;;  %s2335_s9 = inlined_call_operand.vmem [shape: f32[4,32], index: 9, kind: input, shape index: {}]   ;;  %s2336_s10 = inlined_call_operand.hbm [shape: f32[4,4,32], index: 10, kind: output, shape index: {}]  }
   0x1   :  { %16 = vsyncpa [#allocation6], 0 }
   0x2   :  { %17 = vsyncpa [#allocation9], 0 }
   0x3   :  { %18 = vsyncpa [#allocation12], 0  ;;  %s41_s15 = sshll.u32 %s2329_s3, 4  ;;  %s42_s15 = int_to_ptr.hbm [resolvable:$true] %s41_s15 }
   0x4   :  { %19 = vsyncpa [#allocation4], 0  ;;  %s1871_s16 = smov [#allocation5]   ;;  %s67_s20 = sshll.u32 %s2331_s5, 4  ;;  %s68_s20 = int_to_ptr.hbm [resolvable:$true] %s67_s20 }
   0x5   :  { %s43_s17 = sshll.u32 %s1871_s16, 4  ;;  %s1872_s21 = smov 64   ;;  %s44_s17 = int_to_ptr.vmem [resolvable:$true] %s43_s17 }
   0x6   :  { %s1873_s22 = smov 4   ;;  %s1874_s23 = smov [#allocation8]  }
   0x7   :  { %49 = dma.hbm_to_vmem [thread:$0]  %s42_s15, 2048, %s44_s17, [#allocation6], %s1872_s21, %s1872_s21, %s1873_s22  }
   0x8   :  { %s69_s24 = sshll.u32 %s1874_s23, 4  ;;  %s28_s26 = sshll.u32 %s2328_s2, 4  ;;  %s70_s24 = int_to_ptr.vmem [resolvable:$true] %s69_s24  ;;  %s29_s26 = int_to_ptr.hbm [resolvable:$true] %s28_s26 }
   0x9   :  { %75 = dma.hbm_to_vmem [thread:$0]  %s68_s20, 2048, %s70_s24, [#allocation9], %s1872_s21, %s1872_s21, %s1873_s22  }
   0xa   :  { %s1875_s5 = smov [#allocation2]   ;;  %s54_s30 = sshll.u32 %s2330_s4, 4  ;;  %s55_s30 = int_to_ptr.hbm [resolvable:$true] %s54_s30 }
   0xb   :  { %s30_s27 = sshll.u32 %s1875_s5, 4  ;;  %s1876_s11 = smov 16   ;;  %s31_s27 = int_to_ptr.vmem [resolvable:$true] %s30_s27 }
   0xc   :  { %s1877_s12 = smov 1   ;;  %s1878_s13 = smov [#allocation7]  }
   0xd   :  { %36 = dma.hbm_to_vmem [thread:$0]  %s29_s26, 32, %s31_s27, [#allocation3], %s1876_s11, %s1876_s11, %s1877_s12  }
   0xe   :  { %s56_s14 = sshll.u32 %s1878_s13, 4  ;;  %s80_s16 = sshll.u32 %s2332_s6, 4  ;;  %s57_s14 = int_to_ptr.vmem [resolvable:$true] %s56_s14  ;;  %s81_s16 = int_to_ptr.hbm [resolvable:$true] %s80_s16 }
   0xf   :  { %62 = dma.hbm_to_vmem [thread:$0]  %s55_s30, 32, %s57_s14, [#allocation6], %s1876_s11, %s1876_s11, %s1877_s12  }
  0x10   :  { %s93_s19 = sshll.u32 %s2333_s7, 4  ;;  %s1879_s20 = smov [#allocation10]   ;;  %s94_s19 = int_to_ptr.hbm [resolvable:$true] %s93_s19 }
  0x11   :  { %s82_s23 = sshll.u32 %s1879_s20, 4  ;;  %s1880_s4 = smov [#allocation11]   ;;  %s83_s23 = int_to_ptr.vmem [resolvable:$true] %s82_s23 }
  0x12   :  { %88 = dma.hbm_to_vmem [thread:$0]  %s81_s16, 32, %s83_s23, [#allocation9], %s1876_s11, %s1876_s11, %s1877_s12  }
  0x13   :  { %s95_s24 = sshll.u32 %s1880_s4, 4  ;;  %s96_s24 = int_to_ptr.vmem [resolvable:$true] %s95_s24 }
  0x14   :  { %101 = dma.hbm_to_vmem [thread:$0]  %s94_s19, 128, %s96_s24, [#allocation12], %s1872_s21, %s1872_s21, %s1873_s22  }
  0x15   :  { %1861 = dma.done.wait [#allocation3], 32  }
  0x16   :  { %1862 = vsyncadd [#allocation3], 4294967264 }
  0x17   :  { %1863 = dma.done.wait [#allocation6], 2080  }
  0x18   :  { %1864 = vsyncadd [#allocation6], 4294965216 }
  0x19   :  { %1865 = dma.done.wait [#allocation9], 2080  }
  0x1a   :  { %1866 = vsyncadd [#allocation9], 4294965216 }
  0x1b   :  { %1867 = dma.done.wait [#allocation12], 128  }
  0x1c   :  { %1868 = vsyncadd [#allocation12], 4294967168  ;;  %v1968_v0 = vld [vmem:[%s2326_s0 + $0x10] sm:$0xff]  ;;  %v1973_v1 = vld [vmem:[%s2326_s0] sm:$0xff]  ;;  %s1881_s12 = smov 1e-24  }
  0x1d   :  { %143 = vadd.xlane.f32.xlu2 %v1968_v0  ;;  %139 = vadd.xlane.f32.xlu0 %v1973_v1  ;;  %v1980_v2 = vld [vmem:[%s2326_s0 + $0x8] sm:$0xff]  ;;  %v1985_v3 = vld [vmem:[%s2326_s0 + $0x18] sm:$0xff]  ;;  %v1992_v4 = vld [vmem:[%s2326_s0 + $0x20] sm:$0xff]  ;;  %s1882_s20 = smov [#allocation13]   ;;  %s1382_s6 = sshll.u32 %s2336_s10, 4  ;;  %s1383_s6 = int_to_ptr.hbm [resolvable:$true] %s1382_s6 }
  0x1e   :  { %v2011_v18 = vld [vmem:[%s2326_s0 + $0x28] sm:$0xff]  ;;  %v2026_v24 = vld [vmem:[%s2326_s0 + $0x30] sm:$0xff]  ;;  %v2038_v27 = vld [vmem:[%s2326_s0 + $0x38] sm:$0xff]  ;;  %s1380_s23 = sshll.u32 %s1882_s20, 4  ;;  %s1381_s23 = int_to_ptr.vmem [resolvable:$true] %s1380_s23 }
  0x1f   :  { %v1574_v28 = vld [vmem:[#allocation5 + $0x38] sm:$0xff]  ;;  %v1573_v29 = vld [vmem:[#allocation5 + $0x30] sm:$0xff]  ;;  %v1572_v30 = vld [vmem:[#allocation5 + $0x28] sm:$0xff] }
  0x20   :  { %419 = vmatpush.bf16.msra.mxu0 %v1574_v28  ;;  %1608 = vmatpush.bf16.msra.mxu2 %v1574_v28  ;;  %v1571_v31 = vld [vmem:[#allocation5 + $0x20] sm:$0xff]  ;;  %v1570_v32 = vld [vmem:[#allocation5 + $0x18] sm:$0xff]  ;;  %v1569_v35 = vld [vmem:[#allocation5 + $0x10] sm:$0xff] }
  0x21   :  { %v1568_v42 = vld [vmem:[#allocation5 + $0x8] sm:$0xff]  ;;  %v1567_v48 = vld [vmem:[#allocation5] sm:$0xff] }
  0x24   :  { %420 = vmatpush.bf16.msra.mxu0 %v1573_v29  ;;  %1609 = vmatpush.bf16.msra.mxu2 %v1573_v29 }
  0x25   :  { %141 = vadd.xlane.f32.xlu0 %v1980_v2  ;;  %145 = vadd.xlane.f32.xlu2 %v1985_v3 }
  0x28   :  { %421 = vmatpush.bf16.msra.mxu0 %v1572_v30  ;;  %1610 = vmatpush.bf16.msra.mxu2 %v1572_v30 }
  0x2c   :  { %422 = vmatpush.bf16.msra.mxu0 %v1571_v31  ;;  %1611 = vmatpush.bf16.msra.mxu2 %v1571_v31 }
  0x2d   :  { %147 = vadd.xlane.f32.xlu2 %v1992_v4 }
  0x30   :  { %423 = vmatpush.bf16.msra.mxu0 %v1570_v32  ;;  %1612 = vmatpush.bf16.msra.mxu2 %v1570_v32 }
  0x34   :  { %424 = vmatpush.bf16.msra.mxu0 %v1569_v35  ;;  %1613 = vmatpush.bf16.msra.mxu2 %v1569_v35 }
  0x38   :  { %425 = vmatpush.bf16.msra.mxu0 %v1568_v42  ;;  %1614 = vmatpush.bf16.msra.mxu2 %v1568_v42 }
  0x3c   :  { %426 = vmatpush.bf16.msra.mxu0 %v1567_v48  ;;  %1615 = vmatpush.bf16.msra.mxu2 %v1567_v48 }
  0x90   :  { %v144_v5 = vpop.xlane.xlu2 %143  ;;  %v140_v6 = vpop.xlane.xlu0 %139 }
  0x91   :  { %v157_v7 = vmul.f32 0.015625, %v144_v5  ;;  %v155_v8 = vmul.f32 0.015625, %v140_v6 }
  0x93   :  { %v1996_v9 = vsub.f32 %v1968_v0, %v157_v7  ;;  %v1999_v10 = vsub.f32 %v1973_v1, %v155_v8  ;;  %v197_v33 = vmul.f32 %v157_v7, %v157_v7  ;;  %v195_v34 = vmul.f32 %v155_v8, %v155_v8 }
  0x95   :  { %v173_v11 = vmul.f32 %v1996_v9, %v1996_v9  ;;  %v171_v12 = vmul.f32 %v1999_v10, %v1999_v10  ;;  %v203_v36 = vmul.f32 64.0, %v195_v34  ;;  %v205_v37 = vmul.f32 64.0, %v197_v33 }
  0x97   :  { %183 = vadd.xlane.f32.xlu0 %v173_v11  ;;  %179 = vadd.xlane.f32.xlu1 %v171_v12 }
  0x98   :  { %v142_v13 = vpop.xlane.xlu0 %141  ;;  %v146_v14 = vpop.xlane.xlu2 %145 }
  0x99   :  { %v156_v15 = vmul.f32 0.015625, %v142_v13  ;;  %v158_v17 = vmul.f32 0.015625, %v146_v14 }
  0x9b   :  { %v2006_v16 = vsub.f32 %v1980_v2, %v156_v15  ;;  %v2017_v20 = vsub.f32 %v1985_v3, %v158_v17  ;;  %v196_v43 = vmul.f32 %v156_v15, %v156_v15  ;;  %v198_v54 = vmul.f32 %v158_v17, %v158_v17 }
  0x9d   :  { %v172_v19 = vmul.f32 %v2006_v16, %v2006_v16  ;;  %v174_v22 = vmul.f32 %v2017_v20, %v2017_v20  ;;  %v204_v49 = vmul.f32 64.0, %v196_v43  ;;  %v206_v63 = vmul.f32 64.0, %v198_v54 }
  0x9f   :  { %149 = vadd.xlane.f32.xlu0 %v2011_v18  ;;  %181 = vadd.xlane.f32.xlu1 %v172_v19 }
  0xa0   :  { %v148_v21 = vpop.xlane.xlu2 %147 }
  0xa1   :  { %v2021_v23 = vmul.f32 0.015625, %v148_v21 }
  0xa3   :  { %v2031_v25 = vsub.f32 %v1992_v4, %v2021_v23  ;;  %v199_v8 = vmul.f32 %v2021_v23, %v2021_v23 }
  0xa5   :  { %v175_v26 = vmul.f32 %v2031_v25, %v2031_v25  ;;  %v207_v28 = vmul.f32 64.0, %v199_v8 }
  0xa7   :  { %151 = vadd.xlane.f32.xlu0 %v2026_v24  ;;  %185 = vadd.xlane.f32.xlu1 %v174_v22 }
  0xaf   :  { %187 = vadd.xlane.f32.xlu1 %v175_v26 }
  0xb7   :  { %153 = vadd.xlane.f32.xlu1 %v2038_v27 }
 0x10a   :  { %v180_v38 = vpop.xlane.xlu1 %179  ;;  %v184_v39 = vpop.xlane.xlu0 %183 }
 0x10b   :  { %v211_v40 = vsub.f32 %v180_v38, %v203_v36  ;;  %v213_v41 = vsub.f32 %v184_v39, %v205_v37 }
 0x10d   :  { %v219_v44 = vmul.f32 0.015625, %v211_v40  ;;  %v221_v45 = vmul.f32 0.015625, %v213_v41  ;;  %v2072_v40 = vld [vmem:[%s2327_s1] ss:$0 sm:$0xff] }
 0x10f   :  { %v227_v46 = vadd.f32 1e-05, %v219_v44  ;;  %v2041_v47 = vadd.f32 1e-05, %v221_v45 }
 0x111   :  { %1653 = vrsqrt.f32 %v227_v46  ;;  %vm241_vm1 = vweird.f32 %v227_v46  ;;  %vm261_vm7 = vweird.f32 %v2041_v47 }
 0x112   :  { %1655 = vrsqrt.f32 %v2041_v47  ;;  %v182_v50 = vpop.xlane.xlu1 %181  ;;  %v150_v51 = vpop.xlane.xlu0 %149 }
 0x113   :  { %v212_v52 = vsub.f32 %v182_v50, %v204_v49  ;;  %v2044_v53 = vmul.f32 0.015625, %v150_v51  ;;  %v2080_v50 = vld [vmem:[#allocation2] ss:$0 sm:$0xff] }
 0x115   :  { %v220_v55 = vmul.f32 0.015625, %v212_v52  ;;  %v2048_v56 = vsub.f32 %v2011_v18, %v2044_v53 }
 0x117   :  { %v1654_v57 = vpop.eup %1653  ;;  %v228_v58 = vadd.f32 1e-05, %v220_v55  ;;  %v176_v59 = vmul.f32 %v2048_v56, %v2048_v56 }
 0x118   :  { %v2052_v60 = vpop.eup %1655  ;;  %v236_v61 = vmul.f32 %v1654_v57, %v227_v46  ;;  %vm242_vm0 = vweird.f32 %v1654_v57 }
 0x119   :  { %v256_v62 = vmul.f32 %v2052_v60, %v2041_v47  ;;  %1657 = vrsqrt.f32 %v228_v58  ;;  %189 = vadd.xlane.f32.xlu2 %v176_v59  ;;  %vm243_vm2 = vmor %vm241_vm1, %vm242_vm0  ;;  %vm262_vm4 = vweird.f32 %v2052_v60  ;;  %vm251_vm5 = vweird.f32 %v228_v58 }
 0x11a   :  { %v237_v5 = vmul.f32 %v1654_v57, %v236_v61  ;;  %v186_v6 = vpop.xlane.xlu1 %185  ;;  %v152_v7 = vpop.xlane.xlu0 %151  ;;  %vm263_vm8 = vmor %vm261_vm7, %vm262_vm4 }
 0x11b   :  { %v214_v11 = vsub.f32 %v186_v6, %v206_v63  ;;  %v2058_v12 = vmul.f32 0.015625, %v152_v7  ;;  %v257_v14 = vmul.f32 %v2052_v60, %v256_v62 }
 0x11c   :  { %v238_v13 = vmul.f32 0.5, %v237_v5 }
 0x11d   :  { %v222_v15 = vmul.f32 0.015625, %v214_v11  ;;  %v2063_v17 = vsub.f32 %v2026_v24, %v2058_v12  ;;  %v258_v23 = vmul.f32 0.5, %v257_v14  ;;  %v1582_v14 = vld [vmem:[#allocation8 + $0x38] sm:$0xff] }
 0x11e   :  { %v239_v19 = vsub.f32 1.5, %v238_v13  ;;  %528 = vmatpush.bf16.msra.mxu1 %v1582_v14 }
 0x11f   :  { %v1658_v21 = vpop.eup %1657  ;;  %v230_v22 = vadd.f32 1e-05, %v222_v15  ;;  %v177_v26 = vmul.f32 %v2063_v17, %v2063_v17  ;;  %v259_v34 = vsub.f32 1.5, %v258_v23  ;;  %v1581_v15 = vld [vmem:[#allocation8 + $0x30] sm:$0xff]  ;;  %v201_v23 = vmul.f32 %v2058_v12, %v2058_v12 }
 0x120   :  { %v240_v29 = vmul.f32 %v1654_v57, %v239_v19  ;;  %v246_v30 = vmul.f32 %v1658_v21, %v228_v58  ;;  %vm252_vm3 = vweird.f32 %v1658_v21 }
 0x121   :  { %1659 = vrsqrt.f32 %v230_v22  ;;  %191 = vadd.xlane.f32.xlu2 %v177_v26  ;;  %v260_v41 = vmul.f32 %v2052_v60, %v259_v34  ;;  %vm253_vm6 = vmor %vm251_vm5, %vm252_vm3  ;;  %vm271_vm10 = vweird.f32 %v230_v22 }
 0x122   :  { %v247_v31 = vmul.f32 %v1658_v21, %v246_v30  ;;  %v188_v32 = vpop.xlane.xlu1 %187  ;;  %v244_v36 = vsel %vm243_vm2, %v1654_v57, %v240_v29  ;;  %529 = vmatpush.bf16.msra.mxu1 %v1581_v15 }
 0x123   :  { %v215_v33 = vsub.f32 %v188_v32, %v207_v28  ;;  %v315_v39 = vmul.f32 %v244_v36, %v1999_v10  ;;  %v264_v52 = vsel %vm263_vm8, %v2052_v60, %v260_v41  ;;  %v1579_v28 = vld [vmem:[#allocation8 + $0x20] sm:$0xff] }
 0x124   :  { %v248_v35 = vmul.f32 0.5, %v247_v31  ;;  %v317_v59 = vmul.f32 %v264_v52, %v1996_v9 }
 0x125   :  { %v327_v49 = vmul.f32 %v2072_v40, %v315_v39  ;;  %v223_v9 = vmul.f32 0.015625, %v215_v33  ;;  %v1578_v33 = vld [vmem:[#allocation8 + $0x18] sm:$0xff] }
 0x126   :  { %v249_v37 = vsub.f32 1.5, %v248_v35  ;;  %v329_v5 = vmul.f32 %v2072_v40, %v317_v59  ;;  %v209_v35 = vmul.f32 64.0, %v201_v23 }
 0x127   :  { %v1660_v38 = vpop.eup %1659  ;;  %v231_v13 = vadd.f32 1e-05, %v223_v9 }
 0x128   :  { %v250_v42 = vmul.f32 %v1658_v21, %v249_v37  ;;  %v266_v43 = vmul.f32 %v1660_v38, %v230_v22  ;;  %vm272_vm9 = vweird.f32 %v1660_v38  ;;  %v341_v7 = vadd.f32 %v2080_v50, %v329_v5 }
 0x129   :  { %vm273_vm11 = vmor %vm271_vm10, %vm272_vm9  ;;  %1661 = vrsqrt.f32 %v231_v13  ;;  %vm281_vm13 = vweird.f32 %v231_v13 }
 0x12a   :  { %v267_v44 = vmul.f32 %v1660_v38, %v266_v43  ;;  %v154_v45 = vpop.xlane.xlu1 %153  ;;  %v254_v46 = vsel %vm253_vm6, %v1658_v21, %v250_v42  ;;  %v1580_v21 = vld [vmem:[#allocation8 + $0x28] sm:$0xff] }
 0x12b   :  { %v2076_v48 = vmul.f32 0.015625, %v154_v45  ;;  %v316_v10 = vmul.f32 %v254_v46, %v2006_v16  ;;  %v339_v16 = vadd.f32 %v2080_v50, %v327_v49  ;;  %530 = vmatpush.bf16.msra.mxu1 %v1580_v21  ;;  %v1576_v42 = vld [vmem:[#allocation8 + $0x8] sm:$0xff]  ;;  %v1575_v46 = vld [vmem:[#allocation8] sm:$0xff]  ;;  %v1647_v21 = vld [vmem:[#allocation7] ss:$0 sm:$0xff] }
 0x12c   :  { %v268_v51 = vmul.f32 0.5, %v267_v44 }
 0x12d   :  { %v2085_v54 = vsub.f32 %v2038_v27, %v2076_v48  ;;  %v328_v47 = vmul.f32 %v2072_v40, %v316_v10  ;;  %v202_v49 = vmul.f32 %v2076_v48, %v2076_v48 }
 0x12e   :  { %v269_v55 = vsub.f32 1.5, %v268_v51 }
 0x12f   :  { %v178_v57 = vmul.f32 %v2085_v54, %v2085_v54  ;;  %v340_v58 = vadd.f32 %v2080_v50, %v328_v47  ;;  %v1662_v19 = vpop.eup %1661  ;;  %531 = vmatpush.bf16.msra.mxu1 %v1579_v28 }
 0x130   :  { %v270_v61 = vmul.f32 %v1660_v38, %v269_v55  ;;  %v276_v22 = vmul.f32 %v1662_v19, %v231_v13  ;;  %vm282_vm12 = vweird.f32 %v1662_v19 }
 0x131   :  { %193 = vadd.xlane.f32.xlu0 %v178_v57  ;;  %v347_v60 = vpack.c.bf16 %v340_v58, %v339_v16  ;;  %vm283_vm14 = vmor %vm281_vm13, %vm282_vm12  ;;  %v210_v57 = vmul.f32 64.0, %v202_v49 }
 0x132   :  { %v274_v62 = vsel %vm273_vm11, %v1660_v38, %v270_v61  ;;  %v277_v31 = vmul.f32 %v1662_v19, %v276_v22 }
 0x133   :  { %427 = vmatmul.bf16.vlgmr.msra.gmra.mxu0 %v347_v60  ;;  %v318_v63 = vmul.f32 %v274_v62, %v2017_v20  ;;  %v200_v20 = vmul.f32 %v2044_v53, %v2044_v53  ;;  %532 = vmatpush.bf16.msra.mxu1 %v1578_v33  ;;  %v1577_v53 = vld [vmem:[#allocation8 + $0x10] sm:$0xff] }
 0x134   :  { %v278_v36 = vmul.f32 0.5, %v277_v31 }
 0x135   :  { %v330_v6 = vmul.f32 %v2072_v40, %v318_v63  ;;  %v208_v26 = vmul.f32 64.0, %v200_v20 }
 0x136   :  { %v279_v39 = vsub.f32 1.5, %v278_v36 }
 0x137   :  { %v342_v8 = vadd.f32 %v2080_v50, %v330_v6  ;;  %533 = vmatpush.bf16.msra.mxu1 %v1577_v53 }
 0x138   :  { %v280_v12 = vmul.f32 %v1662_v19, %v279_v39 }
 0x139   :  { %v348_v11 = vpack.c.bf16 %v342_v8, %v341_v7 }
 0x13a   :  { %v284_v52 = vsel %vm283_vm14, %v1662_v19, %v280_v12 }
 0x13b   :  { %534 = vmatpush.bf16.msra.mxu1 %v1576_v42  ;;  %v319_v16 = vmul.f32 %v284_v52, %v2031_v25 }
 0x13d   :  { %v331_v48 = vmul.f32 %v2072_v40, %v319_v16 }
 0x13f   :  { %535 = vmatpush.bf16.msra.mxu1 %v1575_v46 }
 0x143   :  { %432 = vmatmul.bf16.gmra.mxu0 %v348_v11  ;;  %v343_v11 = vadd.f32 %v2080_v50, %v331_v48 }
 0x18c   :  { %v190_v29 = vpop.xlane.xlu2 %189 }
 0x18d   :  { %v216_v30 = vsub.f32 %v190_v29, %v208_v26 }
 0x18f   :  { %v224_v32 = vmul.f32 0.015625, %v216_v30 }
 0x191   :  { %v232_v34 = vadd.f32 1e-05, %v224_v32 }
 0x193   :  { %1663 = vrsqrt.f32 %v232_v34  ;;  %vm291_vm0 = vweird.f32 %v232_v34 }
 0x194   :  { %v192_v37 = vpop.xlane.xlu2 %191 }
 0x195   :  { %v217_v38 = vsub.f32 %v192_v37, %v209_v35 }
 0x197   :  { %v225_v41 = vmul.f32 0.015625, %v217_v38 }
 0x199   :  { %v1664_v43 = vpop.eup %1663  ;;  %v233_v44 = vadd.f32 1e-05, %v225_v41 }
 0x19a   :  { %v286_v45 = vmul.f32 %v1664_v43, %v232_v34  ;;  %vm292_vm15 = vweird.f32 %v1664_v43 }
 0x19b   :  { %1665 = vrsqrt.f32 %v233_v44  ;;  %vm293_vm1 = vmor %vm291_vm0, %vm292_vm15  ;;  %vm301_vm2 = vweird.f32 %v233_v44 }
 0x19c   :  { %v287_v10 = vmul.f32 %v1664_v43, %v286_v45 }
 0x19e   :  { %v288_v51 = vmul.f32 0.5, %v287_v10 }
 0x1a0   :  { %v289_v47 = vsub.f32 1.5, %v288_v51 }
 0x1a1   :  { %v1666_v55 = vpop.eup %1665 }
 0x1a2   :  { %v290_v58 = vmul.f32 %v1664_v43, %v289_v47  ;;  %v296_v59 = vmul.f32 %v1666_v55, %v233_v44  ;;  %vm302_vm3 = vweird.f32 %v1666_v55 }
 0x1a3   :  { %vm303_vm4 = vmor %vm301_vm2, %vm302_vm3 }
 0x1a4   :  { %v194_v61 = vpop.xlane.xlu0 %193  ;;  %v294_v60 = vsel %vm293_vm1, %v1664_v43, %v290_v58  ;;  %v297_v5 = vmul.f32 %v1666_v55, %v296_v59 }
 0x1a5   :  { %v218_v62 = vsub.f32 %v194_v61, %v210_v57  ;;  %v320_v63 = vmul.f32 %v294_v60, %v2048_v56 }
 0x1a6   :  { %v298_v9 = vmul.f32 0.5, %v297_v5 }
 0x1a7   :  { %v226_v6 = vmul.f32 0.015625, %v218_v62  ;;  %v332_v7 = vmul.f32 %v2072_v40, %v320_v63 }
 0x1a8   :  { %v299_v14 = vsub.f32 1.5, %v298_v9 }
 0x1a9   :  { %v234_v8 = vadd.f32 1e-05, %v226_v6  ;;  %v344_v25 = vadd.f32 %v2080_v50, %v332_v7 }
 0x1aa   :  { %v300_v19 = vmul.f32 %v1666_v55, %v299_v14 }
 0x1ab   :  { %1667 = vrsqrt.f32 %v234_v8  ;;  %v349_v13 = vpack.c.bf16 %v344_v25, %v343_v11  ;;  %vm311_vm6 = vweird.f32 %v234_v8 }
 0x1ac   :  { %v304_v28 = vsel %vm303_vm4, %v1666_v55, %v300_v19  ;;  %v2116_v55 = vld [vmem:[#allocation10] ss:$0 sm:$0xff] }
 0x1ad   :  { %437 = vmatmul.bf16.vlgmr.msra.gmra.mxu2 %v349_v13  ;;  %v321_v32 = vmul.f32 %v304_v28, %v2063_v17 }
 0x1af   :  { %v333_v38 = vmul.f32 %v2072_v40, %v321_v32 }
 0x1b0   :  { %v428_v15 = vpop.f32.mrf.mxu0 }
 0x1b1   :  { %v1668_v56 = vpop.eup %1667  ;;  %v429_v29 = vadd.f32 %v1647_v21, %v428_v15  ;;  %v345_v42 = vadd.f32 %v2080_v50, %v333_v38  ;;  %v1589_v38 = vld [vmem:[#allocation5 + $0x70] sm:$0xff] }
 0x1b2   :  { %v306_v20 = vmul.f32 %v1668_v56, %v234_v8  ;;  %vm312_vm5 = vweird.f32 %v1668_v56 }
 0x1b3   :  { %vm313_vm7 = vmor %vm311_vm6, %vm312_vm5  ;;  %v448_v34 = vmax.f32 %v429_v29, 0.0 }
 0x1b4   :  { %v307_v22 = vmul.f32 %v1668_v56, %v306_v20 }
 0x1b6   :  { %v308_v26 = vmul.f32 0.5, %v307_v22 }
 0x1b8   :  { %v309_v23 = vsub.f32 1.5, %v308_v26  ;;  %v430_v30 = vpop.f32.mrf.mxu0 }
 0x1b9   :  { %v431_v31 = vadd.f32 %v1647_v21, %v430_v30 }
 0x1ba   :  { %v310_v33 = vmul.f32 %v1668_v56, %v309_v23 }
 0x1bb   :  { %v449_v35 = vmax.f32 %v431_v31, 0.0 }
 0x1bc   :  { %v314_v36 = vsel %vm313_vm7, %v1668_v56, %v310_v33 }
 0x1bd   :  { %v456_v53 = vpack.c.bf16 %v449_v35, %v448_v34  ;;  %v322_v37 = vmul.f32 %v314_v36, %v2085_v54 }
 0x1bf   :  { %536 = vmatmul.bf16.vlgmr.msra.gmra.mxu1 %v456_v53  ;;  %v334_v39 = vmul.f32 %v2072_v40, %v322_v37  ;;  %v1590_v37 = vld [vmem:[#allocation5 + $0x78] sm:$0xff] }
 0x1c0   :  { %v433_v41 = vpop.f32.mrf.mxu0  ;;  %849 = vmatpush.bf16.msrb.mxu2 %v1590_v37 }
 0x1c1   :  { %v346_v43 = vadd.f32 %v2080_v50, %v334_v39  ;;  %v434_v44 = vadd.f32 %v1647_v21, %v433_v41  ;;  %v1588_v39 = vld [vmem:[#allocation5 + $0x68] sm:$0xff]  ;;  %v1587_v41 = vld [vmem:[#allocation5 + $0x60] sm:$0xff] }
 0x1c3   :  { %v350_v17 = vpack.c.bf16 %v346_v43, %v345_v42  ;;  %v450_v46 = vmax.f32 %v434_v44, 0.0  ;;  %v1585_v43 = vld [vmem:[#allocation5 + $0x50] sm:$0xff] }
 0x1c4   :  { %850 = vmatpush.bf16.msrb.mxu2 %v1589_v38 }
 0x1c5   :  { %442 = vmatmul.bf16.gmra.mxu2 %v350_v17 }
 0x1c8   :  { %v435_v12 = vpop.f32.mrf.mxu0  ;;  %851 = vmatpush.bf16.msrb.mxu2 %v1588_v39 }
 0x1c9   :  { %v436_v45 = vadd.f32 %v1647_v21, %v435_v12 }
 0x1cb   :  { %v451_v10 = vmax.f32 %v436_v45, 0.0 }
 0x1cc   :  { %852 = vmatpush.bf16.msrb.mxu2 %v1587_v41 }
 0x1cd   :  { %v457_v49 = vpack.c.bf16 %v451_v10, %v450_v46 }
 0x1cf   :  { %541 = vmatmul.bf16.gmra.mxu1 %v457_v49  ;;  %v1583_v49 = vld [vmem:[#allocation5 + $0x40] sm:$0xff] }
 0x230   :  { %v438_v54 = vpop.f32.mrf.mxu2 }
 0x231   :  { %v439_v51 = vadd.f32 %v1647_v21, %v438_v54 }
 0x233   :  { %v452_v40 = vmax.f32 %v439_v51, 0.0 }
 0x238   :  { %v440_v52 = vpop.f32.mrf.mxu2 }
 0x239   :  { %v441_v47 = vadd.f32 %v1647_v21, %v440_v52 }
 0x23b   :  { %v453_v57 = vmax.f32 %v441_v47, 0.0 }
 0x23c   :  { %v537_v16 = vpop.f32.mrf.mxu1 }
 0x23d   :  { %v538_v50 = vadd.f32 %v2116_v55, %v537_v16  ;;  %v458_v58 = vpack.c.bf16 %v453_v57, %v452_v40 }
 0x23f   :  { %v2120_v59 = vadd.f32 %v538_v50, %v1973_v1  ;;  %546 = vmatmul.bf16.gmra.mxu1 %v458_v58 }
 0x241   :  { %565 = vadd.xlane.f32.xlu1 %v2120_v59 }
 0x244   :  { %v539_v61 = vpop.f32.mrf.mxu1 }
 0x245   :  { %v540_v60 = vadd.f32 %v2116_v55, %v539_v61 }
 0x247   :  { %v2125_v62 = vadd.f32 %v540_v60, %v1980_v2 }
 0x248   :  { %v443_v63 = vpop.f32.mrf.mxu2 }
 0x249   :  { %567 = vadd.xlane.f32.xlu2 %v2125_v62  ;;  %v444_v6 = vadd.f32 %v1647_v21, %v443_v63 }
 0x24b   :  { %v454_v11 = vmax.f32 %v444_v6, 0.0 }
 0x24c   :  { %v542_v48 = vpop.f32.mrf.mxu1 }
 0x24d   :  { %v543_v5 = vadd.f32 %v2116_v55, %v542_v48 }
 0x24f   :  { %v2130_v7 = vadd.f32 %v543_v5, %v1968_v0 }
 0x250   :  { %v445_v1 = vpop.f32.mrf.mxu2 }
 0x251   :  { %v446_v8 = vadd.f32 %v1647_v21, %v445_v1  ;;  %569 = vadd.xlane.f32.xlu2 %v2130_v7 }
 0x253   :  { %v455_v25 = vmax.f32 %v446_v8, 0.0 }
 0x254   :  { %v544_v15 = vpop.f32.mrf.mxu1 }
 0x255   :  { %v459_v9 = vpack.c.bf16 %v455_v25, %v454_v11  ;;  %v545_v19 = vadd.f32 %v2116_v55, %v544_v15 }
 0x257   :  { %551 = vmatmul.bf16.gmra.mxu1 %v459_v9  ;;  %v2143_v26 = vadd.f32 %v545_v19, %v1985_v3 }
 0x2b4   :  { %v566_v2 = vpop.xlane.xlu1 %565 }
 0x2b5   :  { %v581_v13 = vmul.f32 0.015625, %v566_v2 }
 0x2b7   :  { %v2134_v14 = vsub.f32 %v2120_v59, %v581_v13  ;;  %v621_v42 = vmul.f32 %v581_v13, %v581_v13 }
 0x2b9   :  { %v597_v56 = vmul.f32 %v2134_v14, %v2134_v14  ;;  %v629_v17 = vmul.f32 64.0, %v621_v42 }
 0x2bb   :  { %605 = vadd.xlane.f32.xlu0 %v597_v56 }
 0x2bc   :  { %v568_v0 = vpop.xlane.xlu2 %567  ;;  %v547_v22 = vpop.f32.mrf.mxu1 }
 0x2bd   :  { %v582_v20 = vmul.f32 0.015625, %v568_v0  ;;  %v548_v23 = vadd.f32 %v2116_v55, %v547_v22 }
 0x2bf   :  { %v2140_v21 = vsub.f32 %v2125_v62, %v582_v20  ;;  %v2153_v32 = vadd.f32 %v548_v23, %v1992_v4  ;;  %v622_v45 = vmul.f32 %v582_v20, %v582_v20 }
 0x2c1   :  { %v598_v28 = vmul.f32 %v2140_v21, %v2140_v21  ;;  %v630_v54 = vmul.f32 64.0, %v622_v45 }
 0x2c3   :  { %571 = vadd.xlane.f32.xlu0 %v2143_v26  ;;  %607 = vadd.xlane.f32.xlu1 %v598_v28 }
 0x2c4   :  { %v570_v29 = vpop.xlane.xlu2 %569  ;;  %v549_v33 = vpop.f32.mrf.mxu1 }
 0x2c5   :  { %v583_v30 = vmul.f32 0.015625, %v570_v29  ;;  %v550_v34 = vadd.f32 %v2116_v55, %v549_v33 }
 0x2c7   :  { %v2150_v31 = vsub.f32 %v2130_v7, %v583_v30  ;;  %v2160_v35 = vadd.f32 %v550_v34, %v2011_v18  ;;  %v1586_v18 = vld [vmem:[#allocation5 + $0x58] sm:$0xff]  ;;  %v623_v57 = vmul.f32 %v583_v30, %v583_v30 }
 0x2c8   :  { %853 = vmatpush.bf16.msrb.mxu2 %v1586_v18 }
 0x2c9   :  { %v599_v3 = vmul.f32 %v2150_v31, %v2150_v31  ;;  %v631_v48 = vmul.f32 64.0, %v623_v57 }
 0x2cb   :  { %573 = vadd.xlane.f32.xlu0 %v2153_v32  ;;  %609 = vadd.xlane.f32.xlu1 %v599_v3 }
 0x2cc   :  { %854 = vmatpush.bf16.msrb.mxu2 %v1585_v43 }
 0x2d3   :  { %575 = vadd.xlane.f32.xlu1 %v2160_v35 }
 0x2d4   :  { %v552_v36 = vpop.f32.mrf.mxu1 }
 0x2d5   :  { %v553_v53 = vadd.f32 %v2116_v55, %v552_v36 }
 0x2d7   :  { %v2165_v4 = vadd.f32 %v553_v53, %v2026_v24  ;;  %v1584_v24 = vld [vmem:[#allocation5 + $0x48] sm:$0xff] }
 0x2d8   :  { %855 = vmatpush.bf16.msrb.mxu2 %v1584_v24 }
 0x2db   :  { %577 = vadd.xlane.f32.xlu1 %v2165_v4 }
 0x2dc   :  { %856 = vmatpush.bf16.msrb.mxu2 %v1583_v49  ;;  %v554_v56 = vpop.f32.mrf.mxu1 }
 0x2dd   :  { %v555_v28 = vadd.f32 %v2116_v55, %v554_v56  ;;  %v2194_v55 = vld [vmem:[%s2327_s1 + $0x1] ss:$0 sm:$0xff] }
 0x2df   :  { %v2186_v34 = vadd.f32 %v555_v28, %v2038_v27 }
 0x32e   :  { %v606_v44 = vpop.xlane.xlu0 %605 }
 0x32f   :  { %v637_v12 = vsub.f32 %v606_v44, %v629_v17 }
 0x331   :  { %v645_v46 = vmul.f32 0.015625, %v637_v12 }
 0x333   :  { %v653_v10 = vadd.f32 1e-05, %v645_v46  ;;  %v1598_v46 = vld [vmem:[#allocation8 + $0x78] sm:$0xff] }
 0x334   :  { %960 = vmatpush.bf16.msra.mxu3 %v1598_v46 }
 0x335   :  { %1669 = vrsqrt.f32 %v653_v10  ;;  %vm667_vm9 = vweird.f32 %v653_v10 }
 0x336   :  { %v608_v51 = vpop.xlane.xlu1 %607  ;;  %v572_v52 = vpop.xlane.xlu0 %571 }
 0x337   :  { %v638_v47 = vsub.f32 %v608_v51, %v630_v54  ;;  %v2168_v40 = vmul.f32 0.015625, %v572_v52  ;;  %v1597_v54 = vld [vmem:[#allocation8 + $0x70] sm:$0xff] }
 0x338   :  { %961 = vmatpush.bf16.msra.mxu3 %v1597_v54 }
 0x339   :  { %v646_v16 = vmul.f32 0.015625, %v638_v47  ;;  %v2172_v50 = vsub.f32 %v2143_v26, %v2168_v40  ;;  %v624_v49 = vmul.f32 %v2168_v40, %v2168_v40 }
 0x33b   :  { %v1670_v58 = vpop.eup %1669  ;;  %v654_v61 = vadd.f32 1e-05, %v646_v16  ;;  %v600_v60 = vmul.f32 %v2172_v50, %v2172_v50  ;;  %v632_v52 = vmul.f32 64.0, %v624_v49  ;;  %v1596_v16 = vld [vmem:[#allocation8 + $0x68] sm:$0xff] }
 0x33c   :  { %v662_v63 = vmul.f32 %v1670_v58, %v653_v10  ;;  %vm668_vm8 = vweird.f32 %v1670_v58  ;;  %962 = vmatpush.bf16.msra.mxu3 %v1596_v16 }
 0x33d   :  { %1671 = vrsqrt.f32 %v654_v61  ;;  %611 = vadd.xlane.f32.xlu2 %v600_v60  ;;  %vm669_vm10 = vmor %vm667_vm9, %vm668_vm8  ;;  %vm677_vm12 = vweird.f32 %v654_v61 }
 0x33e   :  { %v663_v5 = vmul.f32 %v1670_v58, %v662_v63  ;;  %v610_v6 = vpop.xlane.xlu1 %609  ;;  %v574_v1 = vpop.xlane.xlu0 %573 }
 0x33f   :  { %v639_v8 = vsub.f32 %v610_v6, %v631_v48  ;;  %v585_v11 = vmul.f32 0.015625, %v574_v1  ;;  %v1595_v48 = vld [vmem:[#allocation8 + $0x60] sm:$0xff] }
 0x340   :  { %v664_v25 = vmul.f32 0.5, %v663_v5  ;;  %963 = vmatpush.bf16.msra.mxu3 %v1595_v48 }
 0x341   :  { %v2177_v9 = vsub.f32 %v2153_v32, %v585_v11 }
 0x342   :  { %v665_v2 = vsub.f32 1.5, %v664_v25 }
 0x343   :  { %v1672_v13 = vpop.eup %1671  ;;  %v601_v15 = vmul.f32 %v2177_v9, %v2177_v9 }
 0x344   :  { %v666_v0 = vmul.f32 %v1670_v58, %v665_v2  ;;  %v672_v19 = vmul.f32 %v1672_v13, %v654_v61  ;;  %vm678_vm11 = vweird.f32 %v1672_v13  ;;  %v625_v61 = vmul.f32 %v585_v11, %v585_v11 }
 0x345   :  { %613 = vadd.xlane.f32.xlu2 %v601_v15  ;;  %vm679_vm13 = vmor %vm677_vm12, %vm678_vm11 }
 0x346   :  { %v673_v20 = vmul.f32 %v1672_v13, %v672_v19  ;;  %v576_v22 = vpop.xlane.xlu1 %575  ;;  %v670_v23 = vsel %vm669_vm10, %v1670_v58, %v666_v0  ;;  %v633_v6 = vmul.f32 64.0, %v625_v61  ;;  %v1593_v0 = vld [vmem:[#allocation8 + $0x50] sm:$0xff] }
 0x347   :  { %v586_v29 = vmul.f32 0.015625, %v576_v22  ;;  %v741_v53 = vmul.f32 %v670_v23, %v2134_v14  ;;  %v2201_v14 = vld [vmem:[#allocation2 + $0x1] ss:$0 sm:$0xff] }
 0x348   :  { %v674_v30 = vmul.f32 0.5, %v673_v20 }
 0x349   :  { %v2183_v3 = vsub.f32 %v2160_v35, %v586_v29  ;;  %v754_v18 = vmul.f32 %v2194_v55, %v741_v53  ;;  %v626_v2 = vmul.f32 %v586_v29, %v586_v29  ;;  %v1592_v29 = vld [vmem:[#allocation8 + $0x48] sm:$0xff] }
 0x34a   :  { %v675_v33 = vsub.f32 1.5, %v674_v30 }
 0x34b   :  { %v602_v36 = vmul.f32 %v2183_v3, %v2183_v3  ;;  %v767_v44 = vadd.f32 %v2201_v14, %v754_v18  ;;  %v634_v20 = vmul.f32 64.0, %v626_v2  ;;  %v2232_v2 = vld [vmem:[#allocation7 + $0x1] ss:$0 sm:$0xff] }
 0x34c   :  { %v676_v37 = vmul.f32 %v1672_v13, %v675_v33 }
 0x34d   :  { %615 = vadd.xlane.f32.xlu0 %v602_v36  ;;  %579 = vadd.xlane.f32.xlu2 %v2186_v34 }
 0x34e   :  { %v680_v38 = vsel %vm679_vm13, %v1672_v13, %v676_v37  ;;  %v578_v39 = vpop.xlane.xlu1 %577 }
 0x34f   :  { %v2197_v27 = vmul.f32 0.015625, %v578_v39  ;;  %v742_v41 = vmul.f32 %v680_v38, %v2140_v21  ;;  %v647_v21 = vmul.f32 0.015625, %v639_v8  ;;  %v1594_v8 = vld [vmem:[#allocation8 + $0x58] sm:$0xff] }
 0x350   :  { %964 = vmatpush.bf16.msra.mxu3 %v1594_v8 }
 0x351   :  { %v2205_v42 = vsub.f32 %v2165_v4, %v2197_v27  ;;  %v755_v43 = vmul.f32 %v2194_v55, %v742_v41  ;;  %v655_v45 = vadd.f32 1e-05, %v647_v21 }
 0x353   :  { %v603_v17 = vmul.f32 %v2205_v42, %v2205_v42  ;;  %v768_v12 = vadd.f32 %v2201_v14, %v755_v43  ;;  %1673 = vrsqrt.f32 %v655_v45  ;;  %vm687_vm15 = vweird.f32 %v655_v45 }
 0x354   :  { %965 = vmatpush.bf16.msra.mxu3 %v1593_v0 }
 0x355   :  { %617 = vadd.xlane.f32.xlu0 %v603_v17  ;;  %v775_v24 = vpack.c.bf16 %v768_v12, %v767_v44  ;;  %v1591_v44 = vld [vmem:[#allocation8 + $0x40] sm:$0xff] }
 0x357   :  { %857 = vmatmul.bf16.vlgmr.msrb.gmra.mxu2 %v775_v24 }
 0x358   :  { %966 = vmatpush.bf16.msra.mxu3 %v1592_v29 }
 0x359   :  { %v1674_v10 = vpop.eup %1673 }
 0x35a   :  { %v682_v51 = vmul.f32 %v1674_v10, %v655_v45  ;;  %vm688_vm14 = vweird.f32 %v1674_v10 }
 0x35b   :  { %vm689_vm0 = vmor %vm687_vm15, %vm688_vm14 }
 0x35c   :  { %v683_v58 = vmul.f32 %v1674_v10, %v682_v51  ;;  %967 = vmatpush.bf16.msra.mxu3 %v1591_v44 }
 0x35e   :  { %v684_v5 = vmul.f32 0.5, %v683_v58 }
 0x360   :  { %v685_v25 = vsub.f32 1.5, %v684_v5 }
 0x362   :  { %v686_v19 = vmul.f32 %v1674_v10, %v685_v25 }
 0x364   :  { %v690_v53 = vsel %vm689_vm0, %v1674_v10, %v686_v19  ;;  %vm1133_vm0 = vcmask 130048  }
 0x365   :  { %v743_v17 = vmul.f32 %v690_v53, %v2150_v31 }
 0x367   :  { %v756_v10 = vmul.f32 %v2194_v55, %v743_v17  ;;  %v1606_v17 = vld [vmem:[%s2334_s8 + $0x38] sm:$0xff] }
 0x368   :  { %1065 = vmatpush.bf16.msrb.mxu0 %v1606_v17 }
 0x369   :  { %v769_v31 = vadd.f32 %v2201_v14, %v756_v10  ;;  %v1603_v10 = vld [vmem:[%s2334_s8 + $0x20] sm:$0xff] }
 0x3b0   :  { %v612_v47 = vpop.xlane.xlu2 %611 }
 0x3b1   :  { %v640_v57 = vsub.f32 %v612_v47, %v632_v52 }
 0x3b3   :  { %v648_v60 = vmul.f32 0.015625, %v640_v57 }
 0x3b5   :  { %v656_v63 = vadd.f32 1e-05, %v648_v60 }
 0x3b7   :  { %1675 = vrsqrt.f32 %v656_v63  ;;  %vm697_vm2 = vweird.f32 %v656_v63 }
 0x3b8   :  { %v614_v1 = vpop.xlane.xlu2 %613 }
 0x3b9   :  { %v641_v40 = vsub.f32 %v614_v1, %v633_v6 }
 0x3bb   :  { %v649_v13 = vmul.f32 0.015625, %v641_v40 }
 0x3bd   :  { %v1676_v15 = vpop.eup %1675  ;;  %v657_v56 = vadd.f32 1e-05, %v649_v13 }
 0x3be   :  { %v692_v11 = vmul.f32 %v1676_v15, %v656_v63  ;;  %vm698_vm1 = vweird.f32 %v1676_v15 }
 0x3bf   :  { %1677 = vrsqrt.f32 %v657_v56  ;;  %vm699_vm3 = vmor %vm697_vm2, %vm698_vm1  ;;  %vm707_vm5 = vweird.f32 %v657_v56  ;;  %vm1151_vm1 = vcmask 257024  }
 0x3c0   :  { %v693_v22 = vmul.f32 %v1676_v15, %v692_v11  ;;  %v580_v28 = vpop.xlane.xlu2 %579  ;;  %v616_v23 = vpop.xlane.xlu0 %615 }
 0x3c1   :  { %v2214_v30 = vmul.f32 0.015625, %v580_v28  ;;  %v642_v33 = vsub.f32 %v616_v23, %v634_v20 }
 0x3c2   :  { %v694_v36 = vmul.f32 0.5, %v693_v22  ;;  %v627_v22 = vmul.f32 %v2197_v27, %v2197_v27 }
 0x3c3   :  { %v2218_v37 = vsub.f32 %v2186_v34, %v2214_v30  ;;  %v650_v38 = vmul.f32 0.015625, %v642_v33 }
 0x3c4   :  { %v695_v39 = vsub.f32 1.5, %v694_v36  ;;  %v635_v23 = vmul.f32 64.0, %v627_v22  ;;  %v1652_v22 = vld [vmem:[#allocation10 + $0x1] ss:$0 sm:$0xff] }
 0x3c5   :  { %v1678_v41 = vpop.eup %1677  ;;  %v658_v18 = vadd.f32 1e-05, %v650_v38  ;;  %v604_v43 = vmul.f32 %v2218_v37, %v2218_v37  ;;  %v628_v38 = vmul.f32 %v2214_v30, %v2214_v30  ;;  %v1604_v30 = vld [vmem:[%s2334_s8 + $0x28] sm:$0xff] }
 0x3c6   :  { %v696_v12 = vmul.f32 %v1676_v15, %v695_v39  ;;  %v702_v24 = vmul.f32 %v1678_v41, %v657_v56  ;;  %vm708_vm4 = vweird.f32 %v1678_v41 }
 0x3c7   :  { %1679 = vrsqrt.f32 %v658_v18  ;;  %619 = vadd.xlane.f32.xlu1 %v604_v43  ;;  %vm709_vm6 = vmor %vm707_vm5, %vm708_vm4  ;;  %vm717_vm8 = vweird.f32 %v658_v18 }
 0x3c8   :  { %v703_v21 = vmul.f32 %v1678_v41, %v702_v24  ;;  %v700_v45 = vsel %vm699_vm3, %v1676_v15, %v696_v12  ;;  %v618_v28 = vpop.xlane.xlu0 %617  ;;  %v1605_v24 = vld [vmem:[%s2334_s8 + $0x30] sm:$0xff] }
 0x3c9   :  { %v744_v46 = vmul.f32 %v700_v45, %v2172_v50  ;;  %v643_v33 = vsub.f32 %v618_v28, %v635_v23  ;;  %1066 = vmatpush.bf16.msrb.mxu0 %v1605_v24 }
 0x3ca   :  { %v704_v49 = vmul.f32 0.5, %v703_v21 }
 0x3cb   :  { %v757_v54 = vmul.f32 %v2194_v55, %v744_v46  ;;  %v651_v29 = vmul.f32 0.015625, %v643_v33 }
 0x3cc   :  { %v705_v51 = vsub.f32 1.5, %v704_v49 }
 0x3cd   :  { %v1680_v52 = vpop.eup %1679  ;;  %v770_v47 = vadd.f32 %v2201_v14, %v757_v54  ;;  %v659_v36 = vadd.f32 1e-05, %v651_v29  ;;  %1067 = vmatpush.bf16.msrb.mxu0 %v1604_v30 }
 0x3ce   :  { %v706_v57 = vmul.f32 %v1678_v41, %v705_v51  ;;  %v712_v16 = vmul.f32 %v1680_v52, %v658_v18  ;;  %vm718_vm7 = vweird.f32 %v1680_v52 }
 0x3cf   :  { %v776_v58 = vpack.c.bf16 %v770_v47, %v769_v31  ;;  %vm719_vm9 = vmor %vm717_vm8, %vm718_vm7  ;;  %1681 = vrsqrt.f32 %v659_v36  ;;  %vm727_vm11 = vweird.f32 %v659_v36 }
 0x3d0   :  { %v713_v61 = vmul.f32 %v1680_v52, %v712_v16  ;;  %v710_v60 = vsel %vm709_vm6, %v1678_v41, %v706_v57  ;;  %v636_v41 = vmul.f32 64.0, %v628_v38 }
 0x3d1   :  { %862 = vmatmul.bf16.gmra.mxu2 %v776_v58  ;;  %v745_v48 = vmul.f32 %v710_v60, %v2177_v9  ;;  %1068 = vmatpush.bf16.msrb.mxu0 %v1603_v10  ;;  %v1601_v58 = vld [vmem:[%s2334_s8 + $0x10] sm:$0xff] }
 0x3d2   :  { %v714_v50 = vmul.f32 0.5, %v713_v61 }
 0x3d3   :  { %v758_v40 = vmul.f32 %v2194_v55, %v745_v48  ;;  %v1600_v48 = vld [vmem:[%s2334_s8 + $0x8] sm:$0xff] }
 0x3d4   :  { %v715_v63 = vsub.f32 1.5, %v714_v50 }
 0x3d5   :  { %v771_v13 = vadd.f32 %v2201_v14, %v758_v40  ;;  %v1682_v53 = vpop.eup %1681  ;;  %v1599_v40 = vld [vmem:[%s2334_s8] sm:$0xff] }
 0x3d6   :  { %v716_v5 = vmul.f32 %v1680_v52, %v715_v63  ;;  %v722_v39 = vmul.f32 %v1682_v53, %v659_v36  ;;  %vm728_vm10 = vweird.f32 %v1682_v53 }
 0x3d7   :  { %vm729_vm12 = vmor %vm727_vm11, %vm728_vm10 }
 0x3d8   :  { %v720_v6 = vsel %vm719_vm9, %v1680_v52, %v716_v5  ;;  %v723_v44 = vmul.f32 %v1682_v53, %v722_v39  ;;  %v1602_v52 = vld [vmem:[%s2334_s8 + $0x18] sm:$0xff] }
 0x3d9   :  { %v746_v1 = vmul.f32 %v720_v6, %v2183_v3  ;;  %1069 = vmatpush.bf16.msrb.mxu0 %v1602_v52 }
 0x3da   :  { %v858_v8 = vpop.f32.mrf.mxu2  ;;  %v724_v21 = vmul.f32 0.5, %v723_v44 }
 0x3db   :  { %v759_v25 = vmul.f32 %v2194_v55, %v746_v1  ;;  %v859_v9 = vadd.f32 %v2232_v2, %v858_v8 }
 0x3dc   :  { %v725_v45 = vsub.f32 1.5, %v724_v21 }
 0x3dd   :  { %v772_v15 = vadd.f32 %v2201_v14, %v759_v25  ;;  %v878_v11 = vmax.f32 %v859_v9, 0.0  ;;  %1070 = vmatpush.bf16.msrb.mxu0 %v1601_v58 }
 0x3de   :  { %v726_v49 = vmul.f32 %v1682_v53, %v725_v45 }
 0x3df   :  { %v777_v56 = vpack.c.bf16 %v772_v15, %v771_v13 }
 0x3e0   :  { %v730_v47 = vsel %vm729_vm12, %v1682_v53, %v726_v49 }
 0x3e1   :  { %867 = vmatmul.bf16.gmra.mxu2 %v777_v56  ;;  %v747_v16 = vmul.f32 %v730_v47, %v2205_v42  ;;  %1071 = vmatpush.bf16.msrb.mxu0 %v1600_v48 }
 0x3e2   :  { %v860_v0 = vpop.f32.mrf.mxu2 }
 0x3e3   :  { %v861_v19 = vadd.f32 %v2232_v2, %v860_v0  ;;  %v760_v63 = vmul.f32 %v2194_v55, %v747_v16 }
 0x3e5   :  { %v879_v3 = vmax.f32 %v861_v19, 0.0  ;;  %v773_v6 = vadd.f32 %v2201_v14, %v760_v63  ;;  %1072 = vmatpush.bf16.msrb.mxu0 %v1599_v40 }
 0x3e7   :  { %v886_v20 = vpack.c.bf16 %v879_v3, %v878_v11 }
 0x3e9   :  { %968 = vmatmul.bf16.vlgmr.msra.gmra.mxu3 %v886_v20 }
 0x43a   :  { %v620_v18 = vpop.xlane.xlu1 %619 }
 0x43b   :  { %v644_v43 = vsub.f32 %v620_v18, %v636_v41 }
 0x43d   :  { %v652_v27 = vmul.f32 0.015625, %v644_v43 }
 0x43f   :  { %v660_v12 = vadd.f32 1e-05, %v652_v27 }
 0x441   :  { %1683 = vrsqrt.f32 %v660_v12  ;;  %vm737_vm14 = vweird.f32 %v660_v12 }
 0x447   :  { %v1684_v46 = vpop.eup %1683 }
 0x448   :  { %v732_v54 = vmul.f32 %v1684_v46, %v660_v12  ;;  %vm738_vm13 = vweird.f32 %v1684_v46 }
 0x449   :  { %vm739_vm15 = vmor %vm737_vm14, %vm738_vm13 }
 0x44a   :  { %v733_v51 = vmul.f32 %v1684_v46, %v732_v54 }
 0x44c   :  { %v734_v31 = vmul.f32 0.5, %v733_v51 }
 0x44e   :  { %v735_v57 = vsub.f32 1.5, %v734_v31 }
 0x450   :  { %v736_v61 = vmul.f32 %v1684_v46, %v735_v57 }
 0x452   :  { %v740_v50 = vsel %vm739_vm15, %v1684_v46, %v736_v61 }
 0x453   :  { %v748_v60 = vmul.f32 %v740_v50, %v2218_v37  ;;  %v1607_v50 = vld [vmem:[#allocation11] sm:$0xff] }
 0x454   :  { %v863_v5 = vpop.f32.mrf.mxu2  ;;  %1144 = vmatpush.bf16.msrb.mxu1 %v1607_v50  ;;  %1210 = vmatpush.bf16.msrb.mxu3 %v1607_v50 }
 0x455   :  { %v761_v42 = vmul.f32 %v2194_v55, %v748_v60  ;;  %v864_v37 = vadd.f32 %v2232_v2, %v863_v5 }
 0x457   :  { %v774_v1 = vadd.f32 %v2201_v14, %v761_v42  ;;  %v880_v15 = vmax.f32 %v864_v37, 0.0 }
 0x458   :  { %1276 = vmatpush.bf16.msra.mxu3 %v1607_v50  ;;  %1342 = vmatpush.bf16.msra.mxu1 %v1607_v50 }
 0x459   :  { %v778_v8 = vpack.c.bf16 %v774_v1, %v773_v6 }
 0x45b   :  { %872 = vmatmul.bf16.gmra.mxu2 %v778_v8 }
 0x45c   :  { %v865_v25 = vpop.f32.mrf.mxu2 }
 0x45d   :  { %v866_v13 = vadd.f32 %v2232_v2, %v865_v25 }
 0x45f   :  { %v881_v56 = vmax.f32 %v866_v13, 0.0 }
 0x461   :  { %v887_v55 = vpack.c.bf16 %v881_v56, %v880_v15 }
 0x463   :  { %973 = vmatmul.bf16.gmra.mxu3 %v887_v55 }
 0x464   :  { %v868_v9 = vpop.f32.mrf.mxu2 }
 0x465   :  { %v869_v0 = vadd.f32 %v2232_v2, %v868_v9 }
 0x467   :  { %v882_v3 = vmax.f32 %v869_v0, 0.0 }
 0x46c   :  { %v870_v14 = vpop.f32.mrf.mxu2  ;;  %v969_v19 = vpop.f32.mrf.mxu3 }
 0x46d   :  { %v871_v11 = vadd.f32 %v2232_v2, %v870_v14  ;;  %v970_v23 = vadd.f32 %v1652_v22, %v969_v19 }
 0x46f   :  { %v883_v20 = vmax.f32 %v871_v11, 0.0  ;;  %v989_v36 = vadd.f32 %v970_v23, %v2120_v59  ;;  %v1104_v23 = vld [vmem:[%s2335_s9] sm:$0xf] }
 0x471   :  { %v888_v28 = vpack.c.bf16 %v883_v20, %v882_v3 }
 0x473   :  { %978 = vmatmul.bf16.gmra.mxu3 %v888_v28 }
 0x474   :  { %v971_v33 = vpop.f32.mrf.mxu3 }
 0x475   :  { %v972_v29 = vadd.f32 %v1652_v22, %v971_v33 }
 0x477   :  { %v990_v53 = vadd.f32 %v972_v29, %v2125_v62 }
 0x479   :  { %v997_v38 = vpack.c.bf16 %v990_v53, %v989_v36 }
 0x47b   :  { %1073 = vmatmul.bf16.vlgmr.msrb.gmra.mxu0 %v997_v38 }
 0x4de   :  { %v873_v39 = vpop.f32.mrf.mxu2 }
 0x4df   :  { %v874_v41 = vadd.f32 %v2232_v2, %v873_v39 }
 0x4e1   :  { %v884_v44 = vmax.f32 %v874_v41, 0.0 }
 0x4e6   :  { %v875_v18 = vpop.f32.mrf.mxu2  ;;  %v974_v43 = vpop.f32.mrf.mxu3 }
 0x4e7   :  { %v876_v17 = vadd.f32 %v2232_v2, %v875_v18  ;;  %v975_v24 = vadd.f32 %v1652_v22, %v974_v43 }
 0x4e9   :  { %v885_v27 = vmax.f32 %v876_v17, 0.0  ;;  %v991_v59 = vadd.f32 %v975_v24, %v2130_v7 }
 0x4eb   :  { %v889_v12 = vpack.c.bf16 %v885_v27, %v884_v44 }
 0x4ed   :  { %983 = vmatmul.bf16.gmra.mxu3 %v889_v12 }
 0x4ee   :  { %v976_v21 = vpop.f32.mrf.mxu3 }
 0x4ef   :  { %v977_v30 = vadd.f32 %v1652_v22, %v976_v21 }
 0x4f1   :  { %v992_v62 = vadd.f32 %v977_v30, %v2143_v26 }
 0x4f3   :  { %v998_v45 = vpack.c.bf16 %v992_v62, %v991_v59 }
 0x4f5   :  { %1078 = vmatmul.bf16.gmra.mxu0 %v998_v45 }
 0x4f6   :  { %v979_v46 = vpop.f32.mrf.mxu3 }
 0x4f7   :  { %v980_v49 = vadd.f32 %v1652_v22, %v979_v46 }
 0x4f8   :  { %v1074_v10 = vpop.f32.mrf.mxu0 }
 0x4f9   :  { %v1094_v51 = vpack.c.bf16 %v1074_v10, %v1074_v10  ;;  %v993_v31 = vadd.f32 %v980_v49, %v2153_v32 }
 0x4fb   :  { %v1107_v16 = vunpack.c.l.b16 %v1094_v51 }
 0x4fe   :  { %v981_v54 = vpop.f32.mrf.mxu3 }
 0x4ff   :  { %v982_v52 = vadd.f32 %v1652_v22, %v981_v54 }
 0x500   :  { %v1076_v2 = vpop.f32.mrf.mxu0 }
 0x501   :  { %v994_v47 = vadd.f32 %v982_v52, %v2160_v35  ;;  %v1095_v57 = vpack.c.bf16 %v1076_v2, %v1076_v2 }
 0x503   :  { %v1108_v58 = vunpack.c.l.b16 %v1095_v57  ;;  %v999_v61 = vpack.c.bf16 %v994_v47, %v993_v31 }
 0x505   :  { %1083 = vmatmul.bf16.gmra.mxu0 %v999_v61  ;;  %v1109_v7 = vpack.c.b16 %v1108_v58, %v1107_v16 }
 0x507   :  { %1111 = vxpose.xlu2.c.b16.start.end [1/1] (short) (narrow) %v1109_v7, 16 }
 0x570   :  { %v984_v26 = vpop.f32.mrf.mxu3 }
 0x571   :  { %v985_v63 = vadd.f32 %v1652_v22, %v984_v26 }
 0x572   :  { %v1079_v60 = vpop.f32.mrf.mxu0 }
 0x573   :  { %v1096_v5 = vpack.c.bf16 %v1079_v60, %v1079_v60  ;;  %v995_v35 = vadd.f32 %v985_v63, %v2165_v4 }
 0x575   :  { %v1180_v40 = vunpack.c.l.b16 %v1096_v5 }
 0x578   :  { %v986_v48 = vpop.f32.mrf.mxu3 }
 0x579   :  { %v987_v32 = vadd.f32 %v1652_v22, %v986_v48 }
 0x57a   :  { %v1081_v42 = vpop.f32.mrf.mxu0 }
 0x57b   :  { %v996_v6 = vadd.f32 %v987_v32, %v2186_v34  ;;  %v1097_v1 = vpack.c.bf16 %v1081_v42, %v1081_v42 }
 0x57d   :  { %v1181_v8 = vunpack.c.l.b16 %v1097_v1  ;;  %v1000_v37 = vpack.c.bf16 %v996_v6, %v995_v35 }
 0x57f   :  { %1088 = vmatmul.bf16.gmra.mxu0 %v1000_v37  ;;  %v1182_v25 = vpack.c.b16 %v1181_v8, %v1180_v40 }
 0x581   :  { %1184 = vxpose.xlu0.c.b16.start.end [1/1] (short) (narrow) %v1182_v25, 16 }
 0x582   :  { %v1084_v13 = vpop.f32.mrf.mxu0 }
 0x583   :  { %v1098_v15 = vpack.c.bf16 %v1084_v13, %v1084_v13 }
 0x585   :  { %v1246_v9 = vunpack.c.l.b16 %v1098_v15 }
 0x58a   :  { %v1086_v56 = vpop.f32.mrf.mxu0 }
 0x58b   :  { %v1099_v55 = vpack.c.bf16 %v1086_v56, %v1086_v56 }
 0x58d   :  { %v1247_v0 = vunpack.c.l.b16 %v1099_v55 }
 0x58f   :  { %v1248_v14 = vpack.c.b16 %v1247_v0, %v1246_v9 }
 0x591   :  { %1250 = vxpose.xlu1.c.b16.start.end [1/1] (short) (narrow) %v1248_v14, 16 }
 0x5a8   :  { %v1119_v19 = vpop.trf.xlu2 }
 0x5a9   :  { %1563 = vmatmul.msk.bf16.vlgmr.msrb.gmra.mxu1 %vm1133_vm0, %v1119_v19 }
 0x5fc   :  { %v1089_v4 = vpop.f32.mrf.mxu0 }
 0x5fd   :  { %v1100_v34 = vpack.c.bf16 %v1089_v4, %v1089_v4 }
 0x5ff   :  { %v1312_v20 = vunpack.c.l.b16 %v1100_v34 }
 0x604   :  { %v1091_v11 = vpop.f32.mrf.mxu0 }
 0x605   :  { %v1101_v3 = vpack.c.bf16 %v1091_v11, %v1091_v11 }
 0x607   :  { %v1313_v22 = vunpack.c.l.b16 %v1101_v3 }
 0x609   :  { %v1314_v28 = vpack.c.b16 %v1313_v22, %v1312_v20 }
 0x60b   :  { %1316 = vxpose.xlu0.c.b16.start.end [1/1] (short) (narrow) %v1314_v28, 16 }
 0x626   :  { %v1146_v33 = vpop.f32.mrf.mxu1 }
 0x627   :  { %v1147_v29 = vadd.f32 %v1146_v33, %v1104_v23 }
 0x629   :  { %v1150_v36 = vmul.f32 %v1147_v29, %v1147_v29 }
 0x62b   :  { %v1152_v53 = vsel %vm1151_vm1, %v1150_v36, 0.0 }
 0x62c   :  { %1153 = vadd.xlane.f32.xlu2 %v1152_v53 }
 0x62d   :  { %v1192_v38 = vpop.trf.xlu0 }
 0x62e   :  { %1564 = vmatmul.msk.bf16.vlgmr.msrb.gmra.mxu3 %vm1133_vm0, %v1192_v38  ;;  %v1148_v39 = vpop.f32.mrf.mxu1 }
 0x63d   :  { %v1258_v41 = vpop.trf.xlu1 }
 0x63e   :  { %1565 = vmatmul.msk.bf16.vlgmr.msra.gmra.mxu3 %vm1133_vm0, %v1258_v41 }
 0x69f   :  { %v1154_v18 = vpop.xlane.xlu2 %1153 }
 0x6a0   :  { %v1155_v43 = vrot.slane %v1154_v18, 4 }
 0x6a2   :  { %v1156_v17 = vadd.f32 %v1155_v43, %v1154_v18 }
 0x6a4   :  { %v1157_v44 = vrot.slane %v1156_v17, 2 }
 0x6a6   :  { %v1158_v27 = vadd.f32 %v1157_v44, %v1156_v17 }
 0x6a8   :  { %v1159_v12 = vrot.slane %v1158_v27, 1 }
 0x6aa   :  { %v1160_v24 = vadd.f32 %v1159_v12, %v1158_v27 }
 0x6ac   :  { %1616 = vpush %v1160_v24 }
 0x6b1   :  { %v1212_v21 = vpop.f32.mrf.mxu3 }
 0x6b2   :  { %v2293_v30 = vadd.f32 %v1212_v21, %v1104_v23 }
 0x6b4   :  { %v1216_v59 = vmul.f32 %v2293_v30, %v2293_v30 }
 0x6b6   :  { %v1217_v62 = vsel %vm1151_vm1, %v1216_v59, 0.0 }
 0x6b7   :  { %1218 = vadd.xlane.f32.xlu0 %v1217_v62  ;;  %v1324_v45 = vpop.trf.xlu0 }
 0x6b8   :  { %1566 = vmatmul.msk.bf16.vlgmr.msra.gmra.mxu1 %vm1133_vm0, %v1324_v45 }
 0x6b9   :  { %v1214_v46 = vpop.f32.mrf.mxu3 }
 0x6c1   :  { %v1278_v10 = vpop.f32.mrf.mxu3 }
 0x6c2   :  { %v2299_v49 = vadd.f32 %v1278_v10, %v1104_v23 }
 0x6c4   :  { %v1282_v54 = vmul.f32 %v2299_v49, %v2299_v49 }
 0x6c6   :  { %v1283_v51 = vsel %vm1151_vm1, %v1282_v54, 0.0 }
 0x6c7   :  { %1284 = vadd.xlane.f32.xlu1 %v1283_v51 }
 0x6c9   :  { %v1280_v52 = vpop.f32.mrf.mxu3 }
 0x6dd   :  { %s1617_s9 = spop %1616 }
 0x6de   :  { %s1162_s13 = smax.f32 %s1881_s12, %s1617_s9 }
 0x6df   :  { %v1163_v2 = vstv %s1162_s13 }
 0x6e0   :  { %1685 = vrsqrt.f32 %v1163_v2  ;;  %vm1170_vm2 = vweird.f32 %v1163_v2 }
 0x6e6   :  { %v1686_v31 = vpop.eup %1685 }
 0x6e7   :  { %v1165_v47 = vmul.f32 %v1686_v31, %v1163_v2  ;;  %vm1171_vm3 = vweird.f32 %v1686_v31 }
 0x6e8   :  { %vm1172_vm4 = vmor %vm1170_vm2, %vm1171_vm3 }
 0x6e9   :  { %v1166_v57 = vmul.f32 %v1686_v31, %v1165_v47 }
 0x6eb   :  { %v1167_v16 = vmul.f32 0.5, %v1166_v57 }
 0x6ed   :  { %v1168_v58 = vsub.f32 1.5, %v1167_v16 }
 0x6ef   :  { %v1169_v61 = vmul.f32 %v1686_v31, %v1168_v58 }
 0x6f1   :  { %v1173_v7 = vsel %vm1172_vm4, %v1686_v31, %v1169_v61 }
 0x6f2   :  { %1618 = vpush %v1173_v7 }
 0x723   :  { %s1619_s14 = spop %1618 }
 0x724   :  { %v1175_v26 = vstv %s1619_s14 }
 0x725   :  { %v1176_v50 = vmul.f32 %v1175_v26, %v1147_v29 }
 0x727   :  { %1177 = vst.msk [vmem:[#allocation13] sm:$0xf] %vm1151_vm1, %v1176_v50 }
 0x72a   :  { %v1219_v60 = vpop.xlane.xlu0 %1218 }
 0x72b   :  { %v1220_v63 = vrot.slane %v1219_v60, 4 }
 0x72d   :  { %v1221_v48 = vadd.f32 %v1220_v63, %v1219_v60 }
 0x72f   :  { %v1222_v5 = vrot.slane %v1221_v48, 2 }
 0x731   :  { %v1223_v32 = vadd.f32 %v1222_v5, %v1221_v48 }
 0x733   :  { %v1224_v42 = vrot.slane %v1223_v32, 1 }
 0x735   :  { %v1344_v35 = vpop.f32.mrf.mxu1  ;;  %v1225_v6 = vadd.f32 %v1224_v42, %v1223_v32 }
 0x736   :  { %v2306_v1 = vadd.f32 %v1344_v35, %v1104_v23 }
 0x737   :  { %1620 = vpush %v1225_v6 }
 0x738   :  { %v1348_v40 = vmul.f32 %v2306_v1, %v2306_v1 }
 0x73a   :  { %v1349_v8 = vsel %vm1151_vm1, %v1348_v40, 0.0  ;;  %v1285_v25 = vpop.xlane.xlu1 %1284 }
 0x73b   :  { %1350 = vadd.xlane.f32.xlu2 %v1349_v8  ;;  %v1286_v13 = vrot.slane %v1285_v25, 4 }
 0x73d   :  { %v1346_v37 = vpop.f32.mrf.mxu1  ;;  %v1287_v56 = vadd.f32 %v1286_v13, %v1285_v25 }
 0x73f   :  { %v1288_v55 = vrot.slane %v1287_v56, 2 }
 0x741   :  { %v1289_v19 = vadd.f32 %v1288_v55, %v1287_v56 }
 0x743   :  { %v1290_v11 = vrot.slane %v1289_v19, 1 }
 0x745   :  { %v1291_v22 = vadd.f32 %v1290_v11, %v1289_v19 }
 0x768   :  { %s1621_s2 = spop %1620 }
 0x769   :  { %s1227_s15 = smax.f32 %s1881_s12, %s1621_s2 }
 0x76a   :  { %v1228_v15 = vstv %s1227_s15 }
 0x76b   :  { %1687 = vrsqrt.f32 %v1228_v15  ;;  %vm1235_vm6 = vweird.f32 %v1228_v15 }
 0x771   :  { %v1688_v9 = vpop.eup %1687 }
 0x772   :  { %v1230_v0 = vmul.f32 %v1688_v9, %v1228_v15  ;;  %vm1236_vm5 = vweird.f32 %v1688_v9 }
 0x773   :  { %vm1237_vm7 = vmor %vm1235_vm6, %vm1236_vm5 }
 0x774   :  { %v1231_v14 = vmul.f32 %v1688_v9, %v1230_v0 }
 0x776   :  { %v1232_v4 = vmul.f32 0.5, %v1231_v14 }
 0x778   :  { %v1233_v34 = vsub.f32 1.5, %v1232_v4 }
 0x77a   :  { %v1234_v3 = vmul.f32 %v1688_v9, %v1233_v34 }
 0x77c   :  { %v1238_v20 = vsel %vm1237_vm7, %v1688_v9, %v1234_v3 }
 0x77d   :  { %1622 = vpush %v1238_v20 }
 0x77e   :  { %1624 = vpush %v1291_v22 }
 0x7ae   :  { %s1623_s0 = spop %1622  ;;  %v1351_v28 = vpop.xlane.xlu2 %1350 }
 0x7af   :  { %v1240_v23 = vstv %s1623_s0  ;;  %s1625_s16 = spop %1624  ;;  %v1352_v33 = vrot.slane %v1351_v28, 4 }
 0x7b0   :  { %v1241_v29 = vmul.f32 %v1240_v23, %v2293_v30  ;;  %s1293_s17 = smax.f32 %s1881_s12, %s1625_s16 }
 0x7b1   :  { %v1294_v36 = vstv %s1293_s17  ;;  %v1353_v53 = vadd.f32 %v1352_v33, %v1351_v28 }
 0x7b2   :  { %1243 = vst.msk [vmem:[#allocation13 + $0x4] sm:$0xf] %vm1151_vm1, %v1241_v29  ;;  %1689 = vrsqrt.f32 %v1294_v36  ;;  %vm1301_vm9 = vweird.f32 %v1294_v36 }
 0x7b3   :  { %v1354_v38 = vrot.slane %v1353_v53, 2 }
 0x7b5   :  { %v1355_v43 = vadd.f32 %v1354_v38, %v1353_v53 }
 0x7b7   :  { %v1356_v27 = vrot.slane %v1355_v43, 1 }
 0x7b8   :  { %v1690_v39 = vpop.eup %1689 }
 0x7b9   :  { %v1296_v41 = vmul.f32 %v1690_v39, %v1294_v36  ;;  %vm1302_vm8 = vweird.f32 %v1690_v39  ;;  %v1357_v21 = vadd.f32 %v1356_v27, %v1355_v43 }
 0x7ba   :  { %vm1303_vm10 = vmor %vm1301_vm9, %vm1302_vm8 }
 0x7bb   :  { %v1297_v18 = vmul.f32 %v1690_v39, %v1296_v41 }
 0x7bd   :  { %v1298_v17 = vmul.f32 0.5, %v1297_v18 }
 0x7bf   :  { %v1299_v44 = vsub.f32 1.5, %v1298_v17 }
 0x7c1   :  { %v1300_v12 = vmul.f32 %v1690_v39, %v1299_v44 }
 0x7c3   :  { %v1304_v24 = vsel %vm1303_vm10, %v1690_v39, %v1300_v12 }
 0x7c4   :  { %1626 = vpush %v1304_v24 }
 0x7c5   :  { %1628 = vpush %v1357_v21 }
 0x7f5   :  { %s1627_s18 = spop %1626 }
 0x7f6   :  { %v1306_v30 = vstv %s1627_s18  ;;  %s1629_s1 = spop %1628 }
 0x7f7   :  { %v1307_v59 = vmul.f32 %v1306_v30, %v2299_v49  ;;  %s1359_s19 = smax.f32 %s1881_s12, %s1629_s1 }
 0x7f8   :  { %v1360_v62 = vstv %s1359_s19 }
 0x7f9   :  { %1309 = vst.msk [vmem:[#allocation13 + $0x8] sm:$0xf] %vm1151_vm1, %v1307_v59  ;;  %1691 = vrsqrt.f32 %v1360_v62  ;;  %vm1367_vm12 = vweird.f32 %v1360_v62 }
 0x7ff   :  { %v1692_v45 = vpop.eup %1691 }
 0x800   :  { %v1362_v46 = vmul.f32 %v1692_v45, %v1360_v62  ;;  %vm1368_vm11 = vweird.f32 %v1692_v45 }
 0x801   :  { %vm1369_vm13 = vmor %vm1367_vm12, %vm1368_vm11 }
 0x802   :  { %v1363_v10 = vmul.f32 %v1692_v45, %v1362_v46 }
 0x804   :  { %v1364_v54 = vmul.f32 0.5, %v1363_v10 }
 0x806   :  { %v1365_v51 = vsub.f32 1.5, %v1364_v54 }
 0x808   :  { %v1366_v52 = vmul.f32 %v1692_v45, %v1365_v51 }
 0x80a   :  { %v1370_v2 = vsel %vm1369_vm13, %v1692_v45, %v1366_v52 }
 0x80b   :  { %1630 = vpush %v1370_v2 }
 0x83c   :  { %s1631_s7 = spop %1630 }
 0x83d   :  { %v1372_v49 = vstv %s1631_s7 }
 0x83e   :  { %v1373_v31 = vmul.f32 %v1372_v49, %v2306_v1 }
 0x840   :  { %1375 = vst.msk [vmem:[#allocation13 + $0xc] sm:$0xf] %vm1151_vm1, %v1373_v31 }
 0x841   :  { %1388 = dma.vmem_to_hbm [thread:$0]  %s1381_s23, 256, %s1383_s6, [#allocation4], %s1872_s21, %s1872_s21, %s1873_s22  }
 0x842   :  { %1869 = dma.done.wait [#allocation4], 256  }
 0x843   :  { %1870 = vsyncadd [#allocation4], 4294967040 }
 0x844   :  { %1393 = vsyncpa [#allocation3], 1 }
 0x845   :  { %1394 = vsyncpa [#allocation6], 1 }
 0x846   :  { %1395 = vsyncpa [#allocation9], 1 }
 0x847   :  { %1396 = vsyncpa [#allocation12], 1 }
 0x848   :  { %1397 = vsyncpa [#allocation4], 1 }

// kernel: tpu_custom_call.1
= control target key start
LH: loop header
LB: loop body
LE: loop exit
PB: predicated region body
PF: predicated region fallthrough
CT: control target
= control target key end

     0   :  { %15 = vsyncpa [#allocation3], 0  ;;  %s2326_s0 = inlined_call_operand.vmem [shape: f32[4,16,128], index: 0, kind: input, shape index: {}]   ;;  %s2327_s1 = inlined_call_operand.vmem [shape: f32[2,1,128], index: 1, kind: input, shape index: {}]   ;;  %s2328_s2 = inlined_call_operand.hbm [shape: f32[2,1,128], index: 2, kind: input, shape index: {}]   ;;  %s2329_s3 = inlined_call_operand.hbm [shape: bf16[2,128,128], index: 3, kind: input, shape index: {}]   ;;  %s2330_s4 = inlined_call_operand.hbm [shape: f32[2,1,128], index: 4, kind: input, shape index: {}]   ;;  %s2331_s5 = inlined_call_operand.hbm [shape: bf16[2,128,128], index: 5, kind: input, shape index: {}]   ;;  %s2332_s6 = inlined_call_operand.hbm [shape: f32[2,1,128], index: 6, kind: input, shape index: {}]   ;;  %s2333_s7 = inlined_call_operand.hbm [shape: bf16[16,32], index: 7, kind: input, shape index: {}]   ;;  %s2334_s8 = inlined_call_operand.vmem [shape: bf16[128,4], index: 8, kind: input, shape index: {}]   ;;  %s2335_s9 = inlined_call_operand.vmem [shape: f32[4,32], index: 9, kind: input, shape index: {}]   ;;  %s2336_s10 = inlined_call_operand.hbm [shape: f32[4,4,32], index: 10, kind: output, shape index: {}]  }
   0x1   :  { %16 = vsyncpa [#allocation6], 0 }
   0x2   :  { %17 = vsyncpa [#allocation9], 0 }
   0x3   :  { %18 = vsyncpa [#allocation12], 0  ;;  %s41_s15 = sshll.u32 %s2329_s3, 4  ;;  %s42_s15 = int_to_ptr.hbm [resolvable:$true] %s41_s15 }
   0x4   :  { %19 = vsyncpa [#allocation4], 0  ;;  %s1871_s16 = smov [#allocation5]   ;;  %s67_s20 = sshll.u32 %s2331_s5, 4  ;;  %s68_s20 = int_to_ptr.hbm [resolvable:$true] %s67_s20 }
   0x5   :  { %s43_s17 = sshll.u32 %s1871_s16, 4  ;;  %s1872_s21 = smov 64   ;;  %s44_s17 = int_to_ptr.vmem [resolvable:$true] %s43_s17 }
   0x6   :  { %s1873_s22 = smov 4   ;;  %s1874_s23 = smov [#allocation8]  }
   0x7   :  { %49 = dma.hbm_to_vmem [thread:$0]  %s42_s15, 2048, %s44_s17, [#allocation6], %s1872_s21, %s1872_s21, %s1873_s22  }
   0x8   :  { %s69_s24 = sshll.u32 %s1874_s23, 4  ;;  %s28_s26 = sshll.u32 %s2328_s2, 4  ;;  %s70_s24 = int_to_ptr.vmem [resolvable:$true] %s69_s24  ;;  %s29_s26 = int_to_ptr.hbm [resolvable:$true] %s28_s26 }
   0x9   :  { %75 = dma.hbm_to_vmem [thread:$0]  %s68_s20, 2048, %s70_s24, [#allocation9], %s1872_s21, %s1872_s21, %s1873_s22  }
   0xa   :  { %s1875_s5 = smov [#allocation2]   ;;  %s54_s30 = sshll.u32 %s2330_s4, 4  ;;  %s55_s30 = int_to_ptr.hbm [resolvable:$true] %s54_s30 }
   0xb   :  { %s30_s27 = sshll.u32 %s1875_s5, 4  ;;  %s1876_s11 = smov 16   ;;  %s31_s27 = int_to_ptr.vmem [resolvable:$true] %s30_s27 }
   0xc   :  { %s1877_s12 = smov 1   ;;  %s1878_s13 = smov [#allocation7]  }
   0xd   :  { %36 = dma.hbm_to_vmem [thread:$0]  %s29_s26, 32, %s31_s27, [#allocation3], %s1876_s11, %s1876_s11, %s1877_s12  }
   0xe   :  { %s56_s14 = sshll.u32 %s1878_s13, 4  ;;  %s80_s16 = sshll.u32 %s2332_s6, 4  ;;  %s57_s14 = int_to_ptr.vmem [resolvable:$true] %s56_s14  ;;  %s81_s16 = int_to_ptr.hbm [resolvable:$true] %s80_s16 }
   0xf   :  { %62 = dma.hbm_to_vmem [thread:$0]  %s55_s30, 32, %s57_s14, [#allocation6], %s1876_s11, %s1876_s11, %s1877_s12  }
  0x10   :  { %s93_s19 = sshll.u32 %s2333_s7, 4  ;;  %s1879_s20 = smov [#allocation10]   ;;  %s94_s19 = int_to_ptr.hbm [resolvable:$true] %s93_s19 }
  0x11   :  { %s82_s23 = sshll.u32 %s1879_s20, 4  ;;  %s1880_s4 = smov [#allocation11]   ;;  %s83_s23 = int_to_ptr.vmem [resolvable:$true] %s82_s23 }
  0x12   :  { %88 = dma.hbm_to_vmem [thread:$0]  %s81_s16, 32, %s83_s23, [#allocation9], %s1876_s11, %s1876_s11, %s1877_s12  }
  0x13   :  { %s95_s24 = sshll.u32 %s1880_s4, 4  ;;  %s96_s24 = int_to_ptr.vmem [resolvable:$true] %s95_s24 }
  0x14   :  { %101 = dma.hbm_to_vmem [thread:$0]  %s94_s19, 128, %s96_s24, [#allocation12], %s1872_s21, %s1872_s21, %s1873_s22  }
  0x15   :  { %1861 = dma.done.wait [#allocation3], 32  }
  0x16   :  { %1862 = vsyncadd [#allocation3], 4294967264 }
  0x17   :  { %1863 = dma.done.wait [#allocation6], 2080  }
  0x18   :  { %1864 = vsyncadd [#allocation6], 4294965216 }
  0x19   :  { %1865 = dma.done.wait [#allocation9], 2080  }
  0x1a   :  { %1866 = vsyncadd [#allocation9], 4294965216 }
  0x1b   :  { %1867 = dma.done.wait [#allocation12], 128  }
  0x1c   :  { %1868 = vsyncadd [#allocation12], 4294967168  ;;  %v1968_v0 = vld [vmem:[%s2326_s0 + $0x10] sm:$0xff]  ;;  %v1973_v1 = vld [vmem:[%s2326_s0] sm:$0xff]  ;;  %s1881_s12 = smov 1e-24  }
  0x1d   :  { %143 = vadd.xlane.f32.xlu2 %v1968_v0  ;;  %139 = vadd.xlane.f32.xlu0 %v1973_v1  ;;  %v1980_v2 = vld [vmem:[%s2326_s0 + $0x8] sm:$0xff]  ;;  %v1985_v3 = vld [vmem:[%s2326_s0 + $0x18] sm:$0xff]  ;;  %v1992_v4 = vld [vmem:[%s2326_s0 + $0x20] sm:$0xff]  ;;  %s1882_s20 = smov [#allocation13]   ;;  %s1382_s6 = sshll.u32 %s2336_s10, 4  ;;  %s1383_s6 = int_to_ptr.hbm [resolvable:$true] %s1382_s6 }
  0x1e   :  { %v2011_v18 = vld [vmem:[%s2326_s0 + $0x28] sm:$0xff]  ;;  %v2026_v24 = vld [vmem:[%s2326_s0 + $0x30] sm:$0xff]  ;;  %v2038_v27 = vld [vmem:[%s2326_s0 + $0x38] sm:$0xff]  ;;  %s1380_s23 = sshll.u32 %s1882_s20, 4  ;;  %s1381_s23 = int_to_ptr.vmem [resolvable:$true] %s1380_s23 }
  0x1f   :  { %v1574_v28 = vld [vmem:[#allocation5 + $0x38] sm:$0xff]  ;;  %v1573_v29 = vld [vmem:[#allocation5 + $0x30] sm:$0xff]  ;;  %v1572_v30 = vld [vmem:[#allocation5 + $0x28] sm:$0xff] }
  0x20   :  { %419 = vmatpush.bf16.msra.mxu0 %v1574_v28  ;;  %1608 = vmatpush.bf16.msra.mxu2 %v1574_v28  ;;  %v1571_v31 = vld [vmem:[#allocation5 + $0x20] sm:$0xff]  ;;  %v1570_v32 = vld [vmem:[#allocation5 + $0x18] sm:$0xff]  ;;  %v1569_v35 = vld [vmem:[#allocation5 + $0x10] sm:$0xff] }
  0x21   :  { %v1568_v42 = vld [vmem:[#allocation5 + $0x8] sm:$0xff]  ;;  %v1567_v48 = vld [vmem:[#allocation5] sm:$0xff] }
  0x24   :  { %420 = vmatpush.bf16.msra.mxu0 %v1573_v29  ;;  %1609 = vmatpush.bf16.msra.mxu2 %v1573_v29 }
  0x25   :  { %141 = vadd.xlane.f32.xlu0 %v1980_v2  ;;  %145 = vadd.xlane.f32.xlu2 %v1985_v3 }
  0x28   :  { %421 = vmatpush.bf16.msra.mxu0 %v1572_v30  ;;  %1610 = vmatpush.bf16.msra.mxu2 %v1572_v30 }
  0x2c   :  { %422 = vmatpush.bf16.msra.mxu0 %v1571_v31  ;;  %1611 = vmatpush.bf16.msra.mxu2 %v1571_v31 }
  0x2d   :  { %147 = vadd.xlane.f32.xlu2 %v1992_v4 }
  0x30   :  { %423 = vmatpush.bf16.msra.mxu0 %v1570_v32  ;;  %1612 = vmatpush.bf16.msra.mxu2 %v1570_v32 }
  0x34   :  { %424 = vmatpush.bf16.msra.mxu0 %v1569_v35  ;;  %1613 = vmatpush.bf16.msra.mxu2 %v1569_v35 }
  0x38   :  { %425 = vmatpush.bf16.msra.mxu0 %v1568_v42  ;;  %1614 = vmatpush.bf16.msra.mxu2 %v1568_v42 }
  0x3c   :  { %426 = vmatpush.bf16.msra.mxu0 %v1567_v48  ;;  %1615 = vmatpush.bf16.msra.mxu2 %v1567_v48 }
  0x90   :  { %v144_v5 = vpop.xlane.xlu2 %143  ;;  %v140_v6 = vpop.xlane.xlu0 %139 }
  0x91   :  { %v157_v7 = vmul.f32 0.015625, %v144_v5  ;;  %v155_v8 = vmul.f32 0.015625, %v140_v6 }
  0x93   :  { %v1996_v9 = vsub.f32 %v1968_v0, %v157_v7  ;;  %v1999_v10 = vsub.f32 %v1973_v1, %v155_v8  ;;  %v197_v33 = vmul.f32 %v157_v7, %v157_v7  ;;  %v195_v34 = vmul.f32 %v155_v8, %v155_v8 }
  0x95   :  { %v173_v11 = vmul.f32 %v1996_v9, %v1996_v9  ;;  %v171_v12 = vmul.f32 %v1999_v10, %v1999_v10  ;;  %v203_v36 = vmul.f32 64.0, %v195_v34  ;;  %v205_v37 = vmul.f32 64.0, %v197_v33 }
  0x97   :  { %183 = vadd.xlane.f32.xlu0 %v173_v11  ;;  %179 = vadd.xlane.f32.xlu1 %v171_v12 }
  0x98   :  { %v142_v13 = vpop.xlane.xlu0 %141  ;;  %v146_v14 = vpop.xlane.xlu2 %145 }
  0x99   :  { %v156_v15 = vmul.f32 0.015625, %v142_v13  ;;  %v158_v17 = vmul.f32 0.015625, %v146_v14 }
  0x9b   :  { %v2006_v16 = vsub.f32 %v1980_v2, %v156_v15  ;;  %v2017_v20 = vsub.f32 %v1985_v3, %v158_v17  ;;  %v196_v43 = vmul.f32 %v156_v15, %v156_v15  ;;  %v198_v54 = vmul.f32 %v158_v17, %v158_v17 }
  0x9d   :  { %v172_v19 = vmul.f32 %v2006_v16, %v2006_v16  ;;  %v174_v22 = vmul.f32 %v2017_v20, %v2017_v20  ;;  %v204_v49 = vmul.f32 64.0, %v196_v43  ;;  %v206_v63 = vmul.f32 64.0, %v198_v54 }
  0x9f   :  { %149 = vadd.xlane.f32.xlu0 %v2011_v18  ;;  %181 = vadd.xlane.f32.xlu1 %v172_v19 }
  0xa0   :  { %v148_v21 = vpop.xlane.xlu2 %147 }
  0xa1   :  { %v2021_v23 = vmul.f32 0.015625, %v148_v21 }
  0xa3   :  { %v2031_v25 = vsub.f32 %v1992_v4, %v2021_v23  ;;  %v199_v8 = vmul.f32 %v2021_v23, %v2021_v23 }
  0xa5   :  { %v175_v26 = vmul.f32 %v2031_v25, %v2031_v25  ;;  %v207_v28 = vmul.f32 64.0, %v199_v8 }
  0xa7   :  { %151 = vadd.xlane.f32.xlu0 %v2026_v24  ;;  %185 = vadd.xlane.f32.xlu1 %v174_v22 }
  0xaf   :  { %187 = vadd.xlane.f32.xlu1 %v175_v26 }
  0xb7   :  { %153 = vadd.xlane.f32.xlu1 %v2038_v27 }
 0x10a   :  { %v180_v38 = vpop.xlane.xlu1 %179  ;;  %v184_v39 = vpop.xlane.xlu0 %183 }
 0x10b   :  { %v211_v40 = vsub.f32 %v180_v38, %v203_v36  ;;  %v213_v41 = vsub.f32 %v184_v39, %v205_v37 }
 0x10d   :  { %v219_v44 = vmul.f32 0.015625, %v211_v40  ;;  %v221_v45 = vmul.f32 0.015625, %v213_v41  ;;  %v2072_v40 = vld [vmem:[%s2327_s1] ss:$0 sm:$0xff] }
 0x10f   :  { %v227_v46 = vadd.f32 1e-05, %v219_v44  ;;  %v2041_v47 = vadd.f32 1e-05, %v221_v45 }
 0x111   :  { %1653 = vrsqrt.f32 %v227_v46  ;;  %vm241_vm1 = vweird.f32 %v227_v46  ;;  %vm261_vm7 = vweird.f32 %v2041_v47 }
 0x112   :  { %1655 = vrsqrt.f32 %v2041_v47  ;;  %v182_v50 = vpop.xlane.xlu1 %181  ;;  %v150_v51 = vpop.xlane.xlu0 %149 }
 0x113   :  { %v212_v52 = vsub.f32 %v182_v50, %v204_v49  ;;  %v2044_v53 = vmul.f32 0.015625, %v150_v51  ;;  %v2080_v50 = vld [vmem:[#allocation2] ss:$0 sm:$0xff] }
 0x115   :  { %v220_v55 = vmul.f32 0.015625, %v212_v52  ;;  %v2048_v56 = vsub.f32 %v2011_v18, %v2044_v53 }
 0x117   :  { %v1654_v57 = vpop.eup %1653  ;;  %v228_v58 = vadd.f32 1e-05, %v220_v55  ;;  %v176_v59 = vmul.f32 %v2048_v56, %v2048_v56 }
 0x118   :  { %v2052_v60 = vpop.eup %1655  ;;  %v236_v61 = vmul.f32 %v1654_v57, %v227_v46  ;;  %vm242_vm0 = vweird.f32 %v1654_v57 }
 0x119   :  { %v256_v62 = vmul.f32 %v2052_v60, %v2041_v47  ;;  %1657 = vrsqrt.f32 %v228_v58  ;;  %189 = vadd.xlane.f32.xlu2 %v176_v59  ;;  %vm243_vm2 = vmor %vm241_vm1, %vm242_vm0  ;;  %vm262_vm4 = vweird.f32 %v2052_v60  ;;  %vm251_vm5 = vweird.f32 %v228_v58 }
 0x11a   :  { %v237_v5 = vmul.f32 %v1654_v57, %v236_v61  ;;  %v186_v6 = vpop.xlane.xlu1 %185  ;;  %v152_v7 = vpop.xlane.xlu0 %151  ;;  %vm263_vm8 = vmor %vm261_vm7, %vm262_vm4 }
 0x11b   :  { %v214_v11 = vsub.f32 %v186_v6, %v206_v63  ;;  %v2058_v12 = vmul.f32 0.015625, %v152_v7  ;;  %v257_v14 = vmul.f32 %v2052_v60, %v256_v62 }
 0x11c   :  { %v238_v13 = vmul.f32 0.5, %v237_v5 }
 0x11d   :  { %v222_v15 = vmul.f32 0.015625, %v214_v11  ;;  %v2063_v17 = vsub.f32 %v2026_v24, %v2058_v12  ;;  %v258_v23 = vmul.f32 0.5, %v257_v14  ;;  %v1582_v14 = vld [vmem:[#allocation8 + $0x38] sm:$0xff] }
 0x11e   :  { %v239_v19 = vsub.f32 1.5, %v238_v13  ;;  %528 = vmatpush.bf16.msra.mxu1 %v1582_v14 }
 0x11f   :  { %v1658_v21 = vpop.eup %1657  ;;  %v230_v22 = vadd.f32 1e-05, %v222_v15  ;;  %v177_v26 = vmul.f32 %v2063_v17, %v2063_v17  ;;  %v259_v34 = vsub.f32 1.5, %v258_v23  ;;  %v1581_v15 = vld [vmem:[#allocation8 + $0x30] sm:$0xff]  ;;  %v201_v23 = vmul.f32 %v2058_v12, %v2058_v12 }
 0x120   :  { %v240_v29 = vmul.f32 %v1654_v57, %v239_v19  ;;  %v246_v30 = vmul.f32 %v1658_v21, %v228_v58  ;;  %vm252_vm3 = vweird.f32 %v1658_v21 }
 0x121   :  { %1659 = vrsqrt.f32 %v230_v22  ;;  %191 = vadd.xlane.f32.xlu2 %v177_v26  ;;  %v260_v41 = vmul.f32 %v2052_v60, %v259_v34  ;;  %vm253_vm6 = vmor %vm251_vm5, %vm252_vm3  ;;  %vm271_vm10 = vweird.f32 %v230_v22 }
 0x122   :  { %v247_v31 = vmul.f32 %v1658_v21, %v246_v30  ;;  %v188_v32 = vpop.xlane.xlu1 %187  ;;  %v244_v36 = vsel %vm243_vm2, %v1654_v57, %v240_v29  ;;  %529 = vmatpush.bf16.msra.mxu1 %v1581_v15 }
 0x123   :  { %v215_v33 = vsub.f32 %v188_v32, %v207_v28  ;;  %v315_v39 = vmul.f32 %v244_v36, %v1999_v10  ;;  %v264_v52 = vsel %vm263_vm8, %v2052_v60, %v260_v41  ;;  %v1579_v28 = vld [vmem:[#allocation8 + $0x20] sm:$0xff] }
 0x124   :  { %v248_v35 = vmul.f32 0.5, %v247_v31  ;;  %v317_v59 = vmul.f32 %v264_v52, %v1996_v9 }
 0x125   :  { %v327_v49 = vmul.f32 %v2072_v40, %v315_v39  ;;  %v223_v9 = vmul.f32 0.015625, %v215_v33  ;;  %v1578_v33 = vld [vmem:[#allocation8 + $0x18] sm:$0xff] }
 0x126   :  { %v249_v37 = vsub.f32 1.5, %v248_v35  ;;  %v329_v5 = vmul.f32 %v2072_v40, %v317_v59  ;;  %v209_v35 = vmul.f32 64.0, %v201_v23 }
 0x127   :  { %v1660_v38 = vpop.eup %1659  ;;  %v231_v13 = vadd.f32 1e-05, %v223_v9 }
 0x128   :  { %v250_v42 = vmul.f32 %v1658_v21, %v249_v37  ;;  %v266_v43 = vmul.f32 %v1660_v38, %v230_v22  ;;  %vm272_vm9 = vweird.f32 %v1660_v38  ;;  %v341_v7 = vadd.f32 %v2080_v50, %v329_v5 }
 0x129   :  { %vm273_vm11 = vmor %vm271_vm10, %vm272_vm9  ;;  %1661 = vrsqrt.f32 %v231_v13  ;;  %vm281_vm13 = vweird.f32 %v231_v13 }
 0x12a   :  { %v267_v44 = vmul.f32 %v1660_v38, %v266_v43  ;;  %v154_v45 = vpop.xlane.xlu1 %153  ;;  %v254_v46 = vsel %vm253_vm6, %v1658_v21, %v250_v42  ;;  %v1580_v21 = vld [vmem:[#allocation8 + $0x28] sm:$0xff] }
 0x12b   :  { %v2076_v48 = vmul.f32 0.015625, %v154_v45  ;;  %v316_v10 = vmul.f32 %v254_v46, %v2006_v16  ;;  %v339_v16 = vadd.f32 %v2080_v50, %v327_v49  ;;  %530 = vmatpush.bf16.msra.mxu1 %v1580_v21  ;;  %v1576_v42 = vld [vmem:[#allocation8 + $0x8] sm:$0xff]  ;;  %v1575_v46 = vld [vmem:[#allocation8] sm:$0xff]  ;;  %v1647_v21 = vld [vmem:[#allocation7] ss:$0 sm:$0xff] }
 0x12c   :  { %v268_v51 = vmul.f32 0.5, %v267_v44 }
 0x12d   :  { %v2085_v54 = vsub.f32 %v2038_v27, %v2076_v48  ;;  %v328_v47 = vmul.f32 %v2072_v40, %v316_v10  ;;  %v202_v49 = vmul.f32 %v2076_v48, %v2076_v48 }
 0x12e   :  { %v269_v55 = vsub.f32 1.5, %v268_v51 }
 0x12f   :  { %v178_v57 = vmul.f32 %v2085_v54, %v2085_v54  ;;  %v340_v58 = vadd.f32 %v2080_v50, %v328_v47  ;;  %v1662_v19 = vpop.eup %1661  ;;  %531 = vmatpush.bf16.msra.mxu1 %v1579_v28 }
 0x130   :  { %v270_v61 = vmul.f32 %v1660_v38, %v269_v55  ;;  %v276_v22 = vmul.f32 %v1662_v19, %v231_v13  ;;  %vm282_vm12 = vweird.f32 %v1662_v19 }
 0x131   :  { %193 = vadd.xlane.f32.xlu0 %v178_v57  ;;  %v347_v60 = vpack.c.bf16 %v340_v58, %v339_v16  ;;  %vm283_vm14 = vmor %vm281_vm13, %vm282_vm12  ;;  %v210_v57 = vmul.f32 64.0, %v202_v49 }
 0x132   :  { %v274_v62 = vsel %vm273_vm11, %v1660_v38, %v270_v61  ;;  %v277_v31 = vmul.f32 %v1662_v19, %v276_v22 }
 0x133   :  { %427 = vmatmul.bf16.vlgmr.msra.gmra.mxu0 %v347_v60  ;;  %v318_v63 = vmul.f32 %v274_v62, %v2017_v20  ;;  %v200_v20 = vmul.f32 %v2044_v53, %v2044_v53  ;;  %532 = vmatpush.bf16.msra.mxu1 %v1578_v33  ;;  %v1577_v53 = vld [vmem:[#allocation8 + $0x10] sm:$0xff] }
 0x134   :  { %v278_v36 = vmul.f32 0.5, %v277_v31 }
 0x135   :  { %v330_v6 = vmul.f32 %v2072_v40, %v318_v63  ;;  %v208_v26 = vmul.f32 64.0, %v200_v20 }
 0x136   :  { %v279_v39 = vsub.f32 1.5, %v278_v36 }
 0x137   :  { %v342_v8 = vadd.f32 %v2080_v50, %v330_v6  ;;  %533 = vmatpush.bf16.msra.mxu1 %v1577_v53 }
 0x138   :  { %v280_v12 = vmul.f32 %v1662_v19, %v279_v39 }
 0x139   :  { %v348_v11 = vpack.c.bf16 %v342_v8, %v341_v7 }
 0x13a   :  { %v284_v52 = vsel %vm283_vm14, %v1662_v19, %v280_v12 }
 0x13b   :  { %534 = vmatpush.bf16.msra.mxu1 %v1576_v42  ;;  %v319_v16 = vmul.f32 %v284_v52, %v2031_v25 }
 0x13d   :  { %v331_v48 = vmul.f32 %v2072_v40, %v319_v16 }
 0x13f   :  { %535 = vmatpush.bf16.msra.mxu1 %v1575_v46 }
 0x143   :  { %432 = vmatmul.bf16.gmra.mxu0 %v348_v11  ;;  %v343_v11 = vadd.f32 %v2080_v50, %v331_v48 }
 0x18c   :  { %v190_v29 = vpop.xlane.xlu2 %189 }
 0x18d   :  { %v216_v30 = vsub.f32 %v190_v29, %v208_v26 }
 0x18f   :  { %v224_v32 = vmul.f32 0.015625, %v216_v30 }
 0x191   :  { %v232_v34 = vadd.f32 1e-05, %v224_v32 }
 0x193   :  { %1663 = vrsqrt.f32 %v232_v34  ;;  %vm291_vm0 = vweird.f32 %v232_v34 }
 0x194   :  { %v192_v37 = vpop.xlane.xlu2 %191 }
 0x195   :  { %v217_v38 = vsub.f32 %v192_v37, %v209_v35 }
 0x197   :  { %v225_v41 = vmul.f32 0.015625, %v217_v38 }
 0x199   :  { %v1664_v43 = vpop.eup %1663  ;;  %v233_v44 = vadd.f32 1e-05, %v225_v41 }
 0x19a   :  { %v286_v45 = vmul.f32 %v1664_v43, %v232_v34  ;;  %vm292_vm15 = vweird.f32 %v1664_v43 }
 0x19b   :  { %1665 = vrsqrt.f32 %v233_v44  ;;  %vm293_vm1 = vmor %vm291_vm0, %vm292_vm15  ;;  %vm301_vm2 = vweird.f32 %v233_v44 }
 0x19c   :  { %v287_v10 = vmul.f32 %v1664_v43, %v286_v45 }
 0x19e   :  { %v288_v51 = vmul.f32 0.5, %v287_v10 }
 0x1a0   :  { %v289_v47 = vsub.f32 1.5, %v288_v51 }
 0x1a1   :  { %v1666_v55 = vpop.eup %1665 }
 0x1a2   :  { %v290_v58 = vmul.f32 %v1664_v43, %v289_v47  ;;  %v296_v59 = vmul.f32 %v1666_v55, %v233_v44  ;;  %vm302_vm3 = vweird.f32 %v1666_v55 }
 0x1a3   :  { %vm303_vm4 = vmor %vm301_vm2, %vm302_vm3 }
 0x1a4   :  { %v194_v61 = vpop.xlane.xlu0 %193  ;;  %v294_v60 = vsel %vm293_vm1, %v1664_v43, %v290_v58  ;;  %v297_v5 = vmul.f32 %v1666_v55, %v296_v59 }
 0x1a5   :  { %v218_v62 = vsub.f32 %v194_v61, %v210_v57  ;;  %v320_v63 = vmul.f32 %v294_v60, %v2048_v56 }
 0x1a6   :  { %v298_v9 = vmul.f32 0.5, %v297_v5 }
 0x1a7   :  { %v226_v6 = vmul.f32 0.015625, %v218_v62  ;;  %v332_v7 = vmul.f32 %v2072_v40, %v320_v63 }
 0x1a8   :  { %v299_v14 = vsub.f32 1.5, %v298_v9 }
 0x1a9   :  { %v234_v8 = vadd.f32 1e-05, %v226_v6  ;;  %v344_v25 = vadd.f32 %v2080_v50, %v332_v7 }
 0x1aa   :  { %v300_v19 = vmul.f32 %v1666_v55, %v299_v14 }
 0x1ab   :  { %1667 = vrsqrt.f32 %v234_v8  ;;  %v349_v13 = vpack.c.bf16 %v344_v25, %v343_v11  ;;  %vm311_vm6 = vweird.f32 %v234_v8 }
 0x1ac   :  { %v304_v28 = vsel %vm303_vm4, %v1666_v55, %v300_v19  ;;  %v2116_v55 = vld [vmem:[#allocation10] ss:$0 sm:$0xff] }
 0x1ad   :  { %437 = vmatmul.bf16.vlgmr.msra.gmra.mxu2 %v349_v13  ;;  %v321_v32 = vmul.f32 %v304_v28, %v2063_v17 }
 0x1af   :  { %v333_v38 = vmul.f32 %v2072_v40, %v321_v32 }
 0x1b0   :  { %v428_v15 = vpop.f32.mrf.mxu0 }
 0x1b1   :  { %v1668_v56 = vpop.eup %1667  ;;  %v429_v29 = vadd.f32 %v1647_v21, %v428_v15  ;;  %v345_v42 = vadd.f32 %v2080_v50, %v333_v38  ;;  %v1589_v38 = vld [vmem:[#allocation5 + $0x70] sm:$0xff] }
 0x1b2   :  { %v306_v20 = vmul.f32 %v1668_v56, %v234_v8  ;;  %vm312_vm5 = vweird.f32 %v1668_v56 }
 0x1b3   :  { %vm313_vm7 = vmor %vm311_vm6, %vm312_vm5  ;;  %v448_v34 = vmax.f32 %v429_v29, 0.0 }
 0x1b4   :  { %v307_v22 = vmul.f32 %v1668_v56, %v306_v20 }
 0x1b6   :  { %v308_v26 = vmul.f32 0.5, %v307_v22 }
 0x1b8   :  { %v309_v23 = vsub.f32 1.5, %v308_v26  ;;  %v430_v30 = vpop.f32.mrf.mxu0 }
 0x1b9   :  { %v431_v31 = vadd.f32 %v1647_v21, %v430_v30 }
 0x1ba   :  { %v310_v33 = vmul.f32 %v1668_v56, %v309_v23 }
 0x1bb   :  { %v449_v35 = vmax.f32 %v431_v31, 0.0 }
 0x1bc   :  { %v314_v36 = vsel %vm313_vm7, %v1668_v56, %v310_v33 }
 0x1bd   :  { %v456_v53 = vpack.c.bf16 %v449_v35, %v448_v34  ;;  %v322_v37 = vmul.f32 %v314_v36, %v2085_v54 }
 0x1bf   :  { %536 = vmatmul.bf16.vlgmr.msra.gmra.mxu1 %v456_v53  ;;  %v334_v39 = vmul.f32 %v2072_v40, %v322_v37  ;;  %v1590_v37 = vld [vmem:[#allocation5 + $0x78] sm:$0xff] }
 0x1c0   :  { %v433_v41 = vpop.f32.mrf.mxu0  ;;  %849 = vmatpush.bf16.msrb.mxu2 %v1590_v37 }
 0x1c1   :  { %v346_v43 = vadd.f32 %v2080_v50, %v334_v39  ;;  %v434_v44 = vadd.f32 %v1647_v21, %v433_v41  ;;  %v1588_v39 = vld [vmem:[#allocation5 + $0x68] sm:$0xff]  ;;  %v1587_v41 = vld [vmem:[#allocation5 + $0x60] sm:$0xff] }
 0x1c3   :  { %v350_v17 = vpack.c.bf16 %v346_v43, %v345_v42  ;;  %v450_v46 = vmax.f32 %v434_v44, 0.0  ;;  %v1585_v43 = vld [vmem:[#allocation5 + $0x50] sm:$0xff] }
 0x1c4   :  { %850 = vmatpush.bf16.msrb.mxu2 %v1589_v38 }
 0x1c5   :  { %442 = vmatmul.bf16.gmra.mxu2 %v350_v17 }
 0x1c8   :  { %v435_v12 = vpop.f32.mrf.mxu0  ;;  %851 = vmatpush.bf16.msrb.mxu2 %v1588_v39 }
 0x1c9   :  { %v436_v45 = vadd.f32 %v1647_v21, %v435_v12 }
 0x1cb   :  { %v451_v10 = vmax.f32 %v436_v45, 0.0 }
 0x1cc   :  { %852 = vmatpush.bf16.msrb.mxu2 %v1587_v41 }
 0x1cd   :  { %v457_v49 = vpack.c.bf16 %v451_v10, %v450_v46 }
 0x1cf   :  { %541 = vmatmul.bf16.gmra.mxu1 %v457_v49  ;;  %v1583_v49 = vld [vmem:[#allocation5 + $0x40] sm:$0xff] }
 0x230   :  { %v438_v54 = vpop.f32.mrf.mxu2 }
 0x231   :  { %v439_v51 = vadd.f32 %v1647_v21, %v438_v54 }
 0x233   :  { %v452_v40 = vmax.f32 %v439_v51, 0.0 }
 0x238   :  { %v440_v52 = vpop.f32.mrf.mxu2 }
 0x239   :  { %v441_v47 = vadd.f32 %v1647_v21, %v440_v52 }
 0x23b   :  { %v453_v57 = vmax.f32 %v441_v47, 0.0 }
 0x23c   :  { %v537_v16 = vpop.f32.mrf.mxu1 }
 0x23d   :  { %v538_v50 = vadd.f32 %v2116_v55, %v537_v16  ;;  %v458_v58 = vpack.c.bf16 %v453_v57, %v452_v40 }
 0x23f   :  { %v2120_v59 = vadd.f32 %v538_v50, %v1973_v1  ;;  %546 = vmatmul.bf16.gmra.mxu1 %v458_v58 }
 0x241   :  { %565 = vadd.xlane.f32.xlu1 %v2120_v59 }
 0x244   :  { %v539_v61 = vpop.f32.mrf.mxu1 }
 0x245   :  { %v540_v60 = vadd.f32 %v2116_v55, %v539_v61 }
 0x247   :  { %v2125_v62 = vadd.f32 %v540_v60, %v1980_v2 }
 0x248   :  { %v443_v63 = vpop.f32.mrf.mxu2 }
 0x249   :  { %567 = vadd.xlane.f32.xlu2 %v2125_v62  ;;  %v444_v6 = vadd.f32 %v1647_v21, %v443_v63 }
 0x24b   :  { %v454_v11 = vmax.f32 %v444_v6, 0.0 }
 0x24c   :  { %v542_v48 = vpop.f32.mrf.mxu1 }
 0x24d   :  { %v543_v5 = vadd.f32 %v2116_v55, %v542_v48 }
 0x24f   :  { %v2130_v7 = vadd.f32 %v543_v5, %v1968_v0 }
 0x250   :  { %v445_v1 = vpop.f32.mrf.mxu2 }
 0x251   :  { %v446_v8 = vadd.f32 %v1647_v21, %v445_v1  ;;  %569 = vadd.xlane.f32.xlu2 %v2130_v7 }
 0x253   :  { %v455_v25 = vmax.f32 %v446_v8, 0.0 }
 0x254   :  { %v544_v15 = vpop.f32.mrf.mxu1 }
 0x255   :  { %v459_v9 = vpack.c.bf16 %v455_v25, %v454_v11  ;;  %v545_v19 = vadd.f32 %v2116_v55, %v544_v15 }
 0x257   :  { %551 = vmatmul.bf16.gmra.mxu1 %v459_v9  ;;  %v2143_v26 = vadd.f32 %v545_v19, %v1985_v3 }
 0x2b4   :  { %v566_v2 = vpop.xlane.xlu1 %565 }
 0x2b5   :  { %v581_v13 = vmul.f32 0.015625, %v566_v2 }
 0x2b7   :  { %v2134_v14 = vsub.f32 %v2120_v59, %v581_v13  ;;  %v621_v42 = vmul.f32 %v581_v13, %v581_v13 }
 0x2b9   :  { %v597_v56 = vmul.f32 %v2134_v14, %v2134_v14  ;;  %v629_v17 = vmul.f32 64.0, %v621_v42 }
 0x2bb   :  { %605 = vadd.xlane.f32.xlu0 %v597_v56 }
 0x2bc   :  { %v568_v0 = vpop.xlane.xlu2 %567  ;;  %v547_v22 = vpop.f32.mrf.mxu1 }
 0x2bd   :  { %v582_v20 = vmul.f32 0.015625, %v568_v0  ;;  %v548_v23 = vadd.f32 %v2116_v55, %v547_v22 }
 0x2bf   :  { %v2140_v21 = vsub.f32 %v2125_v62, %v582_v20  ;;  %v2153_v32 = vadd.f32 %v548_v23, %v1992_v4  ;;  %v622_v45 = vmul.f32 %v582_v20, %v582_v20 }
 0x2c1   :  { %v598_v28 = vmul.f32 %v2140_v21, %v2140_v21  ;;  %v630_v54 = vmul.f32 64.0, %v622_v45 }
 0x2c3   :  { %571 = vadd.xlane.f32.xlu0 %v2143_v26  ;;  %607 = vadd.xlane.f32.xlu1 %v598_v28 }
 0x2c4   :  { %v570_v29 = vpop.xlane.xlu2 %569  ;;  %v549_v33 = vpop.f32.mrf.mxu1 }
 0x2c5   :  { %v583_v30 = vmul.f32 0.015625, %v570_v29  ;;  %v550_v34 = vadd.f32 %v2116_v55, %v549_v33 }
 0x2c7   :  { %v2150_v31 = vsub.f32 %v2130_v7, %v583_v30  ;;  %v2160_v35 = vadd.f32 %v550_v34, %v2011_v18  ;;  %v1586_v18 = vld [vmem:[#allocation5 + $0x58] sm:$0xff]  ;;  %v623_v57 = vmul.f32 %v583_v30, %v583_v30 }
 0x2c8   :  { %853 = vmatpush.bf16.msrb.mxu2 %v1586_v18 }
 0x2c9   :  { %v599_v3 = vmul.f32 %v2150_v31, %v2150_v31  ;;  %v631_v48 = vmul.f32 64.0, %v623_v57 }
 0x2cb   :  { %573 = vadd.xlane.f32.xlu0 %v2153_v32  ;;  %609 = vadd.xlane.f32.xlu1 %v599_v3 }
 0x2cc   :  { %854 = vmatpush.bf16.msrb.mxu2 %v1585_v43 }
 0x2d3   :  { %575 = vadd.xlane.f32.xlu1 %v2160_v35 }
 0x2d4   :  { %v552_v36 = vpop.f32.mrf.mxu1 }
 0x2d5   :  { %v553_v53 = vadd.f32 %v2116_v55, %v552_v36 }
 0x2d7   :  { %v2165_v4 = vadd.f32 %v553_v53, %v2026_v24  ;;  %v1584_v24 = vld [vmem:[#allocation5 + $0x48] sm:$0xff] }
 0x2d8   :  { %855 = vmatpush.bf16.msrb.mxu2 %v1584_v24 }
 0x2db   :  { %577 = vadd.xlane.f32.xlu1 %v2165_v4 }
 0x2dc   :  { %856 = vmatpush.bf16.msrb.mxu2 %v1583_v49  ;;  %v554_v56 = vpop.f32.mrf.mxu1 }
 0x2dd   :  { %v555_v28 = vadd.f32 %v2116_v55, %v554_v56  ;;  %v2194_v55 = vld [vmem:[%s2327_s1 + $0x1] ss:$0 sm:$0xff] }
 0x2df   :  { %v2186_v34 = vadd.f32 %v555_v28, %v2038_v27 }
 0x32e   :  { %v606_v44 = vpop.xlane.xlu0 %605 }
 0x32f   :  { %v637_v12 = vsub.f32 %v606_v44, %v629_v17 }
 0x331   :  { %v645_v46 = vmul.f32 0.015625, %v637_v12 }
 0x333   :  { %v653_v10 = vadd.f32 1e-05, %v645_v46  ;;  %v1598_v46 = vld [vmem:[#allocation8 + $0x78] sm:$0xff] }
 0x334   :  { %960 = vmatpush.bf16.msra.mxu3 %v1598_v46 }
 0x335   :  { %1669 = vrsqrt.f32 %v653_v10  ;;  %vm667_vm9 = vweird.f32 %v653_v10 }
 0x336   :  { %v608_v51 = vpop.xlane.xlu1 %607  ;;  %v572_v52 = vpop.xlane.xlu0 %571 }
 0x337   :  { %v638_v47 = vsub.f32 %v608_v51, %v630_v54  ;;  %v2168_v40 = vmul.f32 0.015625, %v572_v52  ;;  %v1597_v54 = vld [vmem:[#allocation8 + $0x70] sm:$0xff] }
 0x338   :  { %961 = vmatpush.bf16.msra.mxu3 %v1597_v54 }
 0x339   :  { %v646_v16 = vmul.f32 0.015625, %v638_v47  ;;  %v2172_v50 = vsub.f32 %v2143_v26, %v2168_v40  ;;  %v624_v49 = vmul.f32 %v2168_v40, %v2168_v40 }
 0x33b   :  { %v1670_v58 = vpop.eup %1669  ;;  %v654_v61 = vadd.f32 1e-05, %v646_v16  ;;  %v600_v60 = vmul.f32 %v2172_v50, %v2172_v50  ;;  %v632_v52 = vmul.f32 64.0, %v624_v49  ;;  %v1596_v16 = vld [vmem:[#allocation8 + $0x68] sm:$0xff] }
 0x33c   :  { %v662_v63 = vmul.f32 %v1670_v58, %v653_v10  ;;  %vm668_vm8 = vweird.f32 %v1670_v58  ;;  %962 = vmatpush.bf16.msra.mxu3 %v1596_v16 }
 0x33d   :  { %1671 = vrsqrt.f32 %v654_v61  ;;  %611 = vadd.xlane.f32.xlu2 %v600_v60  ;;  %vm669_vm10 = vmor %vm667_vm9, %vm668_vm8  ;;  %vm677_vm12 = vweird.f32 %v654_v61 }
 0x33e   :  { %v663_v5 = vmul.f32 %v1670_v58, %v662_v63  ;;  %v610_v6 = vpop.xlane.xlu1 %609  ;;  %v574_v1 = vpop.xlane.xlu0 %573 }
 0x33f   :  { %v639_v8 = vsub.f32 %v610_v6, %v631_v48  ;;  %v585_v11 = vmul.f32 0.015625, %v574_v1  ;;  %v1595_v48 = vld [vmem:[#allocation8 + $0x60] sm:$0xff] }
 0x340   :  { %v664_v25 = vmul.f32 0.5, %v663_v5  ;;  %963 = vmatpush.bf16.msra.mxu3 %v1595_v48 }
 0x341   :  { %v2177_v9 = vsub.f32 %v2153_v32, %v585_v11 }
 0x342   :  { %v665_v2 = vsub.f32 1.5, %v664_v25 }
 0x343   :  { %v1672_v13 = vpop.eup %1671  ;;  %v601_v15 = vmul.f32 %v2177_v9, %v2177_v9 }
 0x344   :  { %v666_v0 = vmul.f32 %v1670_v58, %v665_v2  ;;  %v672_v19 = vmul.f32 %v1672_v13, %v654_v61  ;;  %vm678_vm11 = vweird.f32 %v1672_v13  ;;  %v625_v61 = vmul.f32 %v585_v11, %v585_v11 }
 0x345   :  { %613 = vadd.xlane.f32.xlu2 %v601_v15  ;;  %vm679_vm13 = vmor %vm677_vm12, %vm678_vm11 }
 0x346   :  { %v673_v20 = vmul.f32 %v1672_v13, %v672_v19  ;;  %v576_v22 = vpop.xlane.xlu1 %575  ;;  %v670_v23 = vsel %vm669_vm10, %v1670_v58, %v666_v0  ;;  %v633_v6 = vmul.f32 64.0, %v625_v61  ;;  %v1593_v0 = vld [vmem:[#allocation8 + $0x50] sm:$0xff] }
 0x347   :  { %v586_v29 = vmul.f32 0.015625, %v576_v22  ;;  %v741_v53 = vmul.f32 %v670_v23, %v2134_v14  ;;  %v2201_v14 = vld [vmem:[#allocation2 + $0x1] ss:$0 sm:$0xff] }
 0x348   :  { %v674_v30 = vmul.f32 0.5, %v673_v20 }
 0x349   :  { %v2183_v3 = vsub.f32 %v2160_v35, %v586_v29  ;;  %v754_v18 = vmul.f32 %v2194_v55, %v741_v53  ;;  %v626_v2 = vmul.f32 %v586_v29, %v586_v29  ;;  %v1592_v29 = vld [vmem:[#allocation8 + $0x48] sm:$0xff] }
 0x34a   :  { %v675_v33 = vsub.f32 1.5, %v674_v30 }
 0x34b   :  { %v602_v36 = vmul.f32 %v2183_v3, %v2183_v3  ;;  %v767_v44 = vadd.f32 %v2201_v14, %v754_v18  ;;  %v634_v20 = vmul.f32 64.0, %v626_v2  ;;  %v2232_v2 = vld [vmem:[#allocation7 + $0x1] ss:$0 sm:$0xff] }
 0x34c   :  { %v676_v37 = vmul.f32 %v1672_v13, %v675_v33 }
 0x34d   :  { %615 = vadd.xlane.f32.xlu0 %v602_v36  ;;  %579 = vadd.xlane.f32.xlu2 %v2186_v34 }
 0x34e   :  { %v680_v38 = vsel %vm679_vm13, %v1672_v13, %v676_v37  ;;  %v578_v39 = vpop.xlane.xlu1 %577 }
 0x34f   :  { %v2197_v27 = vmul.f32 0.015625, %v578_v39  ;;  %v742_v41 = vmul.f32 %v680_v38, %v2140_v21  ;;  %v647_v21 = vmul.f32 0.015625, %v639_v8  ;;  %v1594_v8 = vld [vmem:[#allocation8 + $0x58] sm:$0xff] }
 0x350   :  { %964 = vmatpush.bf16.msra.mxu3 %v1594_v8 }
 0x351   :  { %v2205_v42 = vsub.f32 %v2165_v4, %v2197_v27  ;;  %v755_v43 = vmul.f32 %v2194_v55, %v742_v41  ;;  %v655_v45 = vadd.f32 1e-05, %v647_v21 }
 0x353   :  { %v603_v17 = vmul.f32 %v2205_v42, %v2205_v42  ;;  %v768_v12 = vadd.f32 %v2201_v14, %v755_v43  ;;  %1673 = vrsqrt.f32 %v655_v45  ;;  %vm687_vm15 = vweird.f32 %v655_v45 }
 0x354   :  { %965 = vmatpush.bf16.msra.mxu3 %v1593_v0 }
 0x355   :  { %617 = vadd.xlane.f32.xlu0 %v603_v17  ;;  %v775_v24 = vpack.c.bf16 %v768_v12, %v767_v44  ;;  %v1591_v44 = vld [vmem:[#allocation8 + $0x40] sm:$0xff] }
 0x357   :  { %857 = vmatmul.bf16.vlgmr.msrb.gmra.mxu2 %v775_v24 }
 0x358   :  { %966 = vmatpush.bf16.msra.mxu3 %v1592_v29 }
 0x359   :  { %v1674_v10 = vpop.eup %1673 }
 0x35a   :  { %v682_v51 = vmul.f32 %v1674_v10, %v655_v45  ;;  %vm688_vm14 = vweird.f32 %v1674_v10 }
 0x35b   :  { %vm689_vm0 = vmor %vm687_vm15, %vm688_vm14 }
 0x35c   :  { %v683_v58 = vmul.f32 %v1674_v10, %v682_v51  ;;  %967 = vmatpush.bf16.msra.mxu3 %v1591_v44 }
 0x35e   :  { %v684_v5 = vmul.f32 0.5, %v683_v58 }
 0x360   :  { %v685_v25 = vsub.f32 1.5, %v684_v5 }
 0x362   :  { %v686_v19 = vmul.f32 %v1674_v10, %v685_v25 }
 0x364   :  { %v690_v53 = vsel %vm689_vm0, %v1674_v10, %v686_v19  ;;  %vm1133_vm0 = vcmask 130048  }
 0x365   :  { %v743_v17 = vmul.f32 %v690_v53, %v2150_v31 }
 0x367   :  { %v756_v10 = vmul.f32 %v2194_v55, %v743_v17  ;;  %v1606_v17 = vld [vmem:[%s2334_s8 + $0x38] sm:$0xff] }
 0x368   :  { %1065 = vmatpush.bf16.msrb.mxu0 %v1606_v17 }
 0x369   :  { %v769_v31 = vadd.f32 %v2201_v14, %v756_v10  ;;  %v1603_v10 = vld [vmem:[%s2334_s8 + $0x20] sm:$0xff] }
 0x3b0   :  { %v612_v47 = vpop.xlane.xlu2 %611 }
 0x3b1   :  { %v640_v57 = vsub.f32 %v612_v47, %v632_v52 }
 0x3b3   :  { %v648_v60 = vmul.f32 0.015625, %v640_v57 }
 0x3b5   :  { %v656_v63 = vadd.f32 1e-05, %v648_v60 }
 0x3b7   :  { %1675 = vrsqrt.f32 %v656_v63  ;;  %vm697_vm2 = vweird.f32 %v656_v63 }
 0x3b8   :  { %v614_v1 = vpop.xlane.xlu2 %613 }
 0x3b9   :  { %v641_v40 = vsub.f32 %v614_v1, %v633_v6 }
 0x3bb   :  { %v649_v13 = vmul.f32 0.015625, %v641_v40 }
 0x3bd   :  { %v1676_v15 = vpop.eup %1675  ;;  %v657_v56 = vadd.f32 1e-05, %v649_v13 }
 0x3be   :  { %v692_v11 = vmul.f32 %v1676_v15, %v656_v63  ;;  %vm698_vm1 = vweird.f32 %v1676_v15 }
 0x3bf   :  { %1677 = vrsqrt.f32 %v657_v56  ;;  %vm699_vm3 = vmor %vm697_vm2, %vm698_vm1  ;;  %vm707_vm5 = vweird.f32 %v657_v56  ;;  %vm1151_vm1 = vcmask 257024  }
 0x3c0   :  { %v693_v22 = vmul.f32 %v1676_v15, %v692_v11  ;;  %v580_v28 = vpop.xlane.xlu2 %579  ;;  %v616_v23 = vpop.xlane.xlu0 %615 }
 0x3c1   :  { %v2214_v30 = vmul.f32 0.015625, %v580_v28  ;;  %v642_v33 = vsub.f32 %v616_v23, %v634_v20 }
 0x3c2   :  { %v694_v36 = vmul.f32 0.5, %v693_v22  ;;  %v627_v22 = vmul.f32 %v2197_v27, %v2197_v27 }
 0x3c3   :  { %v2218_v37 = vsub.f32 %v2186_v34, %v2214_v30  ;;  %v650_v38 = vmul.f32 0.015625, %v642_v33 }
 0x3c4   :  { %v695_v39 = vsub.f32 1.5, %v694_v36  ;;  %v635_v23 = vmul.f32 64.0, %v627_v22  ;;  %v1652_v22 = vld [vmem:[#allocation10 + $0x1] ss:$0 sm:$0xff] }
 0x3c5   :  { %v1678_v41 = vpop.eup %1677  ;;  %v658_v18 = vadd.f32 1e-05, %v650_v38  ;;  %v604_v43 = vmul.f32 %v2218_v37, %v2218_v37  ;;  %v628_v38 = vmul.f32 %v2214_v30, %v2214_v30  ;;  %v1604_v30 = vld [vmem:[%s2334_s8 + $0x28] sm:$0xff] }
 0x3c6   :  { %v696_v12 = vmul.f32 %v1676_v15, %v695_v39  ;;  %v702_v24 = vmul.f32 %v1678_v41, %v657_v56  ;;  %vm708_vm4 = vweird.f32 %v1678_v41 }
 0x3c7   :  { %1679 = vrsqrt.f32 %v658_v18  ;;  %619 = vadd.xlane.f32.xlu1 %v604_v43  ;;  %vm709_vm6 = vmor %vm707_vm5, %vm708_vm4  ;;  %vm717_vm8 = vweird.f32 %v658_v18 }
 0x3c8   :  { %v703_v21 = vmul.f32 %v1678_v41, %v702_v24  ;;  %v700_v45 = vsel %vm699_vm3, %v1676_v15, %v696_v12  ;;  %v618_v28 = vpop.xlane.xlu0 %617  ;;  %v1605_v24 = vld [vmem:[%s2334_s8 + $0x30] sm:$0xff] }
 0x3c9   :  { %v744_v46 = vmul.f32 %v700_v45, %v2172_v50  ;;  %v643_v33 = vsub.f32 %v618_v28, %v635_v23  ;;  %1066 = vmatpush.bf16.msrb.mxu0 %v1605_v24 }
 0x3ca   :  { %v704_v49 = vmul.f32 0.5, %v703_v21 }
 0x3cb   :  { %v757_v54 = vmul.f32 %v2194_v55, %v744_v46  ;;  %v651_v29 = vmul.f32 0.015625, %v643_v33 }
 0x3cc   :  { %v705_v51 = vsub.f32 1.5, %v704_v49 }
 0x3cd   :  { %v1680_v52 = vpop.eup %1679  ;;  %v770_v47 = vadd.f32 %v2201_v14, %v757_v54  ;;  %v659_v36 = vadd.f32 1e-05, %v651_v29  ;;  %1067 = vmatpush.bf16.msrb.mxu0 %v1604_v30 }
 0x3ce   :  { %v706_v57 = vmul.f32 %v1678_v41, %v705_v51  ;;  %v712_v16 = vmul.f32 %v1680_v52, %v658_v18  ;;  %vm718_vm7 = vweird.f32 %v1680_v52 }
 0x3cf   :  { %v776_v58 = vpack.c.bf16 %v770_v47, %v769_v31  ;;  %vm719_vm9 = vmor %vm717_vm8, %vm718_vm7  ;;  %1681 = vrsqrt.f32 %v659_v36  ;;  %vm727_vm11 = vweird.f32 %v659_v36 }
 0x3d0   :  { %v713_v61 = vmul.f32 %v1680_v52, %v712_v16  ;;  %v710_v60 = vsel %vm709_vm6, %v1678_v41, %v706_v57  ;;  %v636_v41 = vmul.f32 64.0, %v628_v38 }
 0x3d1   :  { %862 = vmatmul.bf16.gmra.mxu2 %v776_v58  ;;  %v745_v48 = vmul.f32 %v710_v60, %v2177_v9  ;;  %1068 = vmatpush.bf16.msrb.mxu0 %v1603_v10  ;;  %v1601_v58 = vld [vmem:[%s2334_s8 + $0x10] sm:$0xff] }
 0x3d2   :  { %v714_v50 = vmul.f32 0.5, %v713_v61 }
 0x3d3   :  { %v758_v40 = vmul.f32 %v2194_v55, %v745_v48  ;;  %v1600_v48 = vld [vmem:[%s2334_s8 + $0x8] sm:$0xff] }
 0x3d4   :  { %v715_v63 = vsub.f32 1.5, %v714_v50 }
 0x3d5   :  { %v771_v13 = vadd.f32 %v2201_v14, %v758_v40  ;;  %v1682_v53 = vpop.eup %1681  ;;  %v1599_v40 = vld [vmem:[%s2334_s8] sm:$0xff] }
 0x3d6   :  { %v716_v5 = vmul.f32 %v1680_v52, %v715_v63  ;;  %v722_v39 = vmul.f32 %v1682_v53, %v659_v36  ;;  %vm728_vm10 = vweird.f32 %v1682_v53 }
 0x3d7   :  { %vm729_vm12 = vmor %vm727_vm11, %vm728_vm10 }
 0x3d8   :  { %v720_v6 = vsel %vm719_vm9, %v1680_v52, %v716_v5  ;;  %v723_v44 = vmul.f32 %v1682_v53, %v722_v39  ;;  %v1602_v52 = vld [vmem:[%s2334_s8 + $0x18] sm:$0xff] }
 0x3d9   :  { %v746_v1 = vmul.f32 %v720_v6, %v2183_v3  ;;  %1069 = vmatpush.bf16.msrb.mxu0 %v1602_v52 }
 0x3da   :  { %v858_v8 = vpop.f32.mrf.mxu2  ;;  %v724_v21 = vmul.f32 0.5, %v723_v44 }
 0x3db   :  { %v759_v25 = vmul.f32 %v2194_v55, %v746_v1  ;;  %v859_v9 = vadd.f32 %v2232_v2, %v858_v8 }
 0x3dc   :  { %v725_v45 = vsub.f32 1.5, %v724_v21 }
 0x3dd   :  { %v772_v15 = vadd.f32 %v2201_v14, %v759_v25  ;;  %v878_v11 = vmax.f32 %v859_v9, 0.0  ;;  %1070 = vmatpush.bf16.msrb.mxu0 %v1601_v58 }
 0x3de   :  { %v726_v49 = vmul.f32 %v1682_v53, %v725_v45 }
 0x3df   :  { %v777_v56 = vpack.c.bf16 %v772_v15, %v771_v13 }
 0x3e0   :  { %v730_v47 = vsel %vm729_vm12, %v1682_v53, %v726_v49 }
 0x3e1   :  { %867 = vmatmul.bf16.gmra.mxu2 %v777_v56  ;;  %v747_v16 = vmul.f32 %v730_v47, %v2205_v42  ;;  %1071 = vmatpush.bf16.msrb.mxu0 %v1600_v48 }
 0x3e2   :  { %v860_v0 = vpop.f32.mrf.mxu2 }
 0x3e3   :  { %v861_v19 = vadd.f32 %v2232_v2, %v860_v0  ;;  %v760_v63 = vmul.f32 %v2194_v55, %v747_v16 }
 0x3e5   :  { %v879_v3 = vmax.f32 %v861_v19, 0.0  ;;  %v773_v6 = vadd.f32 %v2201_v14, %v760_v63  ;;  %1072 = vmatpush.bf16.msrb.mxu0 %v1599_v40 }
 0x3e7   :  { %v886_v20 = vpack.c.bf16 %v879_v3, %v878_v11 }
 0x3e9   :  { %968 = vmatmul.bf16.vlgmr.msra.gmra.mxu3 %v886_v20 }
 0x43a   :  { %v620_v18 = vpop.xlane.xlu1 %619 }
 0x43b   :  { %v644_v43 = vsub.f32 %v620_v18, %v636_v41 }
 0x43d   :  { %v652_v27 = vmul.f32 0.015625, %v644_v43 }
 0x43f   :  { %v660_v12 = vadd.f32 1e-05, %v652_v27 }
 0x441   :  { %1683 = vrsqrt.f32 %v660_v12  ;;  %vm737_vm14 = vweird.f32 %v660_v12 }
 0x447   :  { %v1684_v46 = vpop.eup %1683 }
 0x448   :  { %v732_v54 = vmul.f32 %v1684_v46, %v660_v12  ;;  %vm738_vm13 = vweird.f32 %v1684_v46 }
 0x449   :  { %vm739_vm15 = vmor %vm737_vm14, %vm738_vm13 }
 0x44a   :  { %v733_v51 = vmul.f32 %v1684_v46, %v732_v54 }
 0x44c   :  { %v734_v31 = vmul.f32 0.5, %v733_v51 }
 0x44e   :  { %v735_v57 = vsub.f32 1.5, %v734_v31 }
 0x450   :  { %v736_v61 = vmul.f32 %v1684_v46, %v735_v57 }
 0x452   :  { %v740_v50 = vsel %vm739_vm15, %v1684_v46, %v736_v61 }
 0x453   :  { %v748_v60 = vmul.f32 %v740_v50, %v2218_v37  ;;  %v1607_v50 = vld [vmem:[#allocation11] sm:$0xff] }
 0x454   :  { %v863_v5 = vpop.f32.mrf.mxu2  ;;  %1144 = vmatpush.bf16.msrb.mxu1 %v1607_v50  ;;  %1210 = vmatpush.bf16.msrb.mxu3 %v1607_v50 }
 0x455   :  { %v761_v42 = vmul.f32 %v2194_v55, %v748_v60  ;;  %v864_v37 = vadd.f32 %v2232_v2, %v863_v5 }
 0x457   :  { %v774_v1 = vadd.f32 %v2201_v14, %v761_v42  ;;  %v880_v15 = vmax.f32 %v864_v37, 0.0 }
 0x458   :  { %1276 = vmatpush.bf16.msra.mxu3 %v1607_v50  ;;  %1342 = vmatpush.bf16.msra.mxu1 %v1607_v50 }
 0x459   :  { %v778_v8 = vpack.c.bf16 %v774_v1, %v773_v6 }
 0x45b   :  { %872 = vmatmul.bf16.gmra.mxu2 %v778_v8 }
 0x45c   :  { %v865_v25 = vpop.f32.mrf.mxu2 }
 0x45d   :  { %v866_v13 = vadd.f32 %v2232_v2, %v865_v25 }
 0x45f   :  { %v881_v56 = vmax.f32 %v866_v13, 0.0 }
 0x461   :  { %v887_v55 = vpack.c.bf16 %v881_v56, %v880_v15 }
 0x463   :  { %973 = vmatmul.bf16.gmra.mxu3 %v887_v55 }
 0x464   :  { %v868_v9 = vpop.f32.mrf.mxu2 }
 0x465   :  { %v869_v0 = vadd.f32 %v2232_v2, %v868_v9 }
 0x467   :  { %v882_v3 = vmax.f32 %v869_v0, 0.0 }
 0x46c   :  { %v870_v14 = vpop.f32.mrf.mxu2  ;;  %v969_v19 = vpop.f32.mrf.mxu3 }
 0x46d   :  { %v871_v11 = vadd.f32 %v2232_v2, %v870_v14  ;;  %v970_v23 = vadd.f32 %v1652_v22, %v969_v19 }
 0x46f   :  { %v883_v20 = vmax.f32 %v871_v11, 0.0  ;;  %v989_v36 = vadd.f32 %v970_v23, %v2120_v59  ;;  %v1104_v23 = vld [vmem:[%s2335_s9] sm:$0xf] }
 0x471   :  { %v888_v28 = vpack.c.bf16 %v883_v20, %v882_v3 }
 0x473   :  { %978 = vmatmul.bf16.gmra.mxu3 %v888_v28 }
 0x474   :  { %v971_v33 = vpop.f32.mrf.mxu3 }
 0x475   :  { %v972_v29 = vadd.f32 %v1652_v22, %v971_v33 }
 0x477   :  { %v990_v53 = vadd.f32 %v972_v29, %v2125_v62 }
 0x479   :  { %v997_v38 = vpack.c.bf16 %v990_v53, %v989_v36 }
 0x47b   :  { %1073 = vmatmul.bf16.vlgmr.msrb.gmra.mxu0 %v997_v38 }
 0x4de   :  { %v873_v39 = vpop.f32.mrf.mxu2 }
 0x4df   :  { %v874_v41 = vadd.f32 %v2232_v2, %v873_v39 }
 0x4e1   :  { %v884_v44 = vmax.f32 %v874_v41, 0.0 }
 0x4e6   :  { %v875_v18 = vpop.f32.mrf.mxu2  ;;  %v974_v43 = vpop.f32.mrf.mxu3 }
 0x4e7   :  { %v876_v17 = vadd.f32 %v2232_v2, %v875_v18  ;;  %v975_v24 = vadd.f32 %v1652_v22, %v974_v43 }
 0x4e9   :  { %v885_v27 = vmax.f32 %v876_v17, 0.0  ;;  %v991_v59 = vadd.f32 %v975_v24, %v2130_v7 }
 0x4eb   :  { %v889_v12 = vpack.c.bf16 %v885_v27, %v884_v44 }
 0x4ed   :  { %983 = vmatmul.bf16.gmra.mxu3 %v889_v12 }
 0x4ee   :  { %v976_v21 = vpop.f32.mrf.mxu3 }
 0x4ef   :  { %v977_v30 = vadd.f32 %v1652_v22, %v976_v21 }
 0x4f1   :  { %v992_v62 = vadd.f32 %v977_v30, %v2143_v26 }
 0x4f3   :  { %v998_v45 = vpack.c.bf16 %v992_v62, %v991_v59 }
 0x4f5   :  { %1078 = vmatmul.bf16.gmra.mxu0 %v998_v45 }
 0x4f6   :  { %v979_v46 = vpop.f32.mrf.mxu3 }
 0x4f7   :  { %v980_v49 = vadd.f32 %v1652_v22, %v979_v46 }
 0x4f8   :  { %v1074_v10 = vpop.f32.mrf.mxu0 }
 0x4f9   :  { %v1094_v51 = vpack.c.bf16 %v1074_v10, %v1074_v10  ;;  %v993_v31 = vadd.f32 %v980_v49, %v2153_v32 }
 0x4fb   :  { %v1107_v16 = vunpack.c.l.b16 %v1094_v51 }
 0x4fe   :  { %v981_v54 = vpop.f32.mrf.mxu3 }
 0x4ff   :  { %v982_v52 = vadd.f32 %v1652_v22, %v981_v54 }
 0x500   :  { %v1076_v2 = vpop.f32.mrf.mxu0 }
 0x501   :  { %v994_v47 = vadd.f32 %v982_v52, %v2160_v35  ;;  %v1095_v57 = vpack.c.bf16 %v1076_v2, %v1076_v2 }
 0x503   :  { %v1108_v58 = vunpack.c.l.b16 %v1095_v57  ;;  %v999_v61 = vpack.c.bf16 %v994_v47, %v993_v31 }
 0x505   :  { %1083 = vmatmul.bf16.gmra.mxu0 %v999_v61  ;;  %v1109_v7 = vpack.c.b16 %v1108_v58, %v1107_v16 }
 0x507   :  { %1111 = vxpose.xlu2.c.b16.start.end [1/1] (short) (narrow) %v1109_v7, 16 }
 0x570   :  { %v984_v26 = vpop.f32.mrf.mxu3 }
 0x571   :  { %v985_v63 = vadd.f32 %v1652_v22, %v984_v26 }
 0x572   :  { %v1079_v60 = vpop.f32.mrf.mxu0 }
 0x573   :  { %v1096_v5 = vpack.c.bf16 %v1079_v60, %v1079_v60  ;;  %v995_v35 = vadd.f32 %v985_v63, %v2165_v4 }
 0x575   :  { %v1180_v40 = vunpack.c.l.b16 %v1096_v5 }
 0x578   :  { %v986_v48 = vpop.f32.mrf.mxu3 }
 0x579   :  { %v987_v32 = vadd.f32 %v1652_v22, %v986_v48 }
 0x57a   :  { %v1081_v42 = vpop.f32.mrf.mxu0 }
 0x57b   :  { %v996_v6 = vadd.f32 %v987_v32, %v2186_v34  ;;  %v1097_v1 = vpack.c.bf16 %v1081_v42, %v1081_v42 }
 0x57d   :  { %v1181_v8 = vunpack.c.l.b16 %v1097_v1  ;;  %v1000_v37 = vpack.c.bf16 %v996_v6, %v995_v35 }
 0x57f   :  { %1088 = vmatmul.bf16.gmra.mxu0 %v1000_v37  ;;  %v1182_v25 = vpack.c.b16 %v1181_v8, %v1180_v40 }
 0x581   :  { %1184 = vxpose.xlu0.c.b16.start.end [1/1] (short) (narrow) %v1182_v25, 16 }
 0x582   :  { %v1084_v13 = vpop.f32.mrf.mxu0 }
 0x583   :  { %v1098_v15 = vpack.c.bf16 %v1084_v13, %v1084_v13 }
 0x585   :  { %v1246_v9 = vunpack.c.l.b16 %v1098_v15 }
 0x58a   :  { %v1086_v56 = vpop.f32.mrf.mxu0 }
 0x58b   :  { %v1099_v55 = vpack.c.bf16 %v1086_v56, %v1086_v56 }
 0x58d   :  { %v1247_v0 = vunpack.c.l.b16 %v1099_v55 }
 0x58f   :  { %v1248_v14 = vpack.c.b16 %v1247_v0, %v1246_v9 }
 0x591   :  { %1250 = vxpose.xlu1.c.b16.start.end [1/1] (short) (narrow) %v1248_v14, 16 }
 0x5a8   :  { %v1119_v19 = vpop.trf.xlu2 }
 0x5a9   :  { %1563 = vmatmul.msk.bf16.vlgmr.msrb.gmra.mxu1 %vm1133_vm0, %v1119_v19 }
 0x5fc   :  { %v1089_v4 = vpop.f32.mrf.mxu0 }
 0x5fd   :  { %v1100_v34 = vpack.c.bf16 %v1089_v4, %v1089_v4 }
 0x5ff   :  { %v1312_v20 = vunpack.c.l.b16 %v1100_v34 }
 0x604   :  { %v1091_v11 = vpop.f32.mrf.mxu0 }
 0x605   :  { %v1101_v3 = vpack.c.bf16 %v1091_v11, %v1091_v11 }
 0x607   :  { %v1313_v22 = vunpack.c.l.b16 %v1101_v3 }
 0x609   :  { %v1314_v28 = vpack.c.b16 %v1313_v22, %v1312_v20 }
 0x60b   :  { %1316 = vxpose.xlu0.c.b16.start.end [1/1] (short) (narrow) %v1314_v28, 16 }
 0x626   :  { %v1146_v33 = vpop.f32.mrf.mxu1 }
 0x627   :  { %v1147_v29 = vadd.f32 %v1146_v33, %v1104_v23 }
 0x629   :  { %v1150_v36 = vmul.f32 %v1147_v29, %v1147_v29 }
 0x62b   :  { %v1152_v53 = vsel %vm1151_vm1, %v1150_v36, 0.0 }
 0x62c   :  { %1153 = vadd.xlane.f32.xlu2 %v1152_v53 }
 0x62d   :  { %v1192_v38 = vpop.trf.xlu0 }
 0x62e   :  { %1564 = vmatmul.msk.bf16.vlgmr.msrb.gmra.mxu3 %vm1133_vm0, %v1192_v38  ;;  %v1148_v39 = vpop.f32.mrf.mxu1 }
 0x63d   :  { %v1258_v41 = vpop.trf.xlu1 }
 0x63e   :  { %1565 = vmatmul.msk.bf16.vlgmr.msra.gmra.mxu3 %vm1133_vm0, %v1258_v41 }
 0x69f   :  { %v1154_v18 = vpop.xlane.xlu2 %1153 }
 0x6a0   :  { %v1155_v43 = vrot.slane %v1154_v18, 4 }
 0x6a2   :  { %v1156_v17 = vadd.f32 %v1155_v43, %v1154_v18 }
 0x6a4   :  { %v1157_v44 = vrot.slane %v1156_v17, 2 }
 0x6a6   :  { %v1158_v27 = vadd.f32 %v1157_v44, %v1156_v17 }
 0x6a8   :  { %v1159_v12 = vrot.slane %v1158_v27, 1 }
 0x6aa   :  { %v1160_v24 = vadd.f32 %v1159_v12, %v1158_v27 }
 0x6ac   :  { %1616 = vpush %v1160_v24 }
 0x6b1   :  { %v1212_v21 = vpop.f32.mrf.mxu3 }
 0x6b2   :  { %v2293_v30 = vadd.f32 %v1212_v21, %v1104_v23 }
 0x6b4   :  { %v1216_v59 = vmul.f32 %v2293_v30, %v2293_v30 }
 0x6b6   :  { %v1217_v62 = vsel %vm1151_vm1, %v1216_v59, 0.0 }
 0x6b7   :  { %1218 = vadd.xlane.f32.xlu0 %v1217_v62  ;;  %v1324_v45 = vpop.trf.xlu0 }
 0x6b8   :  { %1566 = vmatmul.msk.bf16.vlgmr.msra.gmra.mxu1 %vm1133_vm0, %v1324_v45 }
 0x6b9   :  { %v1214_v46 = vpop.f32.mrf.mxu3 }
 0x6c1   :  { %v1278_v10 = vpop.f32.mrf.mxu3 }
 0x6c2   :  { %v2299_v49 = vadd.f32 %v1278_v10, %v1104_v23 }
 0x6c4   :  { %v1282_v54 = vmul.f32 %v2299_v49, %v2299_v49 }
 0x6c6   :  { %v1283_v51 = vsel %vm1151_vm1, %v1282_v54, 0.0 }
 0x6c7   :  { %1284 = vadd.xlane.f32.xlu1 %v1283_v51 }
 0x6c9   :  { %v1280_v52 = vpop.f32.mrf.mxu3 }
 0x6dd   :  { %s1617_s9 = spop %1616 }
 0x6de   :  { %s1162_s13 = smax.f32 %s1881_s12, %s1617_s9 }
 0x6df   :  { %v1163_v2 = vstv %s1162_s13 }
 0x6e0   :  { %1685 = vrsqrt.f32 %v1163_v2  ;;  %vm1170_vm2 = vweird.f32 %v1163_v2 }
 0x6e6   :  { %v1686_v31 = vpop.eup %1685 }
 0x6e7   :  { %v1165_v47 = vmul.f32 %v1686_v31, %v1163_v2  ;;  %vm1171_vm3 = vweird.f32 %v1686_v31 }
 0x6e8   :  { %vm1172_vm4 = vmor %vm1170_vm2, %vm1171_vm3 }
 0x6e9   :  { %v1166_v57 = vmul.f32 %v1686_v31, %v1165_v47 }
 0x6eb   :  { %v1167_v16 = vmul.f32 0.5, %v1166_v57 }
 0x6ed   :  { %v1168_v58 = vsub.f32 1.5, %v1167_v16 }
 0x6ef   :  { %v1169_v61 = vmul.f32 %v1686_v31, %v1168_v58 }
 0x6f1   :  { %v1173_v7 = vsel %vm1172_vm4, %v1686_v31, %v1169_v61 }
 0x6f2   :  { %1618 = vpush %v1173_v7 }
 0x723   :  { %s1619_s14 = spop %1618 }
 0x724   :  { %v1175_v26 = vstv %s1619_s14 }
 0x725   :  { %v1176_v50 = vmul.f32 %v1175_v26, %v1147_v29 }
 0x727   :  { %1177 = vst.msk [vmem:[#allocation13] sm:$0xf] %vm1151_vm1, %v1176_v50 }
 0x72a   :  { %v1219_v60 = vpop.xlane.xlu0 %1218 }
 0x72b   :  { %v1220_v63 = vrot.slane %v1219_v60, 4 }
 0x72d   :  { %v1221_v48 = vadd.f32 %v1220_v63, %v1219_v60 }
 0x72f   :  { %v1222_v5 = vrot.slane %v1221_v48, 2 }
 0x731   :  { %v1223_v32 = vadd.f32 %v1222_v5, %v1221_v48 }
 0x733   :  { %v1224_v42 = vrot.slane %v1223_v32, 1 }
 0x735   :  { %v1344_v35 = vpop.f32.mrf.mxu1  ;;  %v1225_v6 = vadd.f32 %v1224_v42, %v1223_v32 }
 0x736   :  { %v2306_v1 = vadd.f32 %v1344_v35, %v1104_v23 }
 0x737   :  { %1620 = vpush %v1225_v6 }
 0x738   :  { %v1348_v40 = vmul.f32 %v2306_v1, %v2306_v1 }
 0x73a   :  { %v1349_v8 = vsel %vm1151_vm1, %v1348_v40, 0.0  ;;  %v1285_v25 = vpop.xlane.xlu1 %1284 }
 0x73b   :  { %1350 = vadd.xlane.f32.xlu2 %v1349_v8  ;;  %v1286_v13 = vrot.slane %v1285_v25, 4 }
 0x73d   :  { %v1346_v37 = vpop.f32.mrf.mxu1  ;;  %v1287_v56 = vadd.f32 %v1286_v13, %v1285_v25 }
 0x73f   :  { %v1288_v55 = vrot.slane %v1287_v56, 2 }
 0x741   :  { %v1289_v19 = vadd.f32 %v1288_v55, %v1287_v56 }
 0x743   :  { %v1290_v11 = vrot.slane %v1289_v19, 1 }
 0x745   :  { %v1291_v22 = vadd.f32 %v1290_v11, %v1289_v19 }
 0x768   :  { %s1621_s2 = spop %1620 }
 0x769   :  { %s1227_s15 = smax.f32 %s1881_s12, %s1621_s2 }
 0x76a   :  { %v1228_v15 = vstv %s1227_s15 }
 0x76b   :  { %1687 = vrsqrt.f32 %v1228_v15  ;;  %vm1235_vm6 = vweird.f32 %v1228_v15 }
 0x771   :  { %v1688_v9 = vpop.eup %1687 }
 0x772   :  { %v1230_v0 = vmul.f32 %v1688_v9, %v1228_v15  ;;  %vm1236_vm5 = vweird.f32 %v1688_v9 }
 0x773   :  { %vm1237_vm7 = vmor %vm1235_vm6, %vm1236_vm5 }
 0x774   :  { %v1231_v14 = vmul.f32 %v1688_v9, %v1230_v0 }
 0x776   :  { %v1232_v4 = vmul.f32 0.5, %v1231_v14 }
 0x778   :  { %v1233_v34 = vsub.f32 1.5, %v1232_v4 }
 0x77a   :  { %v1234_v3 = vmul.f32 %v1688_v9, %v1233_v34 }
 0x77c   :  { %v1238_v20 = vsel %vm1237_vm7, %v1688_v9, %v1234_v3 }
 0x77d   :  { %1622 = vpush %v1238_v20 }
 0x77e   :  { %1624 = vpush %v1291_v22 }
 0x7ae   :  { %s1623_s0 = spop %1622  ;;  %v1351_v28 = vpop.xlane.xlu2 %1350 }
 0x7af   :  { %v1240_v23 = vstv %s1623_s0  ;;  %s1625_s16 = spop %1624  ;;  %v1352_v33 = vrot.slane %v1351_v28, 4 }
 0x7b0   :  { %v1241_v29 = vmul.f32 %v1240_v23, %v2293_v30  ;;  %s1293_s17 = smax.f32 %s1881_s12, %s1625_s16 }
 0x7b1   :  { %v1294_v36 = vstv %s1293_s17  ;;  %v1353_v53 = vadd.f32 %v1352_v33, %v1351_v28 }
 0x7b2   :  { %1243 = vst.msk [vmem:[#allocation13 + $0x4] sm:$0xf] %vm1151_vm1, %v1241_v29  ;;  %1689 = vrsqrt.f32 %v1294_v36  ;;  %vm1301_vm9 = vweird.f32 %v1294_v36 }
 0x7b3   :  { %v1354_v38 = vrot.slane %v1353_v53, 2 }
 0x7b5   :  { %v1355_v43 = vadd.f32 %v1354_v38, %v1353_v53 }
 0x7b7   :  { %v1356_v27 = vrot.slane %v1355_v43, 1 }
 0x7b8   :  { %v1690_v39 = vpop.eup %1689 }
 0x7b9   :  { %v1296_v41 = vmul.f32 %v1690_v39, %v1294_v36  ;;  %vm1302_vm8 = vweird.f32 %v1690_v39  ;;  %v1357_v21 = vadd.f32 %v1356_v27, %v1355_v43 }
 0x7ba   :  { %vm1303_vm10 = vmor %vm1301_vm9, %vm1302_vm8 }
 0x7bb   :  { %v1297_v18 = vmul.f32 %v1690_v39, %v1296_v41 }
 0x7bd   :  { %v1298_v17 = vmul.f32 0.5, %v1297_v18 }
 0x7bf   :  { %v1299_v44 = vsub.f32 1.5, %v1298_v17 }
 0x7c1   :  { %v1300_v12 = vmul.f32 %v1690_v39, %v1299_v44 }
 0x7c3   :  { %v1304_v24 = vsel %vm1303_vm10, %v1690_v39, %v1300_v12 }
 0x7c4   :  { %1626 = vpush %v1304_v24 }
 0x7c5   :  { %1628 = vpush %v1357_v21 }
 0x7f5   :  { %s1627_s18 = spop %1626 }
 0x7f6   :  { %v1306_v30 = vstv %s1627_s18  ;;  %s1629_s1 = spop %1628 }
 0x7f7   :  { %v1307_v59 = vmul.f32 %v1306_v30, %v2299_v49  ;;  %s1359_s19 = smax.f32 %s1881_s12, %s1629_s1 }
 0x7f8   :  { %v1360_v62 = vstv %s1359_s19 }
 0x7f9   :  { %1309 = vst.msk [vmem:[#allocation13 + $0x8] sm:$0xf] %vm1151_vm1, %v1307_v59  ;;  %1691 = vrsqrt.f32 %v1360_v62  ;;  %vm1367_vm12 = vweird.f32 %v1360_v62 }
 0x7ff   :  { %v1692_v45 = vpop.eup %1691 }
 0x800   :  { %v1362_v46 = vmul.f32 %v1692_v45, %v1360_v62  ;;  %vm1368_vm11 = vweird.f32 %v1692_v45 }
 0x801   :  { %vm1369_vm13 = vmor %vm1367_vm12, %vm1368_vm11 }
 0x802   :  { %v1363_v10 = vmul.f32 %v1692_v45, %v1362_v46 }
 0x804   :  { %v1364_v54 = vmul.f32 0.5, %v1363_v10 }
 0x806   :  { %v1365_v51 = vsub.f32 1.5, %v1364_v54 }
 0x808   :  { %v1366_v52 = vmul.f32 %v1692_v45, %v1365_v51 }
 0x80a   :  { %v1370_v2 = vsel %vm1369_vm13, %v1692_v45, %v1366_v52 }
 0x80b   :  { %1630 = vpush %v1370_v2 }
 0x83c   :  { %s1631_s7 = spop %1630 }
 0x83d   :  { %v1372_v49 = vstv %s1631_s7 }
 0x83e   :  { %v1373_v31 = vmul.f32 %v1372_v49, %v2306_v1 }
 0x840   :  { %1375 = vst.msk [vmem:[#allocation13 + $0xc] sm:$0xf] %vm1151_vm1, %v1373_v31 }
 0x841   :  { %1388 = dma.vmem_to_hbm [thread:$0]  %s1381_s23, 256, %s1383_s6, [#allocation4], %s1872_s21, %s1872_s21, %s1873_s22  }
 0x842   :  { %1869 = dma.done.wait [#allocation4], 256  }
 0x843   :  { %1870 = vsyncadd [#allocation4], 4294967040 }
 0x844   :  { %1393 = vsyncpa [#allocation3], 1 }
 0x845   :  { %1394 = vsyncpa [#allocation6], 1 }
 0x846   :  { %1395 = vsyncpa [#allocation9], 1 }
 0x847   :  { %1396 = vsyncpa [#allocation12], 1 }
 0x848   :  { %1397 = vsyncpa [#allocation4], 1 }

</bundles_post_ra>
